<compile_context>
chip_gen: v5e
topology: v5e:2x2
jax: 0.10.0
libtpu: 0.0.40
codegen_flags: <defaults>
</compile_context>

<pallas_src>
import functools

import jax
import jax.numpy as jnp
from jax.experimental import pallas as pl
from jax.experimental.pallas import tpu as pltpu


def spatial_attention_kernel(x_ref, w_ref, b_ref, out_ref, *, width):
    # x_ref:   (1, C, K) VMEM, K = H*W (lane-dense flattened spatial)
    # w_ref:   (98,)     SMEM, conv weight flattened as [ci, kh, kw]
    # b_ref:   (1,)      SMEM, conv bias
    # out_ref: (1, C, K) VMEM
    _, C, K = x_ref.shape
    W = width
    PAD = 3 * W + 3                      # enough zeros for dh in [-3,3], dw in [-3,3]

    x = x_ref[0]                         # (C, K)
    xf = x.astype(jnp.float32)           # no-op for f32 inputs; keeps reduce in f32

    # Channel reduce -> two tiny planes in the flat layout.
    avg = jnp.sum(xf, axis=0, keepdims=True) * (1.0 / C)     # (1, K)
    mx = jnp.max(xf, axis=0, keepdims=True)                   # (1, K)

    # Column index of each flattened pixel (f32 on the VPU; the +0.5 guard makes
    # the floor-division exact for all realistic H, W).
    idx = jax.lax.broadcasted_iota(jnp.int32, (1, K), 1).astype(jnp.float32)
    col = idx - jnp.floor((idx + 0.5) / W) * W                 # in [0, W)

    # Per-dw column-validity masks (7, shared by both planes).
    masks = []
    for j in range(7):
        dw = j - 3
        lo, hi = max(0, dw), min(W - 1, W - 1 + dw)
        masks.append((col >= lo) & (col <= hi))

    # Hoisted out of the tap loop: per (plane, dw) column-masked + zero-padded
    # flat planes.  A lane slice of these at offset PAD + dh*W + dw is exactly
    # the (zero-extended) conv input plane(h+dh, w+dw) for every output pixel.
    zpad = jnp.zeros((1, PAD), jnp.float32)
    planes = (avg, mx)
    padded = []
    for ci in range(2):
        per_dw = []
        for j in range(7):
            per_dw.append(jnp.concatenate(
                [zpad, jnp.where(masks[j], planes[ci], 0.0), zpad], axis=1))
        padded.append(per_dw)

    # 98 taps = static lane slice + SMEM-scalar * vector MAC, 4 partial accs.
    accs = [jnp.zeros((1, K), jnp.float32) for _ in range(4)]
    t = 0
    for ci in range(2):
        for j in range(7):               # kw
            dw = j - 3
            pm = padded[ci][j]
            for i in range(7):           # kh
                dh = i - 3
                wgt = w_ref[ci * 49 + i * 7 + j]
                off = PAD + dh * W + dw
                accs[t % 4] = accs[t % 4] + wgt * pm[:, off:off + K]
                t += 1

    att_pre = (accs[0] + accs[1]) + (accs[2] + accs[3]) + b_ref[0]
    att = jax.nn.sigmoid(att_pre)        # (1, K), exp + reciprocal on the EUP

    out_ref[0] = (x * att).astype(out_ref.dtype)


def spatial_attention(x_nchw, w_oihw, bias):
    """x: (N,C,H,W) f32, w: (1,2,7,7) f32 (PyTorch OIHW), bias: (1,) f32."""
    N, C, H, W = x_nchw.shape
    assert w_oihw.shape == (1, 2, 7, 7)
    K = H * W

    x_flat = x_nchw.reshape(N, C, K)                     # free, contiguous reshape
    w_flat = w_oihw.reshape(-1).astype(jnp.float32)      # (98,) = [ci, kh, kw]
    b_flat = bias.reshape(1).astype(jnp.float32)

    out_flat = pl.pallas_call(
        functools.partial(spatial_attention_kernel, width=W),
        out_shape=jax.ShapeDtypeStruct((N, C, K), x_nchw.dtype),
        grid_spec=pltpu.PrefetchScalarGridSpec(
            num_scalar_prefetch=0,
            grid=(N,),
            in_specs=[
                pl.BlockSpec((1, C, K), lambda n: (n, 0, 0)),
                pl.BlockSpec(memory_space=pltpu.MemorySpace.SMEM),
                pl.BlockSpec(memory_space=pltpu.MemorySpace.SMEM),
            ],
            out_specs=pl.BlockSpec((1, C, K), lambda n: (n, 0, 0)),
        ),
        compiler_params=pltpu.CompilerParams(
            dimension_semantics=("parallel",),
            vmem_limit_bytes=64 * 1024 * 1024,
        ),
    )(x_flat, w_flat, b_flat)

    return out_flat.reshape(N, C, H, W)                  # free reshape back


def spatial_attention_ref(x, w, b):
    """Pure-JAX reference of the PyTorch module."""
    avg = jnp.mean(x, axis=1, keepdims=True)
    mx = jnp.max(x, axis=1, keepdims=True)
    cat = jnp.concatenate([avg, mx], axis=1)             # (N, 2, H, W)
    att = jax.lax.conv_general_dilated(
        cat, w, window_strides=(1, 1), padding=((3, 3), (3, 3)),
        dimension_numbers=("NCHW", "OIHW", "NCHW")) + b.reshape(1, 1, 1, 1)
    att = jax.nn.sigmoid(att)
    return x * att


if __name__ == "__main__":
    key = jax.random.PRNGKey(0)
    k1, k2, k3 = jax.random.split(key, 3)

    N, C, H, W = 2, 4, 16, 16
    x = jax.random.normal(k1, (N, C, H, W), jnp.float32)
    w = jax.random.normal(k2, (1, 2, 7, 7), jnp.float32) * 0.1
    b = jax.random.normal(k3, (1,), jnp.float32) * 0.1

    out = spatial_attention(x, w, b)
    out = jax.block_until_ready(out)
    assert out.shape == (N, C, H, W), out.shape

    ref = spatial_attention_ref(x, w, b)
    err = float(jnp.max(jnp.abs(out - ref)))
    assert jnp.allclose(out, ref, atol=1e-4, rtol=1e-4), f"max abs err {err}"

    print("KERNEL_OK")
</pallas_src>

<mosaic_0001>
module attributes {stable_mosaic.version = 11 : i64} {
  func.func @spatial_attention_kernel(%arg0: i32, %arg1: memref<1x4x256xf32, #tpu.memory_space<vmem>>, %arg2: memref<98xf32, #tpu.memory_space<smem>>, %arg3: memref<1xf32, #tpu.memory_space<smem>>, %arg4: memref<1x4x256xf32, #tpu.memory_space<vmem>>) attributes {dimension_semantics = [#tpu.dimension_semantics<parallel>], iteration_bounds = array<i64: 2>, scalar_prefetch = 0 : i64, scratch_operands = 0 : i64, tpu.core_type = #tpu.core_type<tc>, window_params = [{transform_indices = @transform_0, window_bounds = array<i64: 1, 4, 256>}, {transform_indices = @transform_1, window_bounds = array<i64: 98>}, {transform_indices = @transform_2, window_bounds = array<i64: 1>}, {transform_indices = @transform_3, window_bounds = array<i64: 1, 4, 256>}]} {
    %c0 = arith.constant 0 : index
    %c0_0 = arith.constant 0 : index
    %c0_1 = arith.constant 0 : index
    %0 = vector.load %arg1[%c0, %c0_0, %c0_1] : memref<1x4x256xf32, #tpu.memory_space<vmem>>, vector<1x4x256xf32>
    %1 = vector.shape_cast %0 : vector<1x4x256xf32> to vector<4x256xf32>
    %cst = arith.constant dense<0.000000e+00> : vector<256xf32>
    %2 = vector.multi_reduction <add>, %1, %cst [0] : vector<4x256xf32> to vector<256xf32>
    %3 = vector.shape_cast %2 : vector<256xf32> to vector<1x256xf32>
    %cst_2 = arith.constant 2.500000e-01 : f32
    %4 = vector.broadcast %cst_2 : f32 to vector<1x256xf32>
    %5 = arith.mulf %3, %4 : vector<1x256xf32>
    %cst_3 = arith.constant dense<0xFF800000> : vector<256xf32>
    %6 = vector.multi_reduction <maximumf>, %1, %cst_3 [0] : vector<4x256xf32> to vector<256xf32>
    %7 = vector.shape_cast %6 : vector<256xf32> to vector<1x256xf32>
    %8 = tpu.iota {dimensions = array<i32: 1>} : vector<1x256xi32>
    %9 = arith.sitofp %8 : vector<1x256xi32> to vector<1x256xf32>
    %cst_4 = arith.constant 5.000000e-01 : f32
    %10 = vector.broadcast %cst_4 : f32 to vector<1x256xf32>
    %11 = arith.addf %9, %10 : vector<1x256xf32>
    %cst_5 = arith.constant 1.600000e+01 : f32
    %12 = vector.broadcast %cst_5 : f32 to vector<1x256xf32>
    %13 = arith.divf %11, %12 : vector<1x256xf32>
    %14 = math.floor %13 : vector<1x256xf32>
    %cst_6 = arith.constant 1.600000e+01 : f32
    %15 = vector.broadcast %cst_6 : f32 to vector<1x256xf32>
    %16 = arith.mulf %14, %15 : vector<1x256xf32>
    %17 = arith.subf %9, %16 : vector<1x256xf32>
    %cst_7 = arith.constant 0.000000e+00 : f32
    %18 = vector.broadcast %cst_7 : f32 to vector<1x256xf32>
    %19 = arith.cmpf oge, %17, %18 : vector<1x256xf32>
    %cst_8 = arith.constant 1.200000e+01 : f32
    %20 = vector.broadcast %cst_8 : f32 to vector<1x256xf32>
    %21 = arith.cmpf ole, %17, %20 : vector<1x256xf32>
    %22 = arith.andi %19, %21 : vector<1x256xi1>
    %cst_9 = arith.constant 0.000000e+00 : f32
    %23 = vector.broadcast %cst_9 : f32 to vector<1x256xf32>
    %24 = arith.cmpf oge, %17, %23 : vector<1x256xf32>
    %cst_10 = arith.constant 1.300000e+01 : f32
    %25 = vector.broadcast %cst_10 : f32 to vector<1x256xf32>
    %26 = arith.cmpf ole, %17, %25 : vector<1x256xf32>
    %27 = arith.andi %24, %26 : vector<1x256xi1>
    %cst_11 = arith.constant 0.000000e+00 : f32
    %28 = vector.broadcast %cst_11 : f32 to vector<1x256xf32>
    %29 = arith.cmpf oge, %17, %28 : vector<1x256xf32>
    %cst_12 = arith.constant 1.400000e+01 : f32
    %30 = vector.broadcast %cst_12 : f32 to vector<1x256xf32>
    %31 = arith.cmpf ole, %17, %30 : vector<1x256xf32>
    %32 = arith.andi %29, %31 : vector<1x256xi1>
    %cst_13 = arith.constant 0.000000e+00 : f32
    %33 = vector.broadcast %cst_13 : f32 to vector<1x256xf32>
    %34 = arith.cmpf oge, %17, %33 : vector<1x256xf32>
    %cst_14 = arith.constant 1.500000e+01 : f32
    %35 = vector.broadcast %cst_14 : f32 to vector<1x256xf32>
    %36 = arith.cmpf ole, %17, %35 : vector<1x256xf32>
    %37 = arith.andi %34, %36 : vector<1x256xi1>
    %cst_15 = arith.constant 1.000000e+00 : f32
    %38 = vector.broadcast %cst_15 : f32 to vector<1x256xf32>
    %39 = arith.cmpf oge, %17, %38 : vector<1x256xf32>
    %cst_16 = arith.constant 1.500000e+01 : f32
    %40 = vector.broadcast %cst_16 : f32 to vector<1x256xf32>
    %41 = arith.cmpf ole, %17, %40 : vector<1x256xf32>
    %42 = arith.andi %39, %41 : vector<1x256xi1>
    %cst_17 = arith.constant 2.000000e+00 : f32
    %43 = vector.broadcast %cst_17 : f32 to vector<1x256xf32>
    %44 = arith.cmpf oge, %17, %43 : vector<1x256xf32>
    %cst_18 = arith.constant 1.500000e+01 : f32
    %45 = vector.broadcast %cst_18 : f32 to vector<1x256xf32>
    %46 = arith.cmpf ole, %17, %45 : vector<1x256xf32>
    %47 = arith.andi %44, %46 : vector<1x256xi1>
    %cst_19 = arith.constant 3.000000e+00 : f32
    %48 = vector.broadcast %cst_19 : f32 to vector<1x256xf32>
    %49 = arith.cmpf oge, %17, %48 : vector<1x256xf32>
    %cst_20 = arith.constant 1.500000e+01 : f32
    %50 = vector.broadcast %cst_20 : f32 to vector<1x256xf32>
    %51 = arith.cmpf ole, %17, %50 : vector<1x256xf32>
    %52 = arith.andi %49, %51 : vector<1x256xi1>
    %cst_21 = arith.constant 0.000000e+00 : f32
    %53 = vector.broadcast %cst_21 : f32 to vector<1x51xf32>
    %cst_22 = arith.constant 0.000000e+00 : f32
    %54 = vector.broadcast %cst_22 : f32 to vector<1x256xf32>
    %55 = arith.select %22, %5, %54 : vector<1x256xi1>, vector<1x256xf32>
    %56 = tpu.concatenate %53, %55, %53 in 1 : vector<1x51xf32>, vector<1x256xf32>, vector<1x51xf32> -> vector<1x358xf32>
    %cst_23 = arith.constant 0.000000e+00 : f32
    %57 = vector.broadcast %cst_23 : f32 to vector<1x256xf32>
    %58 = arith.select %27, %5, %57 : vector<1x256xi1>, vector<1x256xf32>
    %59 = tpu.concatenate %53, %58, %53 in 1 : vector<1x51xf32>, vector<1x256xf32>, vector<1x51xf32> -> vector<1x358xf32>
    %cst_24 = arith.constant 0.000000e+00 : f32
    %60 = vector.broadcast %cst_24 : f32 to vector<1x256xf32>
    %61 = arith.select %32, %5, %60 : vector<1x256xi1>, vector<1x256xf32>
    %62 = tpu.concatenate %53, %61, %53 in 1 : vector<1x51xf32>, vector<1x256xf32>, vector<1x51xf32> -> vector<1x358xf32>
    %cst_25 = arith.constant 0.000000e+00 : f32
    %63 = vector.broadcast %cst_25 : f32 to vector<1x256xf32>
    %64 = arith.select %37, %5, %63 : vector<1x256xi1>, vector<1x256xf32>
    %65 = tpu.concatenate %53, %64, %53 in 1 : vector<1x51xf32>, vector<1x256xf32>, vector<1x51xf32> -> vector<1x358xf32>
    %cst_26 = arith.constant 0.000000e+00 : f32
    %66 = vector.broadcast %cst_26 : f32 to vector<1x256xf32>
    %67 = arith.select %42, %5, %66 : vector<1x256xi1>, vector<1x256xf32>
    %68 = tpu.concatenate %53, %67, %53 in 1 : vector<1x51xf32>, vector<1x256xf32>, vector<1x51xf32> -> vector<1x358xf32>
    %cst_27 = arith.constant 0.000000e+00 : f32
    %69 = vector.broadcast %cst_27 : f32 to vector<1x256xf32>
    %70 = arith.select %47, %5, %69 : vector<1x256xi1>, vector<1x256xf32>
    %71 = tpu.concatenate %53, %70, %53 in 1 : vector<1x51xf32>, vector<1x256xf32>, vector<1x51xf32> -> vector<1x358xf32>
    %cst_28 = arith.constant 0.000000e+00 : f32
    %72 = vector.broadcast %cst_28 : f32 to vector<1x256xf32>
    %73 = arith.select %52, %5, %72 : vector<1x256xi1>, vector<1x256xf32>
    %74 = tpu.concatenate %53, %73, %53 in 1 : vector<1x51xf32>, vector<1x256xf32>, vector<1x51xf32> -> vector<1x358xf32>
    %cst_29 = arith.constant 0.000000e+00 : f32
    %75 = vector.broadcast %cst_29 : f32 to vector<1x256xf32>
    %76 = arith.select %22, %7, %75 : vector<1x256xi1>, vector<1x256xf32>
    %77 = tpu.concatenate %53, %76, %53 in 1 : vector<1x51xf32>, vector<1x256xf32>, vector<1x51xf32> -> vector<1x358xf32>
    %cst_30 = arith.constant 0.000000e+00 : f32
    %78 = vector.broadcast %cst_30 : f32 to vector<1x256xf32>
    %79 = arith.select %27, %7, %78 : vector<1x256xi1>, vector<1x256xf32>
    %80 = tpu.concatenate %53, %79, %53 in 1 : vector<1x51xf32>, vector<1x256xf32>, vector<1x51xf32> -> vector<1x358xf32>
    %cst_31 = arith.constant 0.000000e+00 : f32
    %81 = vector.broadcast %cst_31 : f32 to vector<1x256xf32>
    %82 = arith.select %32, %7, %81 : vector<1x256xi1>, vector<1x256xf32>
    %83 = tpu.concatenate %53, %82, %53 in 1 : vector<1x51xf32>, vector<1x256xf32>, vector<1x51xf32> -> vector<1x358xf32>
    %cst_32 = arith.constant 0.000000e+00 : f32
    %84 = vector.broadcast %cst_32 : f32 to vector<1x256xf32>
    %85 = arith.select %37, %7, %84 : vector<1x256xi1>, vector<1x256xf32>
    %86 = tpu.concatenate %53, %85, %53 in 1 : vector<1x51xf32>, vector<1x256xf32>, vector<1x51xf32> -> vector<1x358xf32>
    %cst_33 = arith.constant 0.000000e+00 : f32
    %87 = vector.broadcast %cst_33 : f32 to vector<1x256xf32>
    %88 = arith.select %42, %7, %87 : vector<1x256xi1>, vector<1x256xf32>
    %89 = tpu.concatenate %53, %88, %53 in 1 : vector<1x51xf32>, vector<1x256xf32>, vector<1x51xf32> -> vector<1x358xf32>
    %cst_34 = arith.constant 0.000000e+00 : f32
    %90 = vector.broadcast %cst_34 : f32 to vector<1x256xf32>
    %91 = arith.select %47, %7, %90 : vector<1x256xi1>, vector<1x256xf32>
    %92 = tpu.concatenate %53, %91, %53 in 1 : vector<1x51xf32>, vector<1x256xf32>, vector<1x51xf32> -> vector<1x358xf32>
    %cst_35 = arith.constant 0.000000e+00 : f32
    %93 = vector.broadcast %cst_35 : f32 to vector<1x256xf32>
    %94 = arith.select %52, %7, %93 : vector<1x256xi1>, vector<1x256xf32>
    %95 = tpu.concatenate %53, %94, %53 in 1 : vector<1x51xf32>, vector<1x256xf32>, vector<1x51xf32> -> vector<1x358xf32>
    %cst_36 = arith.constant 0.000000e+00 : f32
    %96 = vector.broadcast %cst_36 : f32 to vector<1x256xf32>
    %cst_37 = arith.constant 0.000000e+00 : f32
    %97 = vector.broadcast %cst_37 : f32 to vector<1x256xf32>
    %cst_38 = arith.constant 0.000000e+00 : f32
    %98 = vector.broadcast %cst_38 : f32 to vector<1x256xf32>
    %cst_39 = arith.constant 0.000000e+00 : f32
    %99 = vector.broadcast %cst_39 : f32 to vector<1x256xf32>
    %c0_40 = arith.constant 0 : index
    %100 = memref.load %arg2[%c0_40] : memref<98xf32, #tpu.memory_space<smem>>
    %101 = vector.extract_strided_slice %56 {offsets = [0, 0], sizes = [1, 256], strides = [1, 1]} : vector<1x358xf32> to vector<1x256xf32>
    %102 = vector.broadcast %100 : f32 to vector<1x256xf32>
    %103 = arith.mulf %102, %101 : vector<1x256xf32>
    %104 = arith.addf %96, %103 : vector<1x256xf32>
    %c7 = arith.constant 7 : index
    %105 = memref.load %arg2[%c7] : memref<98xf32, #tpu.memory_space<smem>>
    %106 = vector.extract_strided_slice %56 {offsets = [0, 16], sizes = [1, 256], strides = [1, 1]} : vector<1x358xf32> to vector<1x256xf32>
    %107 = vector.broadcast %105 : f32 to vector<1x256xf32>
    %108 = arith.mulf %107, %106 : vector<1x256xf32>
    %109 = arith.addf %97, %108 : vector<1x256xf32>
    %c14 = arith.constant 14 : index
    %110 = memref.load %arg2[%c14] : memref<98xf32, #tpu.memory_space<smem>>
    %111 = vector.extract_strided_slice %56 {offsets = [0, 32], sizes = [1, 256], strides = [1, 1]} : vector<1x358xf32> to vector<1x256xf32>
    %112 = vector.broadcast %110 : f32 to vector<1x256xf32>
    %113 = arith.mulf %112, %111 : vector<1x256xf32>
    %114 = arith.addf %98, %113 : vector<1x256xf32>
    %c21 = arith.constant 21 : index
    %115 = memref.load %arg2[%c21] : memref<98xf32, #tpu.memory_space<smem>>
    %116 = vector.extract_strided_slice %56 {offsets = [0, 48], sizes = [1, 256], strides = [1, 1]} : vector<1x358xf32> to vector<1x256xf32>
    %117 = vector.broadcast %115 : f32 to vector<1x256xf32>
    %118 = arith.mulf %117, %116 : vector<1x256xf32>
    %119 = arith.addf %99, %118 : vector<1x256xf32>
    %c28 = arith.constant 28 : index
    %120 = memref.load %arg2[%c28] : memref<98xf32, #tpu.memory_space<smem>>
    %121 = vector.extract_strided_slice %56 {offsets = [0, 64], sizes = [1, 256], strides = [1, 1]} : vector<1x358xf32> to vector<1x256xf32>
    %122 = vector.broadcast %120 : f32 to vector<1x256xf32>
    %123 = arith.mulf %122, %121 : vector<1x256xf32>
    %124 = arith.addf %104, %123 : vector<1x256xf32>
    %c35 = arith.constant 35 : index
    %125 = memref.load %arg2[%c35] : memref<98xf32, #tpu.memory_space<smem>>
    %126 = vector.extract_strided_slice %56 {offsets = [0, 80], sizes = [1, 256], strides = [1, 1]} : vector<1x358xf32> to vector<1x256xf32>
    %127 = vector.broadcast %125 : f32 to vector<1x256xf32>
    %128 = arith.mulf %127, %126 : vector<1x256xf32>
    %129 = arith.addf %109, %128 : vector<1x256xf32>
    %c42 = arith.constant 42 : index
    %130 = memref.load %arg2[%c42] : memref<98xf32, #tpu.memory_space<smem>>
    %131 = vector.extract_strided_slice %56 {offsets = [0, 96], sizes = [1, 256], strides = [1, 1]} : vector<1x358xf32> to vector<1x256xf32>
    %132 = vector.broadcast %130 : f32 to vector<1x256xf32>
    %133 = arith.mulf %132, %131 : vector<1x256xf32>
    %134 = arith.addf %114, %133 : vector<1x256xf32>
    %c1 = arith.constant 1 : index
    %135 = memref.load %arg2[%c1] : memref<98xf32, #tpu.memory_space<smem>>
    %136 = vector.extract_strided_slice %59 {offsets = [0, 1], sizes = [1, 256], strides = [1, 1]} : vector<1x358xf32> to vector<1x256xf32>
    %137 = vector.broadcast %135 : f32 to vector<1x256xf32>
    %138 = arith.mulf %137, %136 : vector<1x256xf32>
    %139 = arith.addf %119, %138 : vector<1x256xf32>
    %c8 = arith.constant 8 : index
    %140 = memref.load %arg2[%c8] : memref<98xf32, #tpu.memory_space<smem>>
    %141 = vector.extract_strided_slice %59 {offsets = [0, 17], sizes = [1, 256], strides = [1, 1]} : vector<1x358xf32> to vector<1x256xf32>
    %142 = vector.broadcast %140 : f32 to vector<1x256xf32>
    %143 = arith.mulf %142, %141 : vector<1x256xf32>
    %144 = arith.addf %124, %143 : vector<1x256xf32>
    %c15 = arith.constant 15 : index
    %145 = memref.load %arg2[%c15] : memref<98xf32, #tpu.memory_space<smem>>
    %146 = vector.extract_strided_slice %59 {offsets = [0, 33], sizes = [1, 256], strides = [1, 1]} : vector<1x358xf32> to vector<1x256xf32>
    %147 = vector.broadcast %145 : f32 to vector<1x256xf32>
    %148 = arith.mulf %147, %146 : vector<1x256xf32>
    %149 = arith.addf %129, %148 : vector<1x256xf32>
    %c22 = arith.constant 22 : index
    %150 = memref.load %arg2[%c22] : memref<98xf32, #tpu.memory_space<smem>>
    %151 = vector.extract_strided_slice %59 {offsets = [0, 49], sizes = [1, 256], strides = [1, 1]} : vector<1x358xf32> to vector<1x256xf32>
    %152 = vector.broadcast %150 : f32 to vector<1x256xf32>
    %153 = arith.mulf %152, %151 : vector<1x256xf32>
    %154 = arith.addf %134, %153 : vector<1x256xf32>
    %c29 = arith.constant 29 : index
    %155 = memref.load %arg2[%c29] : memref<98xf32, #tpu.memory_space<smem>>
    %156 = vector.extract_strided_slice %59 {offsets = [0, 65], sizes = [1, 256], strides = [1, 1]} : vector<1x358xf32> to vector<1x256xf32>
    %157 = vector.broadcast %155 : f32 to vector<1x256xf32>
    %158 = arith.mulf %157, %156 : vector<1x256xf32>
    %159 = arith.addf %139, %158 : vector<1x256xf32>
    %c36 = arith.constant 36 : index
    %160 = memref.load %arg2[%c36] : memref<98xf32, #tpu.memory_space<smem>>
    %161 = vector.extract_strided_slice %59 {offsets = [0, 81], sizes = [1, 256], strides = [1, 1]} : vector<1x358xf32> to vector<1x256xf32>
    %162 = vector.broadcast %160 : f32 to vector<1x256xf32>
    %163 = arith.mulf %162, %161 : vector<1x256xf32>
    %164 = arith.addf %144, %163 : vector<1x256xf32>
    %c43 = arith.constant 43 : index
    %165 = memref.load %arg2[%c43] : memref<98xf32, #tpu.memory_space<smem>>
    %166 = vector.extract_strided_slice %59 {offsets = [0, 97], sizes = [1, 256], strides = [1, 1]} : vector<1x358xf32> to vector<1x256xf32>
    %167 = vector.broadcast %165 : f32 to vector<1x256xf32>
    %168 = arith.mulf %167, %166 : vector<1x256xf32>
    %169 = arith.addf %149, %168 : vector<1x256xf32>
    %c2 = arith.constant 2 : index
    %170 = memref.load %arg2[%c2] : memref<98xf32, #tpu.memory_space<smem>>
    %171 = vector.extract_strided_slice %62 {offsets = [0, 2], sizes = [1, 256], strides = [1, 1]} : vector<1x358xf32> to vector<1x256xf32>
    %172 = vector.broadcast %170 : f32 to vector<1x256xf32>
    %173 = arith.mulf %172, %171 : vector<1x256xf32>
    %174 = arith.addf %154, %173 : vector<1x256xf32>
    %c9 = arith.constant 9 : index
    %175 = memref.load %arg2[%c9] : memref<98xf32, #tpu.memory_space<smem>>
    %176 = vector.extract_strided_slice %62 {offsets = [0, 18], sizes = [1, 256], strides = [1, 1]} : vector<1x358xf32> to vector<1x256xf32>
    %177 = vector.broadcast %175 : f32 to vector<1x256xf32>
    %178 = arith.mulf %177, %176 : vector<1x256xf32>
    %179 = arith.addf %159, %178 : vector<1x256xf32>
    %c16 = arith.constant 16 : index
    %180 = memref.load %arg2[%c16] : memref<98xf32, #tpu.memory_space<smem>>
    %181 = vector.extract_strided_slice %62 {offsets = [0, 34], sizes = [1, 256], strides = [1, 1]} : vector<1x358xf32> to vector<1x256xf32>
    %182 = vector.broadcast %180 : f32 to vector<1x256xf32>
    %183 = arith.mulf %182, %181 : vector<1x256xf32>
    %184 = arith.addf %164, %183 : vector<1x256xf32>
    %c23 = arith.constant 23 : index
    %185 = memref.load %arg2[%c23] : memref<98xf32, #tpu.memory_space<smem>>
    %186 = vector.extract_strided_slice %62 {offsets = [0, 50], sizes = [1, 256], strides = [1, 1]} : vector<1x358xf32> to vector<1x256xf32>
    %187 = vector.broadcast %185 : f32 to vector<1x256xf32>
    %188 = arith.mulf %187, %186 : vector<1x256xf32>
    %189 = arith.addf %169, %188 : vector<1x256xf32>
    %c30 = arith.constant 30 : index
    %190 = memref.load %arg2[%c30] : memref<98xf32, #tpu.memory_space<smem>>
    %191 = vector.extract_strided_slice %62 {offsets = [0, 66], sizes = [1, 256], strides = [1, 1]} : vector<1x358xf32> to vector<1x256xf32>
    %192 = vector.broadcast %190 : f32 to vector<1x256xf32>
    %193 = arith.mulf %192, %191 : vector<1x256xf32>
    %194 = arith.addf %174, %193 : vector<1x256xf32>
    %c37 = arith.constant 37 : index
    %195 = memref.load %arg2[%c37] : memref<98xf32, #tpu.memory_space<smem>>
    %196 = vector.extract_strided_slice %62 {offsets = [0, 82], sizes = [1, 256], strides = [1, 1]} : vector<1x358xf32> to vector<1x256xf32>
    %197 = vector.broadcast %195 : f32 to vector<1x256xf32>
    %198 = arith.mulf %197, %196 : vector<1x256xf32>
    %199 = arith.addf %179, %198 : vector<1x256xf32>
    %c44 = arith.constant 44 : index
    %200 = memref.load %arg2[%c44] : memref<98xf32, #tpu.memory_space<smem>>
    %201 = vector.extract_strided_slice %62 {offsets = [0, 98], sizes = [1, 256], strides = [1, 1]} : vector<1x358xf32> to vector<1x256xf32>
    %202 = vector.broadcast %200 : f32 to vector<1x256xf32>
    %203 = arith.mulf %202, %201 : vector<1x256xf32>
    %204 = arith.addf %184, %203 : vector<1x256xf32>
    %c3 = arith.constant 3 : index
    %205 = memref.load %arg2[%c3] : memref<98xf32, #tpu.memory_space<smem>>
    %206 = vector.extract_strided_slice %65 {offsets = [0, 3], sizes = [1, 256], strides = [1, 1]} : vector<1x358xf32> to vector<1x256xf32>
    %207 = vector.broadcast %205 : f32 to vector<1x256xf32>
    %208 = arith.mulf %207, %206 : vector<1x256xf32>
    %209 = arith.addf %189, %208 : vector<1x256xf32>
    %c10 = arith.constant 10 : index
    %210 = memref.load %arg2[%c10] : memref<98xf32, #tpu.memory_space<smem>>
    %211 = vector.extract_strided_slice %65 {offsets = [0, 19], sizes = [1, 256], strides = [1, 1]} : vector<1x358xf32> to vector<1x256xf32>
    %212 = vector.broadcast %210 : f32 to vector<1x256xf32>
    %213 = arith.mulf %212, %211 : vector<1x256xf32>
    %214 = arith.addf %194, %213 : vector<1x256xf32>
    %c17 = arith.constant 17 : index
    %215 = memref.load %arg2[%c17] : memref<98xf32, #tpu.memory_space<smem>>
    %216 = vector.extract_strided_slice %65 {offsets = [0, 35], sizes = [1, 256], strides = [1, 1]} : vector<1x358xf32> to vector<1x256xf32>
    %217 = vector.broadcast %215 : f32 to vector<1x256xf32>
    %218 = arith.mulf %217, %216 : vector<1x256xf32>
    %219 = arith.addf %199, %218 : vector<1x256xf32>
    %c24 = arith.constant 24 : index
    %220 = memref.load %arg2[%c24] : memref<98xf32, #tpu.memory_space<smem>>
    %221 = vector.extract_strided_slice %65 {offsets = [0, 51], sizes = [1, 256], strides = [1, 1]} : vector<1x358xf32> to vector<1x256xf32>
    %222 = vector.broadcast %220 : f32 to vector<1x256xf32>
    %223 = arith.mulf %222, %221 : vector<1x256xf32>
    %224 = arith.addf %204, %223 : vector<1x256xf32>
    %c31 = arith.constant 31 : index
    %225 = memref.load %arg2[%c31] : memref<98xf32, #tpu.memory_space<smem>>
    %226 = vector.extract_strided_slice %65 {offsets = [0, 67], sizes = [1, 256], strides = [1, 1]} : vector<1x358xf32> to vector<1x256xf32>
    %227 = vector.broadcast %225 : f32 to vector<1x256xf32>
    %228 = arith.mulf %227, %226 : vector<1x256xf32>
    %229 = arith.addf %209, %228 : vector<1x256xf32>
    %c38 = arith.constant 38 : index
    %230 = memref.load %arg2[%c38] : memref<98xf32, #tpu.memory_space<smem>>
    %231 = vector.extract_strided_slice %65 {offsets = [0, 83], sizes = [1, 256], strides = [1, 1]} : vector<1x358xf32> to vector<1x256xf32>
    %232 = vector.broadcast %230 : f32 to vector<1x256xf32>
    %233 = arith.mulf %232, %231 : vector<1x256xf32>
    %234 = arith.addf %214, %233 : vector<1x256xf32>
    %c45 = arith.constant 45 : index
    %235 = memref.load %arg2[%c45] : memref<98xf32, #tpu.memory_space<smem>>
    %236 = vector.extract_strided_slice %65 {offsets = [0, 99], sizes = [1, 256], strides = [1, 1]} : vector<1x358xf32> to vector<1x256xf32>
    %237 = vector.broadcast %235 : f32 to vector<1x256xf32>
    %238 = arith.mulf %237, %236 : vector<1x256xf32>
    %239 = arith.addf %219, %238 : vector<1x256xf32>
    %c4 = arith.constant 4 : index
    %240 = memref.load %arg2[%c4] : memref<98xf32, #tpu.memory_space<smem>>
    %241 = vector.extract_strided_slice %68 {offsets = [0, 4], sizes = [1, 256], strides = [1, 1]} : vector<1x358xf32> to vector<1x256xf32>
    %242 = vector.broadcast %240 : f32 to vector<1x256xf32>
    %243 = arith.mulf %242, %241 : vector<1x256xf32>
    %244 = arith.addf %224, %243 : vector<1x256xf32>
    %c11 = arith.constant 11 : index
    %245 = memref.load %arg2[%c11] : memref<98xf32, #tpu.memory_space<smem>>
    %246 = vector.extract_strided_slice %68 {offsets = [0, 20], sizes = [1, 256], strides = [1, 1]} : vector<1x358xf32> to vector<1x256xf32>
    %247 = vector.broadcast %245 : f32 to vector<1x256xf32>
    %248 = arith.mulf %247, %246 : vector<1x256xf32>
    %249 = arith.addf %229, %248 : vector<1x256xf32>
    %c18 = arith.constant 18 : index
    %250 = memref.load %arg2[%c18] : memref<98xf32, #tpu.memory_space<smem>>
    %251 = vector.extract_strided_slice %68 {offsets = [0, 36], sizes = [1, 256], strides = [1, 1]} : vector<1x358xf32> to vector<1x256xf32>
    %252 = vector.broadcast %250 : f32 to vector<1x256xf32>
    %253 = arith.mulf %252, %251 : vector<1x256xf32>
    %254 = arith.addf %234, %253 : vector<1x256xf32>
    %c25 = arith.constant 25 : index
    %255 = memref.load %arg2[%c25] : memref<98xf32, #tpu.memory_space<smem>>
    %256 = vector.extract_strided_slice %68 {offsets = [0, 52], sizes = [1, 256], strides = [1, 1]} : vector<1x358xf32> to vector<1x256xf32>
    %257 = vector.broadcast %255 : f32 to vector<1x256xf32>
    %258 = arith.mulf %257, %256 : vector<1x256xf32>
    %259 = arith.addf %239, %258 : vector<1x256xf32>
    %c32 = arith.constant 32 : index
    %260 = memref.load %arg2[%c32] : memref<98xf32, #tpu.memory_space<smem>>
    %261 = vector.extract_strided_slice %68 {offsets = [0, 68], sizes = [1, 256], strides = [1, 1]} : vector<1x358xf32> to vector<1x256xf32>
    %262 = vector.broadcast %260 : f32 to vector<1x256xf32>
    %263 = arith.mulf %262, %261 : vector<1x256xf32>
    %264 = arith.addf %244, %263 : vector<1x256xf32>
    %c39 = arith.constant 39 : index
    %265 = memref.load %arg2[%c39] : memref<98xf32, #tpu.memory_space<smem>>
    %266 = vector.extract_strided_slice %68 {offsets = [0, 84], sizes = [1, 256], strides = [1, 1]} : vector<1x358xf32> to vector<1x256xf32>
    %267 = vector.broadcast %265 : f32 to vector<1x256xf32>
    %268 = arith.mulf %267, %266 : vector<1x256xf32>
    %269 = arith.addf %249, %268 : vector<1x256xf32>
    %c46 = arith.constant 46 : index
    %270 = memref.load %arg2[%c46] : memref<98xf32, #tpu.memory_space<smem>>
    %271 = vector.extract_strided_slice %68 {offsets = [0, 100], sizes = [1, 256], strides = [1, 1]} : vector<1x358xf32> to vector<1x256xf32>
    %272 = vector.broadcast %270 : f32 to vector<1x256xf32>
    %273 = arith.mulf %272, %271 : vector<1x256xf32>
    %274 = arith.addf %254, %273 : vector<1x256xf32>
    %c5 = arith.constant 5 : index
    %275 = memref.load %arg2[%c5] : memref<98xf32, #tpu.memory_space<smem>>
    %276 = vector.extract_strided_slice %71 {offsets = [0, 5], sizes = [1, 256], strides = [1, 1]} : vector<1x358xf32> to vector<1x256xf32>
    %277 = vector.broadcast %275 : f32 to vector<1x256xf32>
    %278 = arith.mulf %277, %276 : vector<1x256xf32>
    %279 = arith.addf %259, %278 : vector<1x256xf32>
    %c12 = arith.constant 12 : index
    %280 = memref.load %arg2[%c12] : memref<98xf32, #tpu.memory_space<smem>>
    %281 = vector.extract_strided_slice %71 {offsets = [0, 21], sizes = [1, 256], strides = [1, 1]} : vector<1x358xf32> to vector<1x256xf32>
    %282 = vector.broadcast %280 : f32 to vector<1x256xf32>
    %283 = arith.mulf %282, %281 : vector<1x256xf32>
    %284 = arith.addf %264, %283 : vector<1x256xf32>
    %c19 = arith.constant 19 : index
    %285 = memref.load %arg2[%c19] : memref<98xf32, #tpu.memory_space<smem>>
    %286 = vector.extract_strided_slice %71 {offsets = [0, 37], sizes = [1, 256], strides = [1, 1]} : vector<1x358xf32> to vector<1x256xf32>
    %287 = vector.broadcast %285 : f32 to vector<1x256xf32>
    %288 = arith.mulf %287, %286 : vector<1x256xf32>
    %289 = arith.addf %269, %288 : vector<1x256xf32>
    %c26 = arith.constant 26 : index
    %290 = memref.load %arg2[%c26] : memref<98xf32, #tpu.memory_space<smem>>
    %291 = vector.extract_strided_slice %71 {offsets = [0, 53], sizes = [1, 256], strides = [1, 1]} : vector<1x358xf32> to vector<1x256xf32>
    %292 = vector.broadcast %290 : f32 to vector<1x256xf32>
    %293 = arith.mulf %292, %291 : vector<1x256xf32>
    %294 = arith.addf %274, %293 : vector<1x256xf32>
    %c33 = arith.constant 33 : index
    %295 = memref.load %arg2[%c33] : memref<98xf32, #tpu.memory_space<smem>>
    %296 = vector.extract_strided_slice %71 {offsets = [0, 69], sizes = [1, 256], strides = [1, 1]} : vector<1x358xf32> to vector<1x256xf32>
    %297 = vector.broadcast %295 : f32 to vector<1x256xf32>
    %298 = arith.mulf %297, %296 : vector<1x256xf32>
    %299 = arith.addf %279, %298 : vector<1x256xf32>
    %c40 = arith.constant 40 : index
    %300 = memref.load %arg2[%c40] : memref<98xf32, #tpu.memory_space<smem>>
    %301 = vector.extract_strided_slice %71 {offsets = [0, 85], sizes = [1, 256], strides = [1, 1]} : vector<1x358xf32> to vector<1x256xf32>
    %302 = vector.broadcast %300 : f32 to vector<1x256xf32>
    %303 = arith.mulf %302, %301 : vector<1x256xf32>
    %304 = arith.addf %284, %303 : vector<1x256xf32>
    %c47 = arith.constant 47 : index
    %305 = memref.load %arg2[%c47] : memref<98xf32, #tpu.memory_space<smem>>
    %306 = vector.extract_strided_slice %71 {offsets = [0, 101], sizes = [1, 256], strides = [1, 1]} : vector<1x358xf32> to vector<1x256xf32>
    %307 = vector.broadcast %305 : f32 to vector<1x256xf32>
    %308 = arith.mulf %307, %306 : vector<1x256xf32>
    %309 = arith.addf %289, %308 : vector<1x256xf32>
    %c6 = arith.constant 6 : index
    %310 = memref.load %arg2[%c6] : memref<98xf32, #tpu.memory_space<smem>>
    %311 = vector.extract_strided_slice %74 {offsets = [0, 6], sizes = [1, 256], strides = [1, 1]} : vector<1x358xf32> to vector<1x256xf32>
    %312 = vector.broadcast %310 : f32 to vector<1x256xf32>
    %313 = arith.mulf %312, %311 : vector<1x256xf32>
    %314 = arith.addf %294, %313 : vector<1x256xf32>
    %c13 = arith.constant 13 : index
    %315 = memref.load %arg2[%c13] : memref<98xf32, #tpu.memory_space<smem>>
    %316 = vector.extract_strided_slice %74 {offsets = [0, 22], sizes = [1, 256], strides = [1, 1]} : vector<1x358xf32> to vector<1x256xf32>
    %317 = vector.broadcast %315 : f32 to vector<1x256xf32>
    %318 = arith.mulf %317, %316 : vector<1x256xf32>
    %319 = arith.addf %299, %318 : vector<1x256xf32>
    %c20 = arith.constant 20 : index
    %320 = memref.load %arg2[%c20] : memref<98xf32, #tpu.memory_space<smem>>
    %321 = vector.extract_strided_slice %74 {offsets = [0, 38], sizes = [1, 256], strides = [1, 1]} : vector<1x358xf32> to vector<1x256xf32>
    %322 = vector.broadcast %320 : f32 to vector<1x256xf32>
    %323 = arith.mulf %322, %321 : vector<1x256xf32>
    %324 = arith.addf %304, %323 : vector<1x256xf32>
    %c27 = arith.constant 27 : index
    %325 = memref.load %arg2[%c27] : memref<98xf32, #tpu.memory_space<smem>>
    %326 = vector.extract_strided_slice %74 {offsets = [0, 54], sizes = [1, 256], strides = [1, 1]} : vector<1x358xf32> to vector<1x256xf32>
    %327 = vector.broadcast %325 : f32 to vector<1x256xf32>
    %328 = arith.mulf %327, %326 : vector<1x256xf32>
    %329 = arith.addf %309, %328 : vector<1x256xf32>
    %c34 = arith.constant 34 : index
    %330 = memref.load %arg2[%c34] : memref<98xf32, #tpu.memory_space<smem>>
    %331 = vector.extract_strided_slice %74 {offsets = [0, 70], sizes = [1, 256], strides = [1, 1]} : vector<1x358xf32> to vector<1x256xf32>
    %332 = vector.broadcast %330 : f32 to vector<1x256xf32>
    %333 = arith.mulf %332, %331 : vector<1x256xf32>
    %334 = arith.addf %314, %333 : vector<1x256xf32>
    %c41 = arith.constant 41 : index
    %335 = memref.load %arg2[%c41] : memref<98xf32, #tpu.memory_space<smem>>
    %336 = vector.extract_strided_slice %74 {offsets = [0, 86], sizes = [1, 256], strides = [1, 1]} : vector<1x358xf32> to vector<1x256xf32>
    %337 = vector.broadcast %335 : f32 to vector<1x256xf32>
    %338 = arith.mulf %337, %336 : vector<1x256xf32>
    %339 = arith.addf %319, %338 : vector<1x256xf32>
    %c48 = arith.constant 48 : index
    %340 = memref.load %arg2[%c48] : memref<98xf32, #tpu.memory_space<smem>>
    %341 = vector.extract_strided_slice %74 {offsets = [0, 102], sizes = [1, 256], strides = [1, 1]} : vector<1x358xf32> to vector<1x256xf32>
    %342 = vector.broadcast %340 : f32 to vector<1x256xf32>
    %343 = arith.mulf %342, %341 : vector<1x256xf32>
    %344 = arith.addf %324, %343 : vector<1x256xf32>
    %c49 = arith.constant 49 : index
    %345 = memref.load %arg2[%c49] : memref<98xf32, #tpu.memory_space<smem>>
    %346 = vector.extract_strided_slice %77 {offsets = [0, 0], sizes = [1, 256], strides = [1, 1]} : vector<1x358xf32> to vector<1x256xf32>
    %347 = vector.broadcast %345 : f32 to vector<1x256xf32>
    %348 = arith.mulf %347, %346 : vector<1x256xf32>
    %349 = arith.addf %329, %348 : vector<1x256xf32>
    %c56 = arith.constant 56 : index
    %350 = memref.load %arg2[%c56] : memref<98xf32, #tpu.memory_space<smem>>
    %351 = vector.extract_strided_slice %77 {offsets = [0, 16], sizes = [1, 256], strides = [1, 1]} : vector<1x358xf32> to vector<1x256xf32>
    %352 = vector.broadcast %350 : f32 to vector<1x256xf32>
    %353 = arith.mulf %352, %351 : vector<1x256xf32>
    %354 = arith.addf %334, %353 : vector<1x256xf32>
    %c63 = arith.constant 63 : index
    %355 = memref.load %arg2[%c63] : memref<98xf32, #tpu.memory_space<smem>>
    %356 = vector.extract_strided_slice %77 {offsets = [0, 32], sizes = [1, 256], strides = [1, 1]} : vector<1x358xf32> to vector<1x256xf32>
    %357 = vector.broadcast %355 : f32 to vector<1x256xf32>
    %358 = arith.mulf %357, %356 : vector<1x256xf32>
    %359 = arith.addf %339, %358 : vector<1x256xf32>
    %c70 = arith.constant 70 : index
    %360 = memref.load %arg2[%c70] : memref<98xf32, #tpu.memory_space<smem>>
    %361 = vector.extract_strided_slice %77 {offsets = [0, 48], sizes = [1, 256], strides = [1, 1]} : vector<1x358xf32> to vector<1x256xf32>
    %362 = vector.broadcast %360 : f32 to vector<1x256xf32>
    %363 = arith.mulf %362, %361 : vector<1x256xf32>
    %364 = arith.addf %344, %363 : vector<1x256xf32>
    %c77 = arith.constant 77 : index
    %365 = memref.load %arg2[%c77] : memref<98xf32, #tpu.memory_space<smem>>
    %366 = vector.extract_strided_slice %77 {offsets = [0, 64], sizes = [1, 256], strides = [1, 1]} : vector<1x358xf32> to vector<1x256xf32>
    %367 = vector.broadcast %365 : f32 to vector<1x256xf32>
    %368 = arith.mulf %367, %366 : vector<1x256xf32>
    %369 = arith.addf %349, %368 : vector<1x256xf32>
    %c84 = arith.constant 84 : index
    %370 = memref.load %arg2[%c84] : memref<98xf32, #tpu.memory_space<smem>>
    %371 = vector.extract_strided_slice %77 {offsets = [0, 80], sizes = [1, 256], strides = [1, 1]} : vector<1x358xf32> to vector<1x256xf32>
    %372 = vector.broadcast %370 : f32 to vector<1x256xf32>
    %373 = arith.mulf %372, %371 : vector<1x256xf32>
    %374 = arith.addf %354, %373 : vector<1x256xf32>
    %c91 = arith.constant 91 : index
    %375 = memref.load %arg2[%c91] : memref<98xf32, #tpu.memory_space<smem>>
    %376 = vector.extract_strided_slice %77 {offsets = [0, 96], sizes = [1, 256], strides = [1, 1]} : vector<1x358xf32> to vector<1x256xf32>
    %377 = vector.broadcast %375 : f32 to vector<1x256xf32>
    %378 = arith.mulf %377, %376 : vector<1x256xf32>
    %379 = arith.addf %359, %378 : vector<1x256xf32>
    %c50 = arith.constant 50 : index
    %380 = memref.load %arg2[%c50] : memref<98xf32, #tpu.memory_space<smem>>
    %381 = vector.extract_strided_slice %80 {offsets = [0, 1], sizes = [1, 256], strides = [1, 1]} : vector<1x358xf32> to vector<1x256xf32>
    %382 = vector.broadcast %380 : f32 to vector<1x256xf32>
    %383 = arith.mulf %382, %381 : vector<1x256xf32>
    %384 = arith.addf %364, %383 : vector<1x256xf32>
    %c57 = arith.constant 57 : index
    %385 = memref.load %arg2[%c57] : memref<98xf32, #tpu.memory_space<smem>>
    %386 = vector.extract_strided_slice %80 {offsets = [0, 17], sizes = [1, 256], strides = [1, 1]} : vector<1x358xf32> to vector<1x256xf32>
    %387 = vector.broadcast %385 : f32 to vector<1x256xf32>
    %388 = arith.mulf %387, %386 : vector<1x256xf32>
    %389 = arith.addf %369, %388 : vector<1x256xf32>
    %c64 = arith.constant 64 : index
    %390 = memref.load %arg2[%c64] : memref<98xf32, #tpu.memory_space<smem>>
    %391 = vector.extract_strided_slice %80 {offsets = [0, 33], sizes = [1, 256], strides = [1, 1]} : vector<1x358xf32> to vector<1x256xf32>
    %392 = vector.broadcast %390 : f32 to vector<1x256xf32>
    %393 = arith.mulf %392, %391 : vector<1x256xf32>
    %394 = arith.addf %374, %393 : vector<1x256xf32>
    %c71 = arith.constant 71 : index
    %395 = memref.load %arg2[%c71] : memref<98xf32, #tpu.memory_space<smem>>
    %396 = vector.extract_strided_slice %80 {offsets = [0, 49], sizes = [1, 256], strides = [1, 1]} : vector<1x358xf32> to vector<1x256xf32>
    %397 = vector.broadcast %395 : f32 to vector<1x256xf32>
    %398 = arith.mulf %397, %396 : vector<1x256xf32>
    %399 = arith.addf %379, %398 : vector<1x256xf32>
    %c78 = arith.constant 78 : index
    %400 = memref.load %arg2[%c78] : memref<98xf32, #tpu.memory_space<smem>>
    %401 = vector.extract_strided_slice %80 {offsets = [0, 65], sizes = [1, 256], strides = [1, 1]} : vector<1x358xf32> to vector<1x256xf32>
    %402 = vector.broadcast %400 : f32 to vector<1x256xf32>
    %403 = arith.mulf %402, %401 : vector<1x256xf32>
    %404 = arith.addf %384, %403 : vector<1x256xf32>
    %c85 = arith.constant 85 : index
    %405 = memref.load %arg2[%c85] : memref<98xf32, #tpu.memory_space<smem>>
    %406 = vector.extract_strided_slice %80 {offsets = [0, 81], sizes = [1, 256], strides = [1, 1]} : vector<1x358xf32> to vector<1x256xf32>
    %407 = vector.broadcast %405 : f32 to vector<1x256xf32>
    %408 = arith.mulf %407, %406 : vector<1x256xf32>
    %409 = arith.addf %389, %408 : vector<1x256xf32>
    %c92 = arith.constant 92 : index
    %410 = memref.load %arg2[%c92] : memref<98xf32, #tpu.memory_space<smem>>
    %411 = vector.extract_strided_slice %80 {offsets = [0, 97], sizes = [1, 256], strides = [1, 1]} : vector<1x358xf32> to vector<1x256xf32>
    %412 = vector.broadcast %410 : f32 to vector<1x256xf32>
    %413 = arith.mulf %412, %411 : vector<1x256xf32>
    %414 = arith.addf %394, %413 : vector<1x256xf32>
    %c51 = arith.constant 51 : index
    %415 = memref.load %arg2[%c51] : memref<98xf32, #tpu.memory_space<smem>>
    %416 = vector.extract_strided_slice %83 {offsets = [0, 2], sizes = [1, 256], strides = [1, 1]} : vector<1x358xf32> to vector<1x256xf32>
    %417 = vector.broadcast %415 : f32 to vector<1x256xf32>
    %418 = arith.mulf %417, %416 : vector<1x256xf32>
    %419 = arith.addf %399, %418 : vector<1x256xf32>
    %c58 = arith.constant 58 : index
    %420 = memref.load %arg2[%c58] : memref<98xf32, #tpu.memory_space<smem>>
    %421 = vector.extract_strided_slice %83 {offsets = [0, 18], sizes = [1, 256], strides = [1, 1]} : vector<1x358xf32> to vector<1x256xf32>
    %422 = vector.broadcast %420 : f32 to vector<1x256xf32>
    %423 = arith.mulf %422, %421 : vector<1x256xf32>
    %424 = arith.addf %404, %423 : vector<1x256xf32>
    %c65 = arith.constant 65 : index
    %425 = memref.load %arg2[%c65] : memref<98xf32, #tpu.memory_space<smem>>
    %426 = vector.extract_strided_slice %83 {offsets = [0, 34], sizes = [1, 256], strides = [1, 1]} : vector<1x358xf32> to vector<1x256xf32>
    %427 = vector.broadcast %425 : f32 to vector<1x256xf32>
    %428 = arith.mulf %427, %426 : vector<1x256xf32>
    %429 = arith.addf %409, %428 : vector<1x256xf32>
    %c72 = arith.constant 72 : index
    %430 = memref.load %arg2[%c72] : memref<98xf32, #tpu.memory_space<smem>>
    %431 = vector.extract_strided_slice %83 {offsets = [0, 50], sizes = [1, 256], strides = [1, 1]} : vector<1x358xf32> to vector<1x256xf32>
    %432 = vector.broadcast %430 : f32 to vector<1x256xf32>
    %433 = arith.mulf %432, %431 : vector<1x256xf32>
    %434 = arith.addf %414, %433 : vector<1x256xf32>
    %c79 = arith.constant 79 : index
    %435 = memref.load %arg2[%c79] : memref<98xf32, #tpu.memory_space<smem>>
    %436 = vector.extract_strided_slice %83 {offsets = [0, 66], sizes = [1, 256], strides = [1, 1]} : vector<1x358xf32> to vector<1x256xf32>
    %437 = vector.broadcast %435 : f32 to vector<1x256xf32>
    %438 = arith.mulf %437, %436 : vector<1x256xf32>
    %439 = arith.addf %419, %438 : vector<1x256xf32>
    %c86 = arith.constant 86 : index
    %440 = memref.load %arg2[%c86] : memref<98xf32, #tpu.memory_space<smem>>
    %441 = vector.extract_strided_slice %83 {offsets = [0, 82], sizes = [1, 256], strides = [1, 1]} : vector<1x358xf32> to vector<1x256xf32>
    %442 = vector.broadcast %440 : f32 to vector<1x256xf32>
    %443 = arith.mulf %442, %441 : vector<1x256xf32>
    %444 = arith.addf %424, %443 : vector<1x256xf32>
    %c93 = arith.constant 93 : index
    %445 = memref.load %arg2[%c93] : memref<98xf32, #tpu.memory_space<smem>>
    %446 = vector.extract_strided_slice %83 {offsets = [0, 98], sizes = [1, 256], strides = [1, 1]} : vector<1x358xf32> to vector<1x256xf32>
    %447 = vector.broadcast %445 : f32 to vector<1x256xf32>
    %448 = arith.mulf %447, %446 : vector<1x256xf32>
    %449 = arith.addf %429, %448 : vector<1x256xf32>
    %c52 = arith.constant 52 : index
    %450 = memref.load %arg2[%c52] : memref<98xf32, #tpu.memory_space<smem>>
    %451 = vector.extract_strided_slice %86 {offsets = [0, 3], sizes = [1, 256], strides = [1, 1]} : vector<1x358xf32> to vector<1x256xf32>
    %452 = vector.broadcast %450 : f32 to vector<1x256xf32>
    %453 = arith.mulf %452, %451 : vector<1x256xf32>
    %454 = arith.addf %434, %453 : vector<1x256xf32>
    %c59 = arith.constant 59 : index
    %455 = memref.load %arg2[%c59] : memref<98xf32, #tpu.memory_space<smem>>
    %456 = vector.extract_strided_slice %86 {offsets = [0, 19], sizes = [1, 256], strides = [1, 1]} : vector<1x358xf32> to vector<1x256xf32>
    %457 = vector.broadcast %455 : f32 to vector<1x256xf32>
    %458 = arith.mulf %457, %456 : vector<1x256xf32>
    %459 = arith.addf %439, %458 : vector<1x256xf32>
    %c66 = arith.constant 66 : index
    %460 = memref.load %arg2[%c66] : memref<98xf32, #tpu.memory_space<smem>>
    %461 = vector.extract_strided_slice %86 {offsets = [0, 35], sizes = [1, 256], strides = [1, 1]} : vector<1x358xf32> to vector<1x256xf32>
    %462 = vector.broadcast %460 : f32 to vector<1x256xf32>
    %463 = arith.mulf %462, %461 : vector<1x256xf32>
    %464 = arith.addf %444, %463 : vector<1x256xf32>
    %c73 = arith.constant 73 : index
    %465 = memref.load %arg2[%c73] : memref<98xf32, #tpu.memory_space<smem>>
    %466 = vector.extract_strided_slice %86 {offsets = [0, 51], sizes = [1, 256], strides = [1, 1]} : vector<1x358xf32> to vector<1x256xf32>
    %467 = vector.broadcast %465 : f32 to vector<1x256xf32>
    %468 = arith.mulf %467, %466 : vector<1x256xf32>
    %469 = arith.addf %449, %468 : vector<1x256xf32>
    %c80 = arith.constant 80 : index
    %470 = memref.load %arg2[%c80] : memref<98xf32, #tpu.memory_space<smem>>
    %471 = vector.extract_strided_slice %86 {offsets = [0, 67], sizes = [1, 256], strides = [1, 1]} : vector<1x358xf32> to vector<1x256xf32>
    %472 = vector.broadcast %470 : f32 to vector<1x256xf32>
    %473 = arith.mulf %472, %471 : vector<1x256xf32>
    %474 = arith.addf %454, %473 : vector<1x256xf32>
    %c87 = arith.constant 87 : index
    %475 = memref.load %arg2[%c87] : memref<98xf32, #tpu.memory_space<smem>>
    %476 = vector.extract_strided_slice %86 {offsets = [0, 83], sizes = [1, 256], strides = [1, 1]} : vector<1x358xf32> to vector<1x256xf32>
    %477 = vector.broadcast %475 : f32 to vector<1x256xf32>
    %478 = arith.mulf %477, %476 : vector<1x256xf32>
    %479 = arith.addf %459, %478 : vector<1x256xf32>
    %c94 = arith.constant 94 : index
    %480 = memref.load %arg2[%c94] : memref<98xf32, #tpu.memory_space<smem>>
    %481 = vector.extract_strided_slice %86 {offsets = [0, 99], sizes = [1, 256], strides = [1, 1]} : vector<1x358xf32> to vector<1x256xf32>
    %482 = vector.broadcast %480 : f32 to vector<1x256xf32>
    %483 = arith.mulf %482, %481 : vector<1x256xf32>
    %484 = arith.addf %464, %483 : vector<1x256xf32>
    %c53 = arith.constant 53 : index
    %485 = memref.load %arg2[%c53] : memref<98xf32, #tpu.memory_space<smem>>
    %486 = vector.extract_strided_slice %89 {offsets = [0, 4], sizes = [1, 256], strides = [1, 1]} : vector<1x358xf32> to vector<1x256xf32>
    %487 = vector.broadcast %485 : f32 to vector<1x256xf32>
    %488 = arith.mulf %487, %486 : vector<1x256xf32>
    %489 = arith.addf %469, %488 : vector<1x256xf32>
    %c60 = arith.constant 60 : index
    %490 = memref.load %arg2[%c60] : memref<98xf32, #tpu.memory_space<smem>>
    %491 = vector.extract_strided_slice %89 {offsets = [0, 20], sizes = [1, 256], strides = [1, 1]} : vector<1x358xf32> to vector<1x256xf32>
    %492 = vector.broadcast %490 : f32 to vector<1x256xf32>
    %493 = arith.mulf %492, %491 : vector<1x256xf32>
    %494 = arith.addf %474, %493 : vector<1x256xf32>
    %c67 = arith.constant 67 : index
    %495 = memref.load %arg2[%c67] : memref<98xf32, #tpu.memory_space<smem>>
    %496 = vector.extract_strided_slice %89 {offsets = [0, 36], sizes = [1, 256], strides = [1, 1]} : vector<1x358xf32> to vector<1x256xf32>
    %497 = vector.broadcast %495 : f32 to vector<1x256xf32>
    %498 = arith.mulf %497, %496 : vector<1x256xf32>
    %499 = arith.addf %479, %498 : vector<1x256xf32>
    %c74 = arith.constant 74 : index
    %500 = memref.load %arg2[%c74] : memref<98xf32, #tpu.memory_space<smem>>
    %501 = vector.extract_strided_slice %89 {offsets = [0, 52], sizes = [1, 256], strides = [1, 1]} : vector<1x358xf32> to vector<1x256xf32>
    %502 = vector.broadcast %500 : f32 to vector<1x256xf32>
    %503 = arith.mulf %502, %501 : vector<1x256xf32>
    %504 = arith.addf %484, %503 : vector<1x256xf32>
    %c81 = arith.constant 81 : index
    %505 = memref.load %arg2[%c81] : memref<98xf32, #tpu.memory_space<smem>>
    %506 = vector.extract_strided_slice %89 {offsets = [0, 68], sizes = [1, 256], strides = [1, 1]} : vector<1x358xf32> to vector<1x256xf32>
    %507 = vector.broadcast %505 : f32 to vector<1x256xf32>
    %508 = arith.mulf %507, %506 : vector<1x256xf32>
    %509 = arith.addf %489, %508 : vector<1x256xf32>
    %c88 = arith.constant 88 : index
    %510 = memref.load %arg2[%c88] : memref<98xf32, #tpu.memory_space<smem>>
    %511 = vector.extract_strided_slice %89 {offsets = [0, 84], sizes = [1, 256], strides = [1, 1]} : vector<1x358xf32> to vector<1x256xf32>
    %512 = vector.broadcast %510 : f32 to vector<1x256xf32>
    %513 = arith.mulf %512, %511 : vector<1x256xf32>
    %514 = arith.addf %494, %513 : vector<1x256xf32>
    %c95 = arith.constant 95 : index
    %515 = memref.load %arg2[%c95] : memref<98xf32, #tpu.memory_space<smem>>
    %516 = vector.extract_strided_slice %89 {offsets = [0, 100], sizes = [1, 256], strides = [1, 1]} : vector<1x358xf32> to vector<1x256xf32>
    %517 = vector.broadcast %515 : f32 to vector<1x256xf32>
    %518 = arith.mulf %517, %516 : vector<1x256xf32>
    %519 = arith.addf %499, %518 : vector<1x256xf32>
    %c54 = arith.constant 54 : index
    %520 = memref.load %arg2[%c54] : memref<98xf32, #tpu.memory_space<smem>>
    %521 = vector.extract_strided_slice %92 {offsets = [0, 5], sizes = [1, 256], strides = [1, 1]} : vector<1x358xf32> to vector<1x256xf32>
    %522 = vector.broadcast %520 : f32 to vector<1x256xf32>
    %523 = arith.mulf %522, %521 : vector<1x256xf32>
    %524 = arith.addf %504, %523 : vector<1x256xf32>
    %c61 = arith.constant 61 : index
    %525 = memref.load %arg2[%c61] : memref<98xf32, #tpu.memory_space<smem>>
    %526 = vector.extract_strided_slice %92 {offsets = [0, 21], sizes = [1, 256], strides = [1, 1]} : vector<1x358xf32> to vector<1x256xf32>
    %527 = vector.broadcast %525 : f32 to vector<1x256xf32>
    %528 = arith.mulf %527, %526 : vector<1x256xf32>
    %529 = arith.addf %509, %528 : vector<1x256xf32>
    %c68 = arith.constant 68 : index
    %530 = memref.load %arg2[%c68] : memref<98xf32, #tpu.memory_space<smem>>
    %531 = vector.extract_strided_slice %92 {offsets = [0, 37], sizes = [1, 256], strides = [1, 1]} : vector<1x358xf32> to vector<1x256xf32>
    %532 = vector.broadcast %530 : f32 to vector<1x256xf32>
    %533 = arith.mulf %532, %531 : vector<1x256xf32>
    %534 = arith.addf %514, %533 : vector<1x256xf32>
    %c75 = arith.constant 75 : index
    %535 = memref.load %arg2[%c75] : memref<98xf32, #tpu.memory_space<smem>>
    %536 = vector.extract_strided_slice %92 {offsets = [0, 53], sizes = [1, 256], strides = [1, 1]} : vector<1x358xf32> to vector<1x256xf32>
    %537 = vector.broadcast %535 : f32 to vector<1x256xf32>
    %538 = arith.mulf %537, %536 : vector<1x256xf32>
    %539 = arith.addf %519, %538 : vector<1x256xf32>
    %c82 = arith.constant 82 : index
    %540 = memref.load %arg2[%c82] : memref<98xf32, #tpu.memory_space<smem>>
    %541 = vector.extract_strided_slice %92 {offsets = [0, 69], sizes = [1, 256], strides = [1, 1]} : vector<1x358xf32> to vector<1x256xf32>
    %542 = vector.broadcast %540 : f32 to vector<1x256xf32>
    %543 = arith.mulf %542, %541 : vector<1x256xf32>
    %544 = arith.addf %524, %543 : vector<1x256xf32>
    %c89 = arith.constant 89 : index
    %545 = memref.load %arg2[%c89] : memref<98xf32, #tpu.memory_space<smem>>
    %546 = vector.extract_strided_slice %92 {offsets = [0, 85], sizes = [1, 256], strides = [1, 1]} : vector<1x358xf32> to vector<1x256xf32>
    %547 = vector.broadcast %545 : f32 to vector<1x256xf32>
    %548 = arith.mulf %547, %546 : vector<1x256xf32>
    %549 = arith.addf %529, %548 : vector<1x256xf32>
    %c96 = arith.constant 96 : index
    %550 = memref.load %arg2[%c96] : memref<98xf32, #tpu.memory_space<smem>>
    %551 = vector.extract_strided_slice %92 {offsets = [0, 101], sizes = [1, 256], strides = [1, 1]} : vector<1x358xf32> to vector<1x256xf32>
    %552 = vector.broadcast %550 : f32 to vector<1x256xf32>
    %553 = arith.mulf %552, %551 : vector<1x256xf32>
    %554 = arith.addf %534, %553 : vector<1x256xf32>
    %c55 = arith.constant 55 : index
    %555 = memref.load %arg2[%c55] : memref<98xf32, #tpu.memory_space<smem>>
    %556 = vector.extract_strided_slice %95 {offsets = [0, 6], sizes = [1, 256], strides = [1, 1]} : vector<1x358xf32> to vector<1x256xf32>
    %557 = vector.broadcast %555 : f32 to vector<1x256xf32>
    %558 = arith.mulf %557, %556 : vector<1x256xf32>
    %559 = arith.addf %539, %558 : vector<1x256xf32>
    %c62 = arith.constant 62 : index
    %560 = memref.load %arg2[%c62] : memref<98xf32, #tpu.memory_space<smem>>
    %561 = vector.extract_strided_slice %95 {offsets = [0, 22], sizes = [1, 256], strides = [1, 1]} : vector<1x358xf32> to vector<1x256xf32>
    %562 = vector.broadcast %560 : f32 to vector<1x256xf32>
    %563 = arith.mulf %562, %561 : vector<1x256xf32>
    %564 = arith.addf %544, %563 : vector<1x256xf32>
    %c69 = arith.constant 69 : index
    %565 = memref.load %arg2[%c69] : memref<98xf32, #tpu.memory_space<smem>>
    %566 = vector.extract_strided_slice %95 {offsets = [0, 38], sizes = [1, 256], strides = [1, 1]} : vector<1x358xf32> to vector<1x256xf32>
    %567 = vector.broadcast %565 : f32 to vector<1x256xf32>
    %568 = arith.mulf %567, %566 : vector<1x256xf32>
    %569 = arith.addf %549, %568 : vector<1x256xf32>
    %c76 = arith.constant 76 : index
    %570 = memref.load %arg2[%c76] : memref<98xf32, #tpu.memory_space<smem>>
    %571 = vector.extract_strided_slice %95 {offsets = [0, 54], sizes = [1, 256], strides = [1, 1]} : vector<1x358xf32> to vector<1x256xf32>
    %572 = vector.broadcast %570 : f32 to vector<1x256xf32>
    %573 = arith.mulf %572, %571 : vector<1x256xf32>
    %574 = arith.addf %554, %573 : vector<1x256xf32>
    %c83 = arith.constant 83 : index
    %575 = memref.load %arg2[%c83] : memref<98xf32, #tpu.memory_space<smem>>
    %576 = vector.extract_strided_slice %95 {offsets = [0, 70], sizes = [1, 256], strides = [1, 1]} : vector<1x358xf32> to vector<1x256xf32>
    %577 = vector.broadcast %575 : f32 to vector<1x256xf32>
    %578 = arith.mulf %577, %576 : vector<1x256xf32>
    %579 = arith.addf %559, %578 : vector<1x256xf32>
    %c90 = arith.constant 90 : index
    %580 = memref.load %arg2[%c90] : memref<98xf32, #tpu.memory_space<smem>>
    %581 = vector.extract_strided_slice %95 {offsets = [0, 86], sizes = [1, 256], strides = [1, 1]} : vector<1x358xf32> to vector<1x256xf32>
    %582 = vector.broadcast %580 : f32 to vector<1x256xf32>
    %583 = arith.mulf %582, %581 : vector<1x256xf32>
    %584 = arith.addf %564, %583 : vector<1x256xf32>
    %c97 = arith.constant 97 : index
    %585 = memref.load %arg2[%c97] : memref<98xf32, #tpu.memory_space<smem>>
    %586 = vector.extract_strided_slice %95 {offsets = [0, 102], sizes = [1, 256], strides = [1, 1]} : vector<1x358xf32> to vector<1x256xf32>
    %587 = vector.broadcast %585 : f32 to vector<1x256xf32>
    %588 = arith.mulf %587, %586 : vector<1x256xf32>
    %589 = arith.addf %569, %588 : vector<1x256xf32>
    %590 = arith.addf %584, %589 : vector<1x256xf32>
    %591 = arith.addf %574, %579 : vector<1x256xf32>
    %592 = arith.addf %590, %591 : vector<1x256xf32>
    %c0_41 = arith.constant 0 : index
    %593 = memref.load %arg3[%c0_41] : memref<1xf32, #tpu.memory_space<smem>>
    %594 = vector.broadcast %593 : f32 to vector<1x256xf32>
    %595 = arith.addf %592, %594 : vector<1x256xf32>
    %596 = arith.negf %595 : vector<1x256xf32>
    %597 = math.exp %596 : vector<1x256xf32>
    %cst_42 = arith.constant 1.000000e+00 : f32
    %598 = vector.broadcast %cst_42 : f32 to vector<1x256xf32>
    %599 = arith.addf %598, %597 : vector<1x256xf32>
    %600 = arith.divf %598, %599 : vector<1x256xf32>
    %601 = vector.broadcast %600 : vector<1x256xf32> to vector<4x256xf32>
    %602 = arith.mulf %1, %601 : vector<4x256xf32>
    %c0_43 = arith.constant 0 : index
    %c0_44 = arith.constant 0 : index
    %c0_45 = arith.constant 0 : index
    %603 = vector.load %arg4[%c0_43, %c0_44, %c0_45] : memref<1x4x256xf32, #tpu.memory_space<vmem>>, vector<1x4x256xf32>
    %604 = vector.shape_cast %603 : vector<1x4x256xf32> to vector<4x256xf32>
    %605 = vector.shape_cast %602 : vector<4x256xf32> to vector<1x4x256xf32>
    tpu.vector_store %arg4[%c0_43, %c0_44, %c0_45], %605 {strides = array<i32>} : memref<1x4x256xf32, #tpu.memory_space<vmem>>, vector<1x4x256xf32>,
    return
  }
  func.func @transform_0(%arg0: i32) -> (i32, i32, i32) {
    %c0_i32 = arith.constant 0 : i32
    %c0_i32_0 = arith.constant 0 : i32
    %c0_i32_1 = arith.constant 0 : i32
    return %arg0, %c0_i32, %c0_i32_0 : i32, i32, i32
  }
  func.func @transform_1(%arg0: i32) -> i32 {
    %c0_i32 = arith.constant 0 : i32
    %c0_i32_0 = arith.constant 0 : i32
    return %c0_i32 : i32
  }
  func.func @transform_2(%arg0: i32) -> i32 {
    %c0_i32 = arith.constant 0 : i32
    %c0_i32_0 = arith.constant 0 : i32
    return %c0_i32 : i32
  }
  func.func @transform_3(%arg0: i32) -> (i32, i32, i32) {
    %c0_i32 = arith.constant 0 : i32
    %c0_i32_0 = arith.constant 0 : i32
    %c0_i32_1 = arith.constant 0 : i32
    return %arg0, %c0_i32, %c0_i32_0 : i32, i32, i32
  }
}

</mosaic_0001>

<bundles_post_ra>
// kernel: tpu_custom_call.1
= control target key start
LH: loop header
LB: loop body
LE: loop exit
PB: predicated region body
PF: predicated region fallthrough
CT: control target
= control target key end

     0   :  { %s5122_s0 = inlined_call_operand.hbm [shape: f32[2,4,256], index: 0, kind: input, shape index: {}]   ;;  %s5123_s1 = inlined_call_operand.vmem [shape: f32[98], index: 1, kind: input, shape index: {}]   ;;  %s5124_s2 = inlined_call_operand.<no memory space> [shape: f32[1], index: 2, kind: input, shape index: {}]   ;;  %s5125_s3 = inlined_call_operand.hbm [shape: f32[2,4,256], index: 3, kind: output, shape index: {}]  }
   0x1   :  { %8 = sst [smem:[#allocation2]] %s5124_s2 }
   0x2   :  { %9 = vsyncpa [#allocation4], 0 }
   0x3   :  { %11 = vsyncpa [#allocation4 + $0x1], 0 }
   0x4   :  { %12 = vsyncpa [#allocation6], 0 }
   0x5   :  { %13 = vsyncpa [#allocation5], 0 }
   0x6   :  { %15 = vsyncpa [#allocation5 + $0x1], 0  ;;  %s3154_s14 = smov 0   ;;  %s3156_s15 = smov 0  }
   0x7   :  { %s3158_s16 = smov 0   ;;  %s3160_s17 = smov 0  }
   0x8 LB: > { %s3175_s2 = sadd.s32 4294967295, %s3097_s17   ;;  %s2767_s18 = sadd.s32 4294967294, %s3097_s17   ;;  %s3097_s17 = sphi %s3160_s17, %s5284_s17   ;;  %s3093_s16 = sphi %s3158_s16, %s5283_s16   ;;  %s3089_s15 = sphi %s3156_s15, %s5282_s15   ;;  %s3085_s14 = sphi %s3154_s14, %s5281_s14  }
   0x9   : > { %p41_p0 = scmp.ne.s32.totalorder %s3089_s15, %s3085_s14  ;;  %p42_p1 = scmp.eq.s32.totalorder %s3175_s2, 0 }
   0xa   : > { %p107_p2 = scmp.eq.s32.totalorder %s3175_s2, 1  ;;  %p113_p3 = scmp.eq.s32.totalorder %s2767_s18, 1 }
   0xb   : > { %p3184_p4 = por %p42_p1, %p41_p0  ;;  %p2768_p5 = scmp.ge.s32.totalorder %s3097_s17, 1 }
   0xc   : > { %p3189_p6 = por %p113_p3, %p41_p0  ;;  %p120_p7 = scmp.lt.s32.totalorder %s3097_s17, 3 }
   0xd   : > { %s132_s23 = sshll.u32 %s5123_s1, 4  ;;  %s3205_s25 = sadd.s32 1, %s3097_s17   ;;  %s133_s23 = int_to_ptr.vmem [resolvable:$true] %s132_s23 }
   0xe   : > { %p3197_p8 = pnand %p2768_p5, %p120_p7  ;;  %s25_s26 = ssub.s32 %s3097_s17, %s3205_s25 }
   0xf   : > { %p26_p12 = scmp.eq.s32.totalorder %s25_s26, 0  ;;  %s28_s27 = sadd.s32 1, %s3093_s16 }
  0x10   : > { %p2892_p10 = pneg %p3197_p8  ;;  %p35_p13 = scmp.ne.s32.totalorder %s3093_s16, %s3089_s15 }
  0x11   : > { %s3099_s28 = smov [#allocation7]   ;;  %p36_p0 = scmp.eq.s32.totalorder %s3097_s17, 0 }
  0x12   : > { %p2893_p11 = pnand %p2892_p10, %p42_p1  ;;  %p3220_p3 = por %p107_p2, %p35_p13 }
  0x13   : > { %s3215_s29 = scalar_select %p26_p12, %s3093_s16, %s28_s27  }
  0x14   : > { %2895 = dma.vmem_to_smem (!%p2893_p11), %s133_s23, 16, %s3099_s28, [#allocation6]  }
  0x15   : > { %s146_s4 = sand.u32 1, %s3093_s16   ;;  %p37_p5 = por %p36_p0, %p35_p13 }
  0x16   : > { %p2905_p7 = scmp.lt.s32.totalorder %s3097_s17, 2  ;;  %s2771_s5 = sshll.u32 %s146_s4, 3 }
  0x17   : > { %s2882_s6 = sshll.u32 %s3097_s17, 3  ;;  %s150_s11 = scalar_lea.vmem [#allocation3], %s2771_s5 }
  0x18   : > { %s155_s9 = scalar_lea.hbm %s5122_s0, %s2882_s6  ;;  %s159_s12 = sshll.u32 %s150_s11, 4  ;;  %s160_s12 = int_to_ptr.vmem [resolvable:$true] %s159_s12 }
  0x19   : > { %s157_s10 = sshll.u32 %s155_s9, 4  ;;  %p3230_p10 = pnand %p2905_p7, %p37_p5  ;;  %s158_s10 = int_to_ptr.hbm [resolvable:$true] %s157_s10 }
  0x1a   : > { %s147_s18 = scalar_lea.sflag [#allocation4], %s146_s4  ;;  %s2997_s21 = sshra.s32 %s158_s10, 4  ;;  %s2998_s21 = int_to_ptr.hbm [resolvable:$true] %s2997_s21 }
  0x1b   : > { %s2999_s22 = scalar_lea.hbm %s2998_s21, 8  ;;  %p3001_p11 = pneg %p3230_p10 }
  0x1c   : > { %p3000_p2 = scmp.ne.s32.totalorder %s2998_s21, %s2999_s22  ;;  %s3004_s27 = scalar_lea.hbm %s5122_s0, 16 }
  0x1d   : > { %p3005_p0 = scmp.lt.s32.totalorder %s2998_s21, %s5122_s0  ;;  %p3006_p5 = scmp.lt.s32.totalorder %s3004_s27, %s2999_s22 }
  0x1e   : > { %p3002_p12 = pnand %p3001_p11, %p3000_p2 }
  0x1f   : > { %p3007_p7 = por %p3006_p5, %p3005_p0 }
  0x20   : > { %p3003_p13 = pneg %p3002_p12 }
  0x22   : > { %p3008_p9 = pnand %p3007_p7, %p3003_p13 }
  0x24   : > { %3011 = shalt.err (!%p3008_p9)
}
  0x25   : > { %2899 = dma.hbm_to_vmem [thread:$0]  (!%p3230_p10), %s158_s10, 128, %s160_s12, %s147_s18  }
  0x26   : > { %168 = sbr.rel (%p3197_p8) target bundleno = 1242 (0x4da), region = 32 }
  0x2b   : > { %s3247_s4 = sand.u32 1, %s3089_s15  }
  0x2c   : > { %s2775_s6 = sshll.u32 %s3247_s4, 3  ;;  %s171_s7 = scalar_lea.sflag [#allocation4], %s3247_s4 }
  0x2d   : > { %s174_s8 = scalar_lea.vmem [#allocation3], %s2775_s6 }
  0x2e   : > { %3072 = dma.done.wait (%p3184_p4), %s171_s7, 128  }
  0x2f   : > { %3074 = vsyncadd (%p3184_p4), %s171_s7, 4294967168 }
  0x30   : > { %3076 = dma.done.wait (%p42_p1), [#allocation6], 16  }
  0x31   : > { %3078 = vsyncadd (%p42_p1), [#allocation6], 4294967280 }
  0x32   : > { %185 = sfence }
  0x33   : > { %v3261_v0 = vld [vmem:[%s174_s8] sm:$0xff]  ;;  %v247_v1 = vlaneseq  ;;  %v3100_v2 = vmov 16.0   ;;  %vm5126_vm0 = vcmask 1043456   ;;  %s3101_s19 = smov 51   ;;  %s2781_s24 = sld [smem:[#allocation7 + $0x1c]] }
  0x34   : > { %5165 = vst [vmem:[#allocation12_spill] sm:$0xff] %v3261_v0  ;;  %2972 = vrcp.f32 %v3100_v2  ;;  %s2782_s9 = sld [smem:[#allocation7 + $0x23]]  ;;  %s3102_s10 = smov 64  }
  0x35   : > { %206 = vst [vmem:[#allocation1] ss:$2 sm:$0xff] %v3261_v0  ;;  %v248_v3 = vand.u32 127, %v247_v1  ;;  %s2783_s11 = sld [smem:[#allocation7 + $0x2a]]  ;;  %s3103_s18 = smov 47  }
  0x36   : > { %s2784_s12 = sld [smem:[#allocation7 + $0x1]]  ;;  %s3104_s22 = smov 111  }
  0x37   : > { %v249_v4 = vadd.s32 128, %v248_v3  ;;  %v250_v9 = vcvt.s32.f32 %v248_v3  ;;  %s2785_s13 = sld [smem:[#allocation7 + $0x8]]  ;;  %s3105_s8 = smov 30  }
  0x38   : > { %s2786_s21 = sld [smem:[#allocation7 + $0xf]] }
  0x39   : > { %v251_v11 = vcvt.s32.f32 %v249_v4  ;;  %v252_v18 = vadd.f32 0.5, %v250_v9  ;;  %s2787_s23 = sld [smem:[#allocation7 + $0x16]] }
  0x3a   : > { %v2973_v5 = vpop.eup %2972  ;;  %v548_v40 = vstv %s2782_s9  ;;  %s2788_s26 = sld [smem:[#allocation7 + $0x1d]]  ;;  %s3106_s9 = smov 94  }
  0x3b   : > { %v255_v7 = vmul.f32 16.0, %v2973_v5  ;;  %vm259_vm1 = vweird.f32 %v2973_v5  ;;  %v253_v20 = vadd.f32 0.5, %v251_v11  ;;  %v570_v48 = vstv %s2783_s11  ;;  %s2789_s27 = sld [smem:[#allocation7 + $0x24]] }
  0x3c   : > { %v207_v6 = vld.sshfl [vmem:[#allocation1] sm:$0xff pattern:$0x75316420]  ;;  %v208_v10 = vld.sshfl [vmem:[#allocation1 + $0x8] sm:$0xff pattern:$0x75316420] }
  0x3d   : > { %v212_v8 = vsel %vm5126_vm0, %v207_v6, 0.0  ;;  %v256_v13 = vsub.f32 1.0, %v255_v7  ;;  %v219_v14 = vsel %vm5126_vm0, %v208_v10, 0.0  ;;  %228 = vst [vmem:[#allocation1] ss:$2 sm:$0xff] %v3261_v0  ;;  %v5186_v6 = vmov 0 }
  0x3e   : > { %v213_v12 = vrot.slane %v212_v8, 4  ;;  %v220_v15 = vrot.slane %v219_v14, 4  ;;  %s2790_s28 = sld [smem:[#allocation7 + $0x2b]] }
  0x3f   : > { %v257_v17 = vmul.f32 %v2973_v5, %v256_v13  ;;  %s2791_s5 = sld [smem:[#allocation7 + $0x2]] }
  0x40   : > { %v214_v16 = vadd.f32 %v213_v12, %v212_v8  ;;  %v221_v19 = vadd.f32 %v220_v15, %v219_v14  ;;  %s2792_s7 = sld [smem:[#allocation7 + $0x9]] }
  0x41   : > { %v258_v22 = vadd.f32 %v2973_v5, %v257_v17  ;;  %s3629_s11 = sld [smem:[#allocation7]] }
  0x42   : > { %v215_v21 = vrot.slane %v214_v16, 2  ;;  %v222_v23 = vrot.slane %v221_v19, 2 }
  0x43   : > { %v260_v25 = vsel %vm259_vm1, %v2973_v5, %v258_v22  ;;  %v5184_v5 = vmov 0 }
  0x44   : > { %v216_v24 = vadd.f32 %v215_v21, %v214_v16  ;;  %v261_v26 = vmul.f32 %v260_v25, %v252_v18  ;;  %v223_v27 = vadd.f32 %v222_v23, %v221_v19  ;;  %v262_v28 = vmul.f32 %v260_v25, %v253_v20  ;;  %v230_v52 = vld.sshfl [vmem:[#allocation1 + $0x8] sm:$0xff pattern:$0x75316420]  ;;  %v229_v53 = vld.sshfl [vmem:[#allocation1] sm:$0xff pattern:$0x75316420] }
  0x45   : > { %v233_v55 = vsel %vm5126_vm0, %v229_v53, -inf  ;;  %v240_v57 = vsel %vm5126_vm0, %v230_v52, -inf  ;;  %v680_v16 = vstv %s2788_s26  ;;  %s2800_s26 = sld [smem:[#allocation7 + $0x11]] }
  0x46   : > { %v217_v29 = vrot.slane %v216_v24, 1  ;;  %v263_v30 = vfloor.f32 %v261_v26  ;;  %v264_v31 = vfloor.f32 %v262_v28  ;;  %v224_v34 = vrot.slane %v223_v27, 1 }
  0x47   : > { %v234_v58 = vrot.slane %v233_v55, 4  ;;  %v241_v61 = vrot.slane %v240_v57, 4 }
  0x48   : > { %v218_v32 = vadd.f32 %v217_v29, %v216_v24  ;;  %v265_v33 = vmul.f32 16.0, %v263_v30  ;;  %v266_v35 = vmul.f32 16.0, %v264_v31  ;;  %v225_v39 = vadd.f32 %v224_v34, %v223_v27 }
  0x49   : > { %v235_v62 = vmax.f32 %v233_v55, %v234_v58  ;;  %v242_v3 = vmax.f32 %v240_v57, %v241_v61  ;;  %v615_v61 = vstv %s2785_s13  ;;  %s2797_s13 = sld [smem:[#allocation7 + $0x2c]] }
  0x4a   : > { %v3267_v36 = vmul.f32 0.25, %v218_v32  ;;  %v3269_v37 = vsub.f32 %v250_v9, %v265_v33  ;;  %v3271_v38 = vsub.f32 %v251_v11, %v266_v35  ;;  %v3295_v43 = vmul.f32 0.25, %v225_v39 }
  0x4b   : > { %v236_v4 = vrot.slane %v235_v62, 2  ;;  %v243_v8 = vrot.slane %v242_v3, 2 }
  0x4c   : > { %vm269_vm2 = vcmp.ge.f32.partialorder %v3269_v37, 0.0  ;;  %vm271_vm3 = vcmp.le.f32.partialorder %v3269_v37, 12.0  ;;  %vm270_vm5 = vcmp.ge.f32.partialorder %v3271_v38, 0.0  ;;  %vm272_vm6 = vcmp.le.f32.partialorder %v3271_v38, 12.0 }
  0x4d   : > { %vm3277_vm4 = vmand %vm269_vm2, %vm271_vm3  ;;  %vm275_vm7 = vcmp.le.f32.partialorder %v3269_v37, 13.0  ;;  %vm279_vm8 = vcmp.le.f32.partialorder %v3269_v37, 14.0  ;;  %vm276_vm11 = vcmp.le.f32.partialorder %v3271_v38, 13.0  ;;  %vm280_vm13 = vcmp.le.f32.partialorder %v3271_v38, 14.0 }
  0x4e   : > { %v299_v41 = vsel %vm3277_vm4, %v3267_v36, 0.0  ;;  %vm3291_vm9 = vmand %vm269_vm2, %vm275_vm7  ;;  %vm5127_vm1 = vcmp.le.f32.partialorder %v3269_v37, 15.0  ;;  %vm5128_vm3 = vcmp.le.f32.partialorder %v3271_v38, 15.0  ;;  %vm287_vm7 = vcmp.ge.f32.partialorder %v3269_v37, 1.0 }
  0x4f   : > { %303 = vrot.lane.b32.xlu0 %v299_v41, %s3101_s19  ;;  %vm3299_vm10 = vmand %vm270_vm5, %vm272_vm6  ;;  %v314_v45 = vsel %vm3291_vm9, %v3267_v36, 0.0  ;;  %v237_v9 = vmax.f32 %v235_v62, %v236_v4  ;;  %v244_v13 = vmax.f32 %v242_v3, %v243_v8  ;;  %v636_v4 = vstv %s2786_s21  ;;  %s2798_s21 = sld [smem:[#allocation7 + $0x3]] }
  0x50   : > { %318 = vrot.lane.b32.xlu1 %v314_v45, %s3101_s19  ;;  %vm3310_vm12 = vmand %vm269_vm2, %vm279_vm8  ;;  %v300_v49 = vsel %vm3299_vm10, %v3295_v43, 0.0 }
  0x51   : > { %v328_v47 = vsel %vm3310_vm12, %v3267_v36, 0.0  ;;  %vm3320_vm14 = vmand %vm270_vm5, %vm276_vm11  ;;  %vm291_vm11 = vcmp.ge.f32.partialorder %v3269_v37, 2.0  ;;  %v238_v14 = vrot.slane %v237_v9, 1  ;;  %v245_v18 = vrot.slane %v244_v13, 1 }
  0x52   : > { %332 = vrot.lane.b32.xlu2 %v328_v47, %s3101_s19  ;;  %vm3330_vm15 = vmand %vm270_vm5, %vm280_vm13  ;;  %v315_v51 = vsel %vm3320_vm14, %v3295_v43, 0.0 }
  0x53   : > { %v329_v54 = vsel %vm3330_vm15, %v3295_v43, 0.0  ;;  %vm3349_vm6 = vmand %vm269_vm2, %vm5127_vm1  ;;  %v239_v19 = vmax.f32 %v237_v9, %v238_v14  ;;  %v246_v21 = vmax.f32 %v244_v13, %v245_v18  ;;  %v658_v9 = vstv %s2787_s23  ;;  %s3107_s23 = smov 13  }
  0x54   : > { %vm3360_vm8 = vmand %vm270_vm5, %vm5128_vm3  ;;  %v342_v60 = vsel %vm3349_vm6, %v3267_v36, 0.0  ;;  %vm288_vm5 = vcmp.ge.f32.partialorder %v3271_v38, 1.0 }
  0x55   : > { %vm3369_vm2 = vmand %vm287_vm7, %vm5127_vm1  ;;  %v343_v1 = vsel %vm3360_vm8, %v3295_v43, 0.0  ;;  %vm292_vm7 = vcmp.ge.f32.partialorder %v3271_v38, 2.0  ;;  %v398_v22 = vsel %vm3277_vm4, %v239_v19, 0.0  ;;  %v399_v23 = vsel %vm3299_vm10, %v246_v21, 0.0 }
  0x56   : > { %v356_v2 = vsel %vm3369_vm2, %v3267_v36, 0.0  ;;  %vm3385_vm13 = vmand %vm288_vm5, %vm5128_vm3  ;;  %v412_v24 = vsel %vm3291_vm9, %v239_v19, 0.0  ;;  %v413_v25 = vsel %vm3320_vm14, %v246_v21, 0.0  ;;  %v426_v26 = vsel %vm3310_vm12, %v239_v19, 0.0 }
  0x57   : > { %305 = vrot.lane.b32.xlu0 %v300_v49, %s3101_s19  ;;  %v5185_v5 = vsel %vm3385_vm13, 4294967295, %v5184_v5  ;;  %vm3393_vm0 = vmand %vm291_vm11, %vm5127_vm1  ;;  %v357_v7 = vsel %vm3385_vm13, %v3295_v43, 0.0  ;;  %vm295_vm11 = vcmp.ge.f32.partialorder %v3269_v37, 3.0  ;;  %vm296_vm1 = vcmp.ge.f32.partialorder %v3271_v38, 3.0 }
  0x58   : > { %320 = vrot.lane.b32.xlu1 %v315_v51, %s3101_s19  ;;  %v5187_v6 = vsel %vm3393_vm0, 4294967295, %v5186_v6  ;;  %vm3402_vm5 = vmand %vm292_vm7, %vm5128_vm3  ;;  %v370_v11 = vsel %vm3393_vm0, %v3267_v36, 0.0  ;;  %vm5190_vm7 = vcmp.le.f32.partialorder %v3269_v37, 15.0  ;;  %vm5193_vm0 = vcmp.le.f32.partialorder %v3271_v38, 15.0 }
  0x59   : > { %v371_v12 = vsel %vm3402_vm5, %v3295_v43, 0.0  ;;  %vm3418_vm3 = vmand %vm295_vm11, %vm5190_vm7  ;;  %v427_v27 = vsel %vm3330_vm15, %v246_v21, 0.0  ;;  %v440_v28 = vsel %vm3349_vm6, %v239_v19, 0.0  ;;  %v441_v29 = vsel %vm3360_vm8, %v246_v21, 0.0 }
  0x5a   : > { %334 = vrot.lane.b32.xlu2 %v329_v54, %s3101_s19  ;;  %vm3425_vm13 = vmand %vm296_vm1, %vm5193_vm0  ;;  %v384_v17 = vsel %vm3418_vm3, %v3267_v36, 0.0  ;;  %v454_v30 = vsel %vm3369_vm2, %v239_v19, 0.0  ;;  %vm5196_vm0 = vnez %v5185_v5  ;;  %vm5197_vm4 = vnez %v5187_v6 }
  0x5b   : > { %v385_v20 = vsel %vm3425_vm13, %v3295_v43, 0.0  ;;  %v455_v31 = vsel %vm5196_vm0, %v246_v21, 0.0  ;;  %v468_v32 = vsel %vm5197_vm4, %v239_v19, 0.0  ;;  %v469_v33 = vsel %vm3402_vm5, %v246_v21, 0.0 }
  0x5c   : > { %v483_v34 = vsel %vm3425_vm13, %v246_v21, 0.0  ;;  %v482_v35 = vsel %vm3418_vm3, %v239_v19, 0.0  ;;  %vm307_vm9 = vcmask 416768   ;;  %v527_v36 = vstv %s2781_s24  ;;  %s2794_s24 = sld [smem:[#allocation7 + $0x17]] }
  0x5d   : > { %v592_v54 = vstv %s2784_s12  ;;  %s2796_s12 = sld [smem:[#allocation7 + $0x25]]  ;;  %vm540_vm10 = vcmask 523264   ;;  %vm628_vm12 = vcmask 908288   ;;  %vm605_vm14 = vcmask 384000  }
  0x5e   : > { %vm757_vm15 = vcmask 244736   ;;  %vm802_vm1 = vcmask 769024   ;;  %vm909_vm3 = vcmask 105472   ;;  %vm976_vm6 = vcmask 629760  }
  0x5f   : > { %346 = vrot.lane.b32.xlu0 %v342_v60, %s3101_s19  ;;  %vm1063_vm8 = vcmask 1014784   ;;  %vm1150_vm2 = vcmask 490496   ;;  %vm1238_vm13 = vcmask 875520   ;;  %vm1215_vm5 = vcmask 351232  }
  0x60   : > { %348 = vrot.lane.b32.xlu1 %v343_v1, %s3101_s19  ;;  %vm1367_vm11 = vcmask 211968   ;;  %vm1412_vm7 = vcmask 736256   ;;  %vm1515_vm0 = vcmask 130048   ;;  %vm1581_vm4 = vcmask 654336  }
  0x62   : > { %360 = vrot.lane.b32.xlu2 %v356_v2, %s3101_s19 }
  0x67   : > { %362 = vrot.lane.b32.xlu0 %v357_v7, %s3101_s19 }
  0x68   : > { %374 = vrot.lane.b32.xlu1 %v370_v11, %s3101_s19 }
  0x6a   : > { %376 = vrot.lane.b32.xlu2 %v371_v12, %s3101_s19 }
  0x6f   : > { %388 = vrot.lane.b32.xlu0 %v384_v17, %s3101_s19 }
  0x70   : > { %390 = vrot.lane.b32.xlu1 %v385_v20, %s3101_s19 }
  0x72   : > { %402 = vrot.lane.b32.xlu2 %v398_v22, %s3101_s19  ;;  %v702_v22 = vstv %s2789_s27  ;;  %s2801_s27 = sld [smem:[#allocation7 + $0x18]] }
  0x77   : > { %404 = vrot.lane.b32.xlu0 %v399_v23, %s3101_s19 }
  0x78   : > { %416 = vrot.lane.b32.xlu1 %v412_v24, %s3101_s19 }
  0x7a   : > { %418 = vrot.lane.b32.xlu2 %v413_v25, %s3101_s19 }
  0x7f   : > { %430 = vrot.lane.b32.xlu0 %v426_v26, %s3101_s19 }
  0x80   : > { %432 = vrot.lane.b32.xlu1 %v427_v27, %s3101_s19 }
  0x82   : > { %444 = vrot.lane.b32.xlu2 %v440_v28, %s3101_s19 }
  0x87   : > { %446 = vrot.lane.b32.xlu0 %v441_v29, %s3101_s19  ;;  %v722_v29 = vstv %s2790_s28  ;;  %s2802_s28 = sld [smem:[#allocation7 + $0x1f]] }
  0x88   : > { %458 = vrot.lane.b32.xlu1 %v454_v30, %s3101_s19 }
  0x8a   : > { %460 = vrot.lane.b32.xlu2 %v455_v31, %s3101_s19 }
  0x8f   : > { %472 = vrot.lane.b32.xlu0 %v468_v32, %s3101_s19 }
  0x90   : > { %474 = vrot.lane.b32.xlu1 %v469_v33, %s3101_s19 }
  0x92   : > { %486 = vrot.lane.b32.xlu2 %v482_v35, %s3101_s19 }
  0x97   : > { %488 = vrot.lane.b32.xlu0 %v483_v34, %s3101_s19  ;;  %s2793_s19 = sld [smem:[#allocation7 + $0x10]] }
  0xac   : > { %v3496_v47 = vpop.permute.xlu2 %332 }
  0xb4   : > { %v3507_v55 = vpop.permute.xlu2 %334 }
  0xbc   : > { %v3522_v1 = vpop.permute.xlu2 %360 }
  0xc1   : > { %v304_v37 = vpop.permute.xlu0 %303 }
  0xc2   : > { %v3480_v38 = vsel %vm307_vm9, 0.0, %v304_v37  ;;  %v319_v49 = vpop.permute.xlu1 %318 }
  0xc3   : > { %v528_v39 = vmul.f32 %v527_v36, %v3480_v38  ;;  %v549_v44 = vmul.f32 %v548_v40, %v3480_v38  ;;  %v571_v50 = vmul.f32 %v570_v48, %v3480_v38  ;;  %v3504_v53 = vsel %vm307_vm9, 0.0, %v319_v49 }
  0xc4   : > { %v593_v56 = vmul.f32 %v592_v54, %v3504_v53  ;;  %v616_v2 = vmul.f32 %v615_v61, %v3504_v53  ;;  %v637_v5 = vmul.f32 %v636_v4, %v3504_v53  ;;  %v3532_v8 = vpop.permute.xlu2 %376  ;;  %v659_v12 = vmul.f32 %v658_v9, %v3504_v53 }
  0xc5   : > { %534 = vrot.lane.b32.xlu1 %v528_v39, %s3102_s10  ;;  %v681_v17 = vmul.f32 %v680_v16, %v3504_v53  ;;  %v703_v24 = vmul.f32 %v702_v22, %v3504_v53  ;;  %v723_v31 = vmul.f32 %v722_v29, %v3504_v53 }
  0xc9   : > { %v306_v41 = vpop.permute.xlu0 %305 }
  0xca   : > { %v3485_v42 = vsel %vm307_vm9, %v304_v37, %v306_v41  ;;  %v3488_v43 = vsel %vm307_vm9, %v306_v41, 0.0  ;;  %v321_v59 = vpop.permute.xlu1 %320  ;;  %v744_v37 = vstv %s2791_s5  ;;  %s3108_s5 = smov 77  }
  0xcb   : > { %5198 = vst [vmem:[#allocation13_spill] sm:$0xff] %v3485_v42  ;;  %v530_v45 = vmul.f32 %v527_v36, %v3488_v43  ;;  %v529_v46 = vmul.f32 %v527_v36, %v3485_v42  ;;  %v551_v51 = vmul.f32 %v548_v40, %v3488_v43  ;;  %v550_v52 = vmul.f32 %v548_v40, %v3485_v42 }
  0xcc   : > { %v573_v57 = vmul.f32 %v570_v48, %v3488_v43  ;;  %v572_v58 = vmul.f32 %v570_v48, %v3485_v42  ;;  %v3515_v60 = vsel %vm307_vm9, %v321_v59, 0.0  ;;  %v3519_v62 = vsel %vm307_vm9, %v319_v49, %v321_v59  ;;  %v3547_v15 = vpop.permute.xlu2 %402 }
  0xcd   : > { %555 = vrot.lane.b32.xlu1 %v549_v44, %s3102_s10  ;;  %538 = vrot.lane.b32.xlu0 %v530_v45, %s3102_s10  ;;  %v595_v63 = vmul.f32 %v592_v54, %v3515_v60  ;;  %v594_v3 = vmul.f32 %v592_v54, %v3519_v62  ;;  %v618_v6 = vmul.f32 %v615_v61, %v3515_v60  ;;  %v3585_v36 = vsel %vm307_vm9, 0.0, %v3496_v47 }
  0xce   : > { %536 = vrot.lane.b32.xlu2 %v529_v46, %s3102_s10  ;;  %v617_v7 = vmul.f32 %v615_v61, %v3519_v62  ;;  %v639_v13 = vmul.f32 %v636_v4, %v3515_v60  ;;  %v638_v14 = vmul.f32 %v636_v4, %v3519_v62  ;;  %v661_v18 = vmul.f32 %v658_v9, %v3515_v60 }
  0xcf   : > { %v660_v21 = vmul.f32 %v658_v9, %v3519_v62  ;;  %v683_v25 = vmul.f32 %v680_v16, %v3515_v60  ;;  %v682_v26 = vmul.f32 %v680_v16, %v3519_v62  ;;  %v705_v32 = vmul.f32 %v702_v22, %v3515_v60 }
  0xd0   : > { %v704_v33 = vmul.f32 %v702_v22, %v3519_v62  ;;  %v745_v39 = vmul.f32 %v744_v37, %v3585_v36  ;;  %v725_v40 = vmul.f32 %v722_v29, %v3515_v60  ;;  %v724_v41 = vmul.f32 %v722_v29, %v3519_v62 }
  0xd1   : > { %v3537_v10 = vpop.permute.xlu0 %346  ;;  %v3597_v45 = vsel %vm307_vm9, %v3507_v55, 0.0  ;;  %v767_v46 = vstv %s2792_s7  ;;  %v3602_v48 = vsel %vm307_vm9, %v3496_v47, %v3507_v55  ;;  %v789_v47 = vstv %s2793_s19  ;;  %s2803_s7 = sld [smem:[#allocation7 + $0x26]] }
  0xd2   : > { %v3539_v11 = vpop.permute.xlu1 %348  ;;  %v746_v53 = vmul.f32 %v744_v37, %v3602_v48  ;;  %v769_v59 = vmul.f32 %v767_v46, %v3602_v48  ;;  %v810_v61 = vstv %s2794_s24  ;;  %v854_v22 = vstv %s2796_s12  ;;  %s2805_s19 = sld [smem:[#allocation7 + $0x4]] }
  0xd3   : > { %v811_v62 = vmul.f32 %v810_v61, %v3585_v36  ;;  %v813_v9 = vmul.f32 %v810_v61, %v3597_v45  ;;  %s2778_s24 = sld [smem:[#allocation7 + $0x7]] }
  0xd4   : > { %v3559_v23 = vpop.permute.xlu2 %418  ;;  %s2808_s12 = sld [smem:[#allocation7 + $0x19]] }
  0xd5   : > { %577 = vrot.lane.b32.xlu1 %v571_v50, %s3102_s10  ;;  %559 = vrot.lane.b32.xlu0 %v551_v51, %s3102_s10  ;;  %v768_v51 = vmul.f32 %v767_v46, %v3585_v36 }
  0xd6   : > { %557 = vrot.lane.b32.xlu2 %v550_v52, %s3102_s10  ;;  %v747_v52 = vmul.f32 %v744_v37, %v3597_v45 }
  0xd9   : > { %v3551_v19 = vpop.permute.xlu0 %362 }
  0xda   : > { %v3553_v20 = vpop.permute.xlu1 %374 }
  0xdc   : > { %v3571_v30 = vpop.permute.xlu2 %444 }
  0xdd   : > { %599 = vrot.lane.b32.xlu1 %v593_v56, %s3103_s18  ;;  %581 = vrot.lane.b32.xlu0 %v573_v57, %s3102_s10  ;;  %5199 = vst [vmem:[#allocation14_spill] sm:$0xff] %v3571_v30  ;;  %v790_v56 = vmul.f32 %v789_v47, %v3585_v36  ;;  %v770_v57 = vmul.f32 %v767_v46, %v3597_v45 }
  0xde   : > { %579 = vrot.lane.b32.xlu2 %v572_v58, %s3102_s10  ;;  %s2795_s10 = sld [smem:[#allocation7 + $0x1e]] }
  0xe1   : > { %v3566_v27 = vpop.permute.xlu0 %388 }
  0xe2   : > { %v3568_v28 = vpop.permute.xlu1 %390 }
  0xe4   : > { %v3590_v44 = vpop.permute.xlu2 %460 }
  0xe5   : > { %622 = vrot.lane.b32.xlu1 %v616_v2, %s3104_s22  ;;  %603 = vrot.lane.b32.xlu0 %v595_v63, %s3103_s18  ;;  %5200 = vst [vmem:[#allocation15_spill] sm:$0xff] %v3590_v44  ;;  %v792_v63 = vmul.f32 %v789_v47, %v3597_v45  ;;  %v791_v2 = vmul.f32 %v789_v47, %v3602_v48 }
  0xe6   : > { %601 = vrot.lane.b32.xlu2 %v594_v3, %s3103_s18 }
  0xe9   : > { %v3579_v34 = vpop.permute.xlu0 %404 }
  0xea   : > { %v3581_v35 = vpop.permute.xlu1 %416 }
  0xec   : > { %v3614_v54 = vpop.permute.xlu2 %486 }
  0xed   : > { %643 = vrot.lane.b32.xlu1 %v637_v5, %s3104_s22  ;;  %626 = vrot.lane.b32.xlu0 %v618_v6, %s3104_s22  ;;  %5201 = vst [vmem:[#allocation16_spill] sm:$0xff] %v3614_v54  ;;  %v832_v6 = vstv %s2795_s10  ;;  %s3109_s10 = smov 124  }
  0xee   : > { %624 = vrot.lane.b32.xlu2 %v617_v7, %s3104_s22  ;;  %v833_v7 = vmul.f32 %v832_v6, %v3585_v36  ;;  %v834_v29 = vmul.f32 %v832_v6, %v3602_v48 }
  0xf1   : > { %v3604_v49 = vpop.permute.xlu0 %430 }
  0xf2   : > { %v3606_v50 = vpop.permute.xlu1 %432 }
  0xf5   : > { %665 = vrot.lane.b32.xlu1 %v659_v12, %s3104_s22  ;;  %647 = vrot.lane.b32.xlu0 %v639_v13, %s3104_s22  ;;  %v812_v12 = vmul.f32 %v810_v61, %v3602_v48  ;;  %v497_v13 = vstv %s3629_s11  ;;  %v896_v61 = vstv %s2798_s21  ;;  %s2807_s11 = sld [smem:[#allocation7 + $0x12]]  ;;  %s3110_s21 = smov 60  }
  0xf6   : > { %645 = vrot.lane.b32.xlu2 %v638_v14, %s3104_s22 }
  0xf9   : > { %v3616_v55 = vpop.permute.xlu0 %446 }
  0xfa   : > { %5202 = vst [vmem:[#allocation17_spill] sm:$0xff] %v3616_v55  ;;  %v3620_v58 = vpop.permute.xlu1 %458 }
  0xfb   : > { %5203 = vst [vmem:[#allocation18_spill] sm:$0xff] %v3620_v58  ;;  %v3899_v58 = vsel %vm307_vm9, %v3532_v8, 0.0 }
  0xfd   : > { %687 = vrot.lane.b32.xlu1 %v681_v17, %s3104_s22  ;;  %669 = vrot.lane.b32.xlu0 %v661_v18, %s3104_s22  ;;  %v498_v17 = vmul.f32 %v497_v13, %v3480_v38 }
  0xfe   : > { %667 = vrot.lane.b32.xlu2 %v660_v21, %s3104_s22 }
 0x101   : > { %v3631_v3 = vpop.permute.xlu0 %472 }
 0x102   : > { %5204 = vst [vmem:[#allocation19_spill] sm:$0xff] %v3631_v3  ;;  %v3635_v4 = vpop.permute.xlu1 %474 }
 0x103   : > { %5205 = vst [vmem:[#allocation20_spill] sm:$0xff] %v3635_v4 }
 0x105   : > { %709 = vrot.lane.b32.xlu1 %v703_v24, %s3103_s18  ;;  %691 = vrot.lane.b32.xlu0 %v683_v25, %s3104_s22  ;;  %v855_v25 = vmul.f32 %v854_v22, %v3585_v36 }
 0x106   : > { %689 = vrot.lane.b32.xlu2 %v682_v26, %s3104_s22  ;;  %v835_v26 = vmul.f32 %v832_v6, %v3597_v45  ;;  %s2799_s22 = sld [smem:[#allocation7 + $0xa]] }
 0x109   : > { %v3647_v14 = vpop.permute.xlu0 %488 }
 0x10a   : > { %5206 = vst [vmem:[#allocation21_spill] sm:$0xff] %v3647_v14 }
 0x10d   : > { %729 = vrot.lane.b32.xlu1 %v723_v31, %s3103_s18  ;;  %713 = vrot.lane.b32.xlu0 %v705_v32, %s3103_s18  ;;  %v499_v32 = vmul.f32 %v497_v13, %v3485_v42 }
 0x10e   : > { %711 = vrot.lane.b32.xlu2 %v704_v33, %s3103_s18 }
 0x115   : > { %751 = vrot.lane.b32.xlu1 %v745_v39, %s3105_s8  ;;  %733 = vrot.lane.b32.xlu0 %v725_v40, %s3103_s18  ;;  %v876_v40 = vstv %s2797_s13  ;;  %s2809_s13 = sld [smem:[#allocation7 + $0x20]] }
 0x116   : > { %731 = vrot.lane.b32.xlu2 %v724_v41, %s3103_s18  ;;  %s2779_s18 = sld [smem:[#allocation7 + $0xe]]  ;;  %v877_v46 = vmul.f32 %v876_v40, %v3585_v36  ;;  %v3677_v36 = vsel %vm307_vm9, 0.0, %v3537_v10  ;;  %v878_v6 = vmul.f32 %v876_v40, %v3602_v48 }
 0x11d   : > { %774 = vrot.lane.b32.xlu1 %v768_v51, %s3105_s8  ;;  %755 = vrot.lane.b32.xlu0 %v747_v52, %s3105_s8  ;;  %v857_v51 = vmul.f32 %v854_v22, %v3597_v45  ;;  %v856_v52 = vmul.f32 %v854_v22, %v3602_v48 }
 0x11e   : > { %753 = vrot.lane.b32.xlu2 %v746_v53, %s3105_s8  ;;  %v3666_v53 = vstv %s2779_s18  ;;  %s2810_s18 = sld [smem:[#allocation7 + $0x27]] }
 0x125   : > { %796 = vrot.lane.b32.xlu1 %v790_v56, %s3106_s9  ;;  %778 = vrot.lane.b32.xlu0 %v770_v57, %s3105_s8  ;;  %v512_v56 = vmul.f32 %v3666_v53, %v3480_v38 }
 0x126   : > { %776 = vrot.lane.b32.xlu2 %v769_v59, %s3105_s8 }
 0x128   : > { %v537_v60 = vpop.permute.xlu2 %536 }
 0x12d   : > { %817 = vrot.lane.b32.xlu1 %v811_v62, %s3106_s9  ;;  %800 = vrot.lane.b32.xlu0 %v792_v63, %s3106_s9  ;;  %v879_v63 = vmul.f32 %v876_v40, %v3597_v45  ;;  %v3694_v45 = vsel %vm307_vm9, %v3539_v11, 0.0 }
 0x12e   : > { %798 = vrot.lane.b32.xlu2 %v791_v2, %s3106_s9  ;;  %v897_v2 = vmul.f32 %v896_v61, %v3677_v36  ;;  %v899_v22 = vmul.f32 %v896_v61, %v3694_v45 }
 0x130   : > { %v3638_v5 = vpop.permute.xlu2 %557 }
 0x135   : > { %839 = vrot.lane.b32.xlu1 %v833_v7, %s3106_s9  ;;  %821 = vrot.lane.b32.xlu0 %v813_v9, %s3106_s9  ;;  %v513_v9 = vmul.f32 %v3666_v53, %v3485_v42 }
 0x136   : > { %819 = vrot.lane.b32.xlu2 %v812_v12, %s3106_s9 }
 0x137   : > { %v535_v16 = vpop.permute.xlu1 %534 }
 0x138   : > { %v541_v18 = vsel %vm540_vm10, %v535_v16, %v537_v60  ;;  %v580_v21 = vpop.permute.xlu2 %579  ;;  %v919_v16 = vstv %s2799_s22  ;;  %s2811_s22 = sld [smem:[#allocation7 + $0x2e]] }
 0x139   : > { %v545_v24 = vadd.f32 %v541_v18, %v498_v17  ;;  %v3703_v17 = vsel %vm307_vm9, %v3537_v10, %v3539_v11 }
 0x13d   : > { %861 = vrot.lane.b32.xlu1 %v855_v25, %s3106_s9  ;;  %843 = vrot.lane.b32.xlu0 %v835_v26, %s3106_s9  ;;  %v920_v25 = vmul.f32 %v919_v16, %v3677_v36  ;;  %v898_v26 = vmul.f32 %v896_v61, %v3703_v17 }
 0x13e   : > { %841 = vrot.lane.b32.xlu2 %v834_v29, %s3106_s9 }
 0x13f   : > { %v3657_v31 = vpop.permute.xlu1 %555  ;;  %v539_v33 = vpop.permute.xlu0 %538 }
 0x140   : > { %v3660_v37 = vpop.permute.xlu2 %601  ;;  %v542_v39 = vsel %vm540_vm10, %v537_v60, %v539_v33 }
 0x141   : > { %v546_v41 = vadd.f32 %v542_v39, %v499_v32  ;;  %v941_v32 = vstv %s2800_s26  ;;  %v922_v39 = vmul.f32 %v919_v16, %v3694_v45  ;;  %s2813_s26 = sld [smem:[#allocation7 + $0xc]] }
 0x142   : > { %v942_v40 = vmul.f32 %v941_v32, %v3677_v36  ;;  %v944_v61 = vmul.f32 %v941_v32, %v3694_v45 }
 0x145   : > { %883 = vrot.lane.b32.xlu1 %v877_v46, %s3105_s8  ;;  %865 = vrot.lane.b32.xlu0 %v857_v51, %s3106_s9  ;;  %v921_v46 = vmul.f32 %v919_v16, %v3703_v17 }
 0x146   : > { %863 = vrot.lane.b32.xlu2 %v856_v52, %s3106_s9  ;;  %s2806_s9 = sld [smem:[#allocation7 + $0xb]] }
 0x147   : > { %v578_v47 = vpop.permute.xlu1 %577  ;;  %v3673_v57 = vpop.permute.xlu0 %559 }
 0x148   : > { %v583_v59 = vsel %vm540_vm10, %v578_v47, %v580_v21  ;;  %v625_v60 = vpop.permute.xlu2 %624 }
 0x149   : > { %v588_v62 = vadd.f32 %v583_v59, %v512_v56 }
 0x14d   : > { %887 = vrot.lane.b32.xlu0 %v879_v63, %s3105_s8  ;;  %903 = vrot.lane.b32.xlu1 %v897_v2, %s3107_s23  ;;  %v943_v2 = vmul.f32 %v941_v32, %v3703_v17 }
 0x14e   : > { %885 = vrot.lane.b32.xlu2 %v878_v6, %s3105_s8  ;;  %s2804_s8 = sld [smem:[#allocation7 + $0x2d]] }
 0x14f   : > { %v3686_v7 = vpop.permute.xlu1 %599  ;;  %v3690_v12 = vpop.permute.xlu0 %581 }
 0x150   : > { %5207 = vst [vmem:[#allocation22_spill] sm:$0xff] %v3686_v7  ;;  %v3696_v13 = vpop.permute.xlu2 %645  ;;  %v584_v48 = vsel %vm540_vm10, %v580_v21, %v3690_v12 }
 0x151   : > { %v589_v18 = vadd.f32 %v584_v48, %v513_v9 }
 0x155   : > { %907 = vrot.lane.b32.xlu0 %v899_v22, %s3107_s23  ;;  %926 = vrot.lane.b32.xlu1 %v920_v25, %s3107_s23 }
 0x156   : > { %905 = vrot.lane.b32.xlu2 %v898_v26, %s3107_s23 }
 0x157   : > { %v623_v21 = vpop.permute.xlu1 %622  ;;  %v3711_v29 = vpop.permute.xlu0 %603 }
 0x158   : > { %v629_v10 = vsel %vm628_vm12, %v623_v21, %v625_v60  ;;  %v668_v11 = vpop.permute.xlu2 %667 }
 0x159   : > { %v633_v33 = vadd.f32 %v629_v10, %v545_v24  ;;  %v963_v24 = vstv %s2801_s27  ;;  %s3111_s27 = smov 43  }
 0x15a   : > { %v964_v63 = vmul.f32 %v963_v24, %v3677_v36  ;;  %v966_v22 = vmul.f32 %v963_v24, %v3694_v45  ;;  %v965_v26 = vmul.f32 %v963_v24, %v3703_v17 }
 0x15d   : > { %930 = vrot.lane.b32.xlu0 %v922_v39, %s3107_s23  ;;  %948 = vrot.lane.b32.xlu1 %v942_v40, %s3107_s23  ;;  %v1006_v39 = vstv %s2803_s7  ;;  %s2815_s7 = sld [smem:[#allocation7 + $0x1a]] }
 0x15e   : > { %928 = vrot.lane.b32.xlu2 %v921_v46, %s3107_s23 }
 0x15f   : > { %v3720_v51 = vpop.permute.xlu1 %643  ;;  %v627_v52 = vpop.permute.xlu0 %626 }
 0x160   : > { %v3722_v47 = vpop.permute.xlu2 %689  ;;  %v630_v56 = vsel %vm628_vm12, %v625_v60, %v627_v52  ;;  %v1007_v52 = vmul.f32 %v1006_v39, %v3677_v36 }
 0x161   : > { %5208 = vst [vmem:[#allocation23_spill] sm:$0xff] %v3722_v47  ;;  %v634_v59 = vadd.f32 %v630_v56, %v546_v41  ;;  %v984_v41 = vstv %s2802_s28  ;;  %s2814_s28 = sld [smem:[#allocation7 + $0x13]] }
 0x162   : > { %v985_v25 = vmul.f32 %v984_v41, %v3677_v36  ;;  %v987_v46 = vmul.f32 %v984_v41, %v3694_v45  ;;  %v986_v56 = vmul.f32 %v984_v41, %v3703_v17  ;;  %v1008_v41 = vmul.f32 %v1006_v39, %v3703_v17 }
 0x165   : > { %952 = vrot.lane.b32.xlu0 %v944_v61, %s3107_s23  ;;  %970 = vrot.lane.b32.xlu1 %v964_v63, %s3108_s5 }
 0x166   : > { %950 = vrot.lane.b32.xlu2 %v943_v2, %s3107_s23  ;;  %s2812_s23 = sld [smem:[#allocation7 + $0x5]] }
 0x167   : > { %v666_v6 = vpop.permute.xlu1 %665  ;;  %v3731_v9 = vpop.permute.xlu0 %647 }
 0x168   : > { %v671_v60 = vsel %vm628_vm12, %v666_v6, %v668_v11  ;;  %v712_v48 = vpop.permute.xlu2 %711  ;;  %v1009_v6 = vmul.f32 %v1006_v39, %v3694_v45 }
 0x169   : > { %v3734_v16 = vadd.f32 %v671_v60, %v588_v62 }
 0x16d   : > { %974 = vrot.lane.b32.xlu0 %v966_v22, %s3108_s5  ;;  %991 = vrot.lane.b32.xlu1 %v985_v25, %s3108_s5 }
 0x16e   : > { %972 = vrot.lane.b32.xlu2 %v965_v26, %s3108_s5 }
 0x16f   : > { %v3742_v21 = vpop.permute.xlu1 %687  ;;  %v3744_v10 = vpop.permute.xlu0 %669 }
 0x170   : > { %5209 = vst [vmem:[#allocation24_spill] sm:$0xff] %v3742_v21  ;;  %v3746_v32 = vpop.permute.xlu2 %731  ;;  %v672_v62 = vsel %vm628_vm12, %v668_v11, %v3744_v10 }
 0x171   : > { %v677_v40 = vadd.f32 %v672_v62, %v589_v18  ;;  %v1028_v18 = vstv %s2804_s8  ;;  %s2816_s8 = sld [smem:[#allocation7 + $0x21]] }
 0x172   : > { %v1029_v60 = vmul.f32 %v1028_v18, %v3677_v36  ;;  %v1050_v36 = vstv %s2805_s19  ;;  %s2817_s19 = sld [smem:[#allocation7 + $0x28]] }
 0x175   : > { %995 = vrot.lane.b32.xlu0 %v987_v46, %s3108_s5  ;;  %1013 = vrot.lane.b32.xlu1 %v1007_v52, %s3108_s5  ;;  %v3778_v46 = vstv %s2778_s24  ;;  %v562_v52 = vsel %vm540_vm10, %v3638_v5, %v3673_v57  ;;  %s2818_s24 = sld [smem:[#allocation7 + $0x2f]] }
 0x176   : > { %993 = vrot.lane.b32.xlu2 %v986_v56, %s3108_s5  ;;  %v505_v56 = vmul.f32 %v3778_v46, %v3485_v42 }
 0x177   : > { %v710_v24 = vpop.permute.xlu1 %709  ;;  %v3756_v61 = vpop.permute.xlu0 %691 }
 0x178   : > { %v715_v11 = vsel %vm605_vm14, %v710_v24, %v712_v48  ;;  %v754_v63 = vpop.permute.xlu2 %753  ;;  %v1031_v24 = vmul.f32 %v1028_v18, %v3694_v45 }
 0x179   : > { %v3759_v2 = vadd.f32 %v715_v11, %v633_v33  ;;  %v3771_v33 = vsel %vm307_vm9, 0.0, %v3522_v1 }
 0x17a   : > { %v1051_v11 = vmul.f32 %v1050_v36, %v3771_v33 }
 0x17d   : > { %1017 = vrot.lane.b32.xlu0 %v1009_v6, %s3108_s5  ;;  %1035 = vrot.lane.b32.xlu1 %v1029_v60, %s3108_s5  ;;  %v567_v6 = vadd.f32 %v562_v52, %v505_v56  ;;  %v1071_v52 = vstv %s2806_s9  ;;  %v3807_v56 = vsel %vm307_vm9, %v3522_v1, %v3551_v19  ;;  %s2819_s9 = sld [smem:[#allocation7 + $0x6]] }
 0x17e   : > { %1015 = vrot.lane.b32.xlu2 %v1008_v41, %s3108_s5  ;;  %v1052_v0 = vmul.f32 %v1050_v36, %v3807_v56 }
 0x17f   : > { %v3767_v22 = vpop.permute.xlu1 %729  ;;  %v714_v25 = vpop.permute.xlu0 %713 }
 0x180   : > { %v3773_v26 = vpop.permute.xlu2 %776  ;;  %v716_v62 = vsel %vm605_vm14, %v712_v48, %v714_v25  ;;  %v650_v48 = vsel %vm628_vm12, %v3696_v13, %v3731_v9  ;;  %v3798_v25 = vsel %vm307_vm9, %v3551_v19, 0.0 }
 0x181   : > { %v3776_v39 = vadd.f32 %v716_v62, %v634_v59  ;;  %v1030_v59 = vmul.f32 %v1028_v18, %v3703_v17  ;;  %v655_v60 = vadd.f32 %v650_v48, %v567_v6  ;;  %v514_v48 = vmul.f32 %v3666_v53, %v3488_v43 }
 0x182   : > { %v1053_v6 = vmul.f32 %v1050_v36, %v3798_v25 }
 0x183   : > { %v590_v14 = vadd.f32 %v3690_v12, %v514_v48  ;;  %v1073_v48 = vmul.f32 %v1071_v52, %v3807_v56 }
 0x185   : > { %1039 = vrot.lane.b32.xlu0 %v1031_v24, %s3108_s5  ;;  %1057 = vrot.lane.b32.xlu1 %v1051_v11, %s3109_s10  ;;  %v678_v1 = vadd.f32 %v3744_v10, %v590_v14 }
 0x186   : > { %1037 = vrot.lane.b32.xlu2 %v1030_v59, %s3108_s5  ;;  %v1072_v59 = vmul.f32 %v1071_v52, %v3771_v33  ;;  %s3112_s5 = smov 107  }
 0x187   : > { %v752_v41 = vpop.permute.xlu1 %751  ;;  %v3794_v45 = vpop.permute.xlu0 %733 }
 0x188   : > { %v758_v62 = vsel %vm757_vm15, %v752_v41, %v754_v63  ;;  %v799_v17 = vpop.permute.xlu2 %798  ;;  %v736_v18 = vsel %vm605_vm14, %v3746_v32, %v3794_v45 }
 0x189   : > { %v3809_v24 = vadd.f32 %v758_v62, %v677_v40  ;;  %v3811_v11 = vadd.f32 %v736_v18, %v655_v60  ;;  %v1093_v62 = vstv %s2807_s11  ;;  %v1074_v18 = vmul.f32 %v1071_v52, %v3798_v25  ;;  %s3113_s11 = smov 26  }
 0x18a   : > { %v1094_v12 = vmul.f32 %v1093_v62, %v3771_v33  ;;  %v1096_v52 = vmul.f32 %v1093_v62, %v3798_v25 }
 0x18d   : > { %1078 = vrot.lane.b32.xlu1 %v1072_v59, %s3109_s10  ;;  %1061 = vrot.lane.b32.xlu0 %v1053_v6, %s3109_s10  ;;  %v1115_v59 = vstv %s2808_s12  ;;  %s2821_s12 = sld [smem:[#allocation7 + $0x14]] }
 0x18e   : > { %1059 = vrot.lane.b32.xlu2 %v1052_v0, %s3109_s10 }
 0x18f   : > { %v3823_v19 = vpop.permute.xlu1 %774  ;;  %v756_v40 = vpop.permute.xlu0 %755 }
 0x190   : > { %5210 = vst [vmem:[#allocation25_spill] sm:$0xff] %v3823_v19  ;;  %v3825_v53 = vpop.permute.xlu2 %819  ;;  %v759_v60 = vsel %vm757_vm15, %v754_v63, %v756_v40  ;;  %v1095_v40 = vmul.f32 %v1093_v62, %v3807_v56  ;;  %v1118_v62 = vmul.f32 %v1115_v59, %v3798_v25 }
 0x191   : > { %v3828_v36 = vadd.f32 %v759_v60, %v678_v1  ;;  %v1116_v1 = vmul.f32 %v1115_v59, %v3771_v33 }
 0x195   : > { %1100 = vrot.lane.b32.xlu1 %v1094_v12, %s3109_s10  ;;  %1082 = vrot.lane.b32.xlu0 %v1074_v18, %s3109_s10 }
 0x196   : > { %1080 = vrot.lane.b32.xlu2 %v1073_v48, %s3109_s10 }
 0x197   : > { %v797_v0 = vpop.permute.xlu1 %796  ;;  %v3836_v14 = vpop.permute.xlu0 %778 }
 0x198   : > { %v803_v10 = vsel %vm802_vm1, %v797_v0, %v799_v17  ;;  %v842_v63 = vpop.permute.xlu2 %841 }
 0x199   : > { %v807_v6 = vadd.f32 %v803_v10, %v3759_v2  ;;  %v1137_v2 = vstv %s2809_s13  ;;  %s2822_s13 = sld [smem:[#allocation7 + $0x1b]] }
 0x19a   : > { %v1138_v10 = vmul.f32 %v1137_v2, %v3771_v33 }
 0x19d   : > { %1122 = vrot.lane.b32.xlu1 %v1116_v1, %s3109_s10  ;;  %1104 = vrot.lane.b32.xlu0 %v1096_v52, %s3109_s10  ;;  %v1117_v1 = vmul.f32 %v1115_v59, %v3807_v56  ;;  %v763_v52 = vadd.f32 %v752_v41, %v3734_v16 }
 0x19e   : > { %1102 = vrot.lane.b32.xlu2 %v1095_v40, %s3109_s10 }
 0x19f   : > { %v3846_v60 = vpop.permute.xlu1 %817  ;;  %v801_v12 = vpop.permute.xlu0 %800 }
 0x1a0   : > { %v3848_v18 = vpop.permute.xlu2 %863  ;;  %v804_v48 = vsel %vm802_vm1, %v799_v17, %v801_v12 }
 0x1a1   : > { %5211 = vst [vmem:[#allocation26_spill] sm:$0xff] %v3848_v18  ;;  %v808_v0 = vadd.f32 %v804_v48, %v3776_v39  ;;  %v1158_v48 = vstv %s2810_s18  ;;  %s3114_s18 = smov 90  }
 0x1a2   : > { %v1159_v59 = vmul.f32 %v1158_v48, %v3771_v33 }
 0x1a5   : > { %1144 = vrot.lane.b32.xlu1 %v1138_v10, %s3110_s21  ;;  %1126 = vrot.lane.b32.xlu0 %v1118_v62, %s3109_s10  ;;  %v1140_v10 = vmul.f32 %v1137_v2, %v3798_v25  ;;  %v1139_v62 = vmul.f32 %v1137_v2, %v3807_v56  ;;  %v1161_v2 = vmul.f32 %v1158_v48, %v3798_v25 }
 0x1a6   : > { %1124 = vrot.lane.b32.xlu2 %v1117_v1, %s3109_s10  ;;  %s2820_s10 = sld [smem:[#allocation7 + $0xd]] }
 0x1a7   : > { %v840_v17 = vpop.permute.xlu1 %839  ;;  %v3859_v40 = vpop.permute.xlu0 %821 }
 0x1a8   : > { %v845_v39 = vsel %vm802_vm1, %v840_v17, %v842_v63  ;;  %v886_v12 = vpop.permute.xlu2 %885  ;;  %v1180_v17 = vstv %s2811_s22  ;;  %s2824_s22 = sld [smem:[#allocation7 + $0x29]] }
 0x1a9   : > { %v3862_v54 = vadd.f32 %v845_v39, %v763_v52  ;;  %v1181_v3 = vmul.f32 %v1180_v17, %v3771_v33 }
 0x1ad   : > { %1165 = vrot.lane.b32.xlu1 %v1159_v59, %s3110_s21  ;;  %1148 = vrot.lane.b32.xlu0 %v1140_v10, %s3110_s21  ;;  %v1160_v59 = vmul.f32 %v1158_v48, %v3807_v56 }
 0x1ae   : > { %1146 = vrot.lane.b32.xlu2 %v1139_v62, %s3110_s21 }
 0x1af   : > { %v3870_v16 = vpop.permute.xlu1 %861  ;;  %v844_v41 = vpop.permute.xlu0 %843 }
 0x1b0   : > { %5212 = vst [vmem:[#allocation27_spill] sm:$0xff] %v3870_v16  ;;  %v3872_v1 = vpop.permute.xlu2 %905  ;;  %v846_v52 = vsel %vm802_vm1, %v842_v63, %v844_v41  ;;  %v3886_v63 = vsel %vm307_vm9, 0.0, %v3553_v20 }
 0x1b1   : > { %v851_v39 = vadd.f32 %v846_v52, %v3809_v24  ;;  %v1202_v52 = vstv %s2812_s23  ;;  %s2825_s23 = sld [smem:[#allocation7 + $0x30]] }
 0x1b2   : > { %v1203_v48 = vmul.f32 %v1202_v52, %v3886_v63 }
 0x1b5   : > { %1187 = vrot.lane.b32.xlu1 %v1181_v3, %s3110_s21  ;;  %1169 = vrot.lane.b32.xlu0 %v1161_v2, %s3110_s21  ;;  %v1183_v3 = vmul.f32 %v1180_v17, %v3798_v25  ;;  %v1182_v2 = vmul.f32 %v1180_v17, %v3807_v56  ;;  %v3907_v56 = vsel %vm307_vm9, %v3553_v20, %v3532_v8 }
 0x1b6   : > { %1167 = vrot.lane.b32.xlu2 %v1160_v59, %s3110_s21 }
 0x1b7   : > { %v884_v10 = vpop.permute.xlu1 %883  ;;  %v3882_v62 = vpop.permute.xlu0 %865 }
 0x1b8   : > { %5213 = vst [vmem:[#allocation28_spill] sm:$0xff] %v3882_v62  ;;  %v889_v24 = vsel %vm757_vm15, %v884_v10, %v886_v12  ;;  %v929_v33 = vpop.permute.xlu2 %928 }
 0x1b9   : > { %v893_v4 = vadd.f32 %v889_v24, %v807_v6  ;;  %v1225_v24 = vstv %s2813_s26  ;;  %s4055_s26 = sld [smem:[#allocation7 + $0x31]] }
 0x1ba   : > { %v1228_v44 = vmul.f32 %v1225_v24, %v3899_v58 }
 0x1bd   : > { %1209 = vrot.lane.b32.xlu1 %v1203_v48, %s3111_s27  ;;  %1191 = vrot.lane.b32.xlu0 %v1183_v3, %s3110_s21  ;;  %v1226_v48 = vmul.f32 %v1225_v24, %v3886_v63  ;;  %v1205_v3 = vmul.f32 %v1202_v52, %v3899_v58 }
 0x1be   : > { %1189 = vrot.lane.b32.xlu2 %v1182_v2, %s3110_s21  ;;  %v1204_v2 = vmul.f32 %v1202_v52, %v3907_v56  ;;  %s2823_s21 = sld [smem:[#allocation7 + $0x22]] }
 0x1bf   : > { %v3895_v59 = vpop.permute.xlu1 %903  ;;  %v888_v10 = vpop.permute.xlu0 %887 }
 0x1c0   : > { %5214 = vst [vmem:[#allocation29_spill] sm:$0xff] %v3895_v59  ;;  %v3901_v6 = vpop.permute.xlu2 %950  ;;  %v890_v25 = vsel %vm757_vm15, %v886_v12, %v888_v10 }
 0x1c1   : > { %v894_v17 = vadd.f32 %v890_v25, %v808_v0  ;;  %v1246_v0 = vstv %s2814_s28  ;;  %s3115_s28 = smov 16  }
 0x1c2   : > { %v1247_v52 = vmul.f32 %v1246_v0, %v3886_v63 }
 0x1c5   : > { %1232 = vrot.lane.b32.xlu1 %v1226_v48, %s3112_s5  ;;  %1213 = vrot.lane.b32.xlu0 %v1205_v3, %s3111_s27  ;;  %v1227_v48 = vmul.f32 %v1225_v24, %v3907_v56  ;;  %v852_v3 = vadd.f32 %v844_v41, %v3828_v36 }
 0x1c6   : > { %1211 = vrot.lane.b32.xlu2 %v1204_v2, %s3111_s27 }
 0x1c7   : > { %v927_v12 = vpop.permute.xlu1 %926  ;;  %v3915_v10 = vpop.permute.xlu0 %907 }
 0x1c8   : > { %v932_v8 = vsel %vm909_vm3, %v927_v12, %v929_v33  ;;  %v973_v20 = vpop.permute.xlu2 %972 }
 0x1c9   : > { %v3918_v25 = vadd.f32 %v932_v8, %v851_v39  ;;  %v1268_v8 = vstv %s2815_s7  ;;  %s2829_s7 = sld [smem:[#allocation7 + $0x46]] }
 0x1ca   : > { %v1269_v24 = vmul.f32 %v1268_v8, %v3886_v63 }
 0x1cd   : > { %1253 = vrot.lane.b32.xlu1 %v1247_v52, %s3112_s5  ;;  %1236 = vrot.lane.b32.xlu0 %v1228_v44, %s3112_s5  ;;  %v1249_v52 = vmul.f32 %v1246_v0, %v3899_v58  ;;  %v1248_v44 = vmul.f32 %v1246_v0, %v3907_v56  ;;  %v1271_v0 = vmul.f32 %v1268_v8, %v3899_v58 }
 0x1ce   : > { %1234 = vrot.lane.b32.xlu2 %v1227_v48, %s3112_s5  ;;  %v1290_v48 = vstv %s2816_s8  ;;  %s2830_s8 = sld [smem:[#allocation7 + $0x4d]] }
 0x1cf   : > { %v3927_v2 = vpop.permute.xlu1 %948  ;;  %v931_v55 = vpop.permute.xlu0 %930 }
 0x1d0   : > { %5215 = vst [vmem:[#allocation30_spill] sm:$0xff] %v3927_v2  ;;  %v3929_v30 = vpop.permute.xlu2 %993  ;;  %v933_v39 = vsel %vm909_vm3, %v929_v33, %v931_v55 }
 0x1d1   : > { %v3932_v16 = vadd.f32 %v933_v39, %v852_v3  ;;  %v1291_v39 = vmul.f32 %v1290_v48, %v3886_v63 }
 0x1d5   : > { %1275 = vrot.lane.b32.xlu1 %v1269_v24, %s3112_s5  ;;  %1257 = vrot.lane.b32.xlu0 %v1249_v52, %s3112_s5  ;;  %v1270_v24 = vmul.f32 %v1268_v8, %v3907_v56  ;;  %v1293_v8 = vmul.f32 %v1290_v48, %v3899_v58 }
 0x1d6   : > { %1255 = vrot.lane.b32.xlu2 %v1248_v44, %s3112_s5 }
 0x1d7   : > { %v971_v36 = vpop.permute.xlu1 %970  ;;  %v3940_v41 = vpop.permute.xlu0 %952 }
 0x1d8   : > { %v977_v55 = vsel %vm976_vm6, %v971_v36, %v973_v20  ;;  %v1016_v33 = vpop.permute.xlu2 %1015 }
 0x1d9   : > { %v981_v3 = vadd.f32 %v977_v55, %v893_v4  ;;  %v1312_v4 = vstv %s2817_s19  ;;  %s3116_s19 = smov 80  }
 0x1da   : > { %v1313_v18 = vmul.f32 %v1312_v4, %v3886_v63 }
 0x1dd   : > { %1297 = vrot.lane.b32.xlu1 %v1291_v39, %s3112_s5  ;;  %1279 = vrot.lane.b32.xlu0 %v1271_v0, %s3112_s5  ;;  %v1292_v39 = vmul.f32 %v1290_v48, %v3907_v56  ;;  %v937_v0 = vadd.f32 %v927_v12, %v3862_v54  ;;  %v1315_v48 = vmul.f32 %v1312_v4, %v3899_v58 }
 0x1de   : > { %1277 = vrot.lane.b32.xlu2 %v1270_v24, %s3112_s5 }
 0x1df   : > { %v3949_v52 = vpop.permute.xlu1 %991  ;;  %v975_v44 = vpop.permute.xlu0 %974 }
 0x1e0   : > { %5216 = vst [vmem:[#allocation31_spill] sm:$0xff] %v3949_v52  ;;  %v3951_v36 = vpop.permute.xlu2 %1037  ;;  %v978_v2 = vsel %vm976_vm6, %v973_v20, %v975_v44 }
 0x1e1   : > { %5217 = vst [vmem:[#allocation32_spill] sm:$0xff] %v3951_v36  ;;  %v982_v55 = vadd.f32 %v978_v2, %v894_v17  ;;  %v1332_v2 = vstv %s2818_s24  ;;  %s2831_s24 = sld [smem:[#allocation7 + $0x54]] }
 0x1e2   : > { %v1333_v19 = vmul.f32 %v1332_v2, %v3886_v63 }
 0x1e5   : > { %1319 = vrot.lane.b32.xlu1 %v1313_v18, %s3111_s27  ;;  %1301 = vrot.lane.b32.xlu0 %v1293_v8, %s3112_s5  ;;  %v1314_v18 = vmul.f32 %v1312_v4, %v3907_v56  ;;  %v3976_v8 = vsel %vm307_vm9, 0.0, %v3566_v27  ;;  %v1354_v4 = vstv %s2819_s9  ;;  %s2832_s9 = sld [smem:[#allocation7 + $0x5b]] }
 0x1e6   : > { %1299 = vrot.lane.b32.xlu2 %v1292_v39, %s3112_s5  ;;  %s2828_s5 = sld [smem:[#allocation7 + $0x3f]] }
 0x1e7   : > { %v1014_v24 = vpop.permute.xlu1 %1013  ;;  %v3961_v36 = vpop.permute.xlu0 %995 }
 0x1e8   : > { %v1019_v20 = vsel %vm976_vm6, %v1014_v24, %v1016_v33  ;;  %v1060_v17 = vpop.permute.xlu2 %1059  ;;  %v1355_v24 = vmul.f32 %v1354_v4, %v3976_v8 }
 0x1e9   : > { %v1024_v44 = vadd.f32 %v1019_v20, %v937_v0  ;;  %v1335_v0 = vmul.f32 %v1332_v2, %v3899_v58  ;;  %v1334_v20 = vmul.f32 %v1332_v2, %v3907_v56  ;;  %v3999_v56 = vsel %vm307_vm9, %v3566_v27, %v3568_v28 }
 0x1ed   : > { %1339 = vrot.lane.b32.xlu1 %v1333_v19, %s3111_s27  ;;  %1323 = vrot.lane.b32.xlu0 %v1315_v48, %s3111_s27 }
 0x1ee   : > { %1321 = vrot.lane.b32.xlu2 %v1314_v18, %s3111_s27 }
 0x1ef   : > { %v3970_v54 = vpop.permute.xlu1 %1035  ;;  %v3972_v12 = vpop.permute.xlu0 %1017 }
 0x1f0   : > { %5218 = vst [vmem:[#allocation33_spill] sm:$0xff] %v3970_v54  ;;  %v3978_v39 = vpop.permute.xlu2 %1080  ;;  %v1020_v63 = vsel %vm976_vm6, %v1016_v33, %v3972_v12 }
 0x1f1   : > { %v1025_v19 = vadd.f32 %v1020_v63, %v3918_v25  ;;  %v3993_v25 = vsel %vm307_vm9, %v3568_v28, 0.0  ;;  %v1377_v63 = vstv %s2820_s10  ;;  %v1399_v28 = vstv %s2821_s12  ;;  %s2833_s10 = sld [smem:[#allocation7 + $0x32]]  ;;  %s3117_s12 = smov 127  }
 0x1f5   : > { %1343 = vrot.lane.b32.xlu0 %v1335_v0, %s3111_s27  ;;  %1361 = vrot.lane.b32.xlu1 %v1355_v24, %s3113_s11  ;;  %v1357_v0 = vmul.f32 %v1354_v4, %v3993_v25  ;;  %v1378_v24 = vmul.f32 %v1377_v63, %v3976_v8 }
 0x1f6   : > { %1341 = vrot.lane.b32.xlu2 %v1334_v20, %s3111_s27  ;;  %v1356_v20 = vmul.f32 %v1354_v4, %v3999_v56  ;;  %v1400_v4 = vmul.f32 %v1399_v28, %v3976_v8  ;;  %s2827_s27 = sld [smem:[#allocation7 + $0x38]] }
 0x1f7   : > { %v1058_v48 = vpop.permute.xlu1 %1057  ;;  %v3989_v33 = vpop.permute.xlu0 %1039 }
 0x1f8   : > { %5219 = vst [vmem:[#allocation34_spill] sm:$0xff] %v3989_v33  ;;  %v1064_v58 = vsel %vm1063_vm8, %v1058_v48, %v1060_v17  ;;  %v1103_v18 = vpop.permute.xlu2 %1102 }
 0x1f9   : > { %v1068_v2 = vadd.f32 %v1064_v58, %v981_v3  ;;  %v1380_v58 = vmul.f32 %v1377_v63, %v3993_v25 }
 0x1fd   : > { %1365 = vrot.lane.b32.xlu0 %v1357_v0, %s3113_s11  ;;  %1384 = vrot.lane.b32.xlu1 %v1378_v24, %s3113_s11  ;;  %v1379_v0 = vmul.f32 %v1377_v63, %v3999_v56 }
 0x1fe   : > { %1363 = vrot.lane.b32.xlu2 %v1356_v20, %s3113_s11 }
 0x1ff   : > { %v4007_v48 = vpop.permute.xlu1 %1078  ;;  %v1062_v54 = vpop.permute.xlu0 %1061 }
 0x200   : > { %5220 = vst [vmem:[#allocation35_spill] sm:$0xff] %v4007_v48  ;;  %v4009_v33 = vpop.permute.xlu2 %1124  ;;  %v1065_v27 = vsel %vm1063_vm8, %v1060_v17, %v1062_v54 }
 0x201   : > { %5221 = vst [vmem:[#allocation36_spill] sm:$0xff] %v4009_v33  ;;  %v1069_v3 = vadd.f32 %v1065_v27, %v982_v55  ;;  %v1420_v55 = vstv %s2822_s13  ;;  %v1402_v33 = vmul.f32 %v1399_v28, %v3993_v25  ;;  %s2835_s13 = sld [smem:[#allocation7 + $0x40]] }
 0x202   : > { %v1421_v63 = vmul.f32 %v1420_v55, %v3976_v8 }
 0x205   : > { %1388 = vrot.lane.b32.xlu0 %v1380_v58, %s3113_s11  ;;  %1406 = vrot.lane.b32.xlu1 %v1400_v4, %s3114_s18  ;;  %v1401_v58 = vmul.f32 %v1399_v28, %v3999_v56  ;;  %v1423_v28 = vmul.f32 %v1420_v55, %v3993_v25 }
 0x206   : > { %1386 = vrot.lane.b32.xlu2 %v1379_v0, %s3113_s11 }
 0x207   : > { %v1101_v24 = vpop.permute.xlu1 %1100  ;;  %v4018_v20 = vpop.permute.xlu0 %1082 }
 0x208   : > { %v1106_v17 = vsel %vm1063_vm8, %v1101_v24, %v1103_v18  ;;  %v1147_v54 = vpop.permute.xlu2 %1146 }
 0x209   : > { %v1111_v27 = vadd.f32 %v1106_v17, %v1024_v44  ;;  %v1442_v17 = vstv %s2823_s21  ;;  %s2837_s21 = sld [smem:[#allocation7 + $0x4e]] }
 0x20a   : > { %v1445_v7 = vmul.f32 %v1442_v17, %v3993_v25 }
 0x20d   : > { %1410 = vrot.lane.b32.xlu0 %v1402_v33, %s3114_s18  ;;  %1427 = vrot.lane.b32.xlu1 %v1421_v63, %s3114_s18  ;;  %v1443_v33 = vmul.f32 %v1442_v17, %v3976_v8  ;;  %v1422_v63 = vmul.f32 %v1420_v55, %v3999_v56 }
 0x20e   : > { %1408 = vrot.lane.b32.xlu2 %v1401_v58, %s3114_s18 }
 0x20f   : > { %v4027_v4 = vpop.permute.xlu1 %1122  ;;  %v4029_v0 = vpop.permute.xlu0 %1104 }
 0x210   : > { %5222 = vst [vmem:[#allocation37_spill] sm:$0xff] %v4027_v4  ;;  %v4031_v24 = vpop.permute.xlu2 %1167  ;;  %v1107_v44 = vsel %vm1063_vm8, %v1103_v18, %v4029_v0 }
 0x211   : > { %v1112_v21 = vadd.f32 %v1107_v44, %v1025_v19  ;;  %v1464_v19 = vstv %s2824_s22  ;;  %s2838_s22 = sld [smem:[#allocation7 + $0x55]] }
 0x212   : > { %v1465_v55 = vmul.f32 %v1464_v19, %v3976_v8 }
 0x215   : > { %1431 = vrot.lane.b32.xlu0 %v1423_v28, %s3114_s18  ;;  %1449 = vrot.lane.b32.xlu1 %v1443_v33, %s3114_s18  ;;  %v1444_v28 = vmul.f32 %v1442_v17, %v3999_v56 }
 0x216   : > { %1429 = vrot.lane.b32.xlu2 %v1422_v63, %s3114_s18 }
 0x217   : > { %v1145_v58 = vpop.permute.xlu1 %1144  ;;  %v4041_v4 = vpop.permute.xlu0 %1126 }
 0x218   : > { %5223 = vst [vmem:[#allocation38_spill] sm:$0xff] %v4041_v4  ;;  %v1151_v18 = vsel %vm1150_vm2, %v1145_v58, %v1147_v54  ;;  %v1190_v47 = vpop.permute.xlu2 %1189 }
 0x219   : > { %v1155_v44 = vadd.f32 %v1151_v18, %v1068_v2  ;;  %v1486_v2 = vstv %s2825_s23  ;;  %s3118_s23 = smov 63  }
 0x21a   : > { %v1487_v17 = vmul.f32 %v1486_v2, %v3976_v8 }
 0x21d   : > { %1453 = vrot.lane.b32.xlu0 %v1445_v7, %s3114_s18  ;;  %1471 = vrot.lane.b32.xlu1 %v1465_v55, %s3114_s18  ;;  %v1467_v7 = vmul.f32 %v1464_v19, %v3993_v25  ;;  %v1466_v55 = vmul.f32 %v1464_v19, %v3999_v56 }
 0x21e   : > { %1451 = vrot.lane.b32.xlu2 %v1444_v28, %s3114_s18 }
 0x21f   : > { %v4050_v33 = vpop.permute.xlu1 %1165  ;;  %v1149_v63 = vpop.permute.xlu0 %1148 }
 0x220   : > { %5224 = vst [vmem:[#allocation39_spill] sm:$0xff] %v4050_v33  ;;  %v4052_v58 = vpop.permute.xlu2 %1211  ;;  %v1152_v4 = vsel %vm1150_vm2, %v1147_v54, %v1149_v63  ;;  %v4067_v54 = vsel %vm307_vm9, 0.0, %v3547_v15 }
 0x221   : > { %5225 = vst [vmem:[#allocation40_spill] sm:$0xff] %v4052_v58  ;;  %v1156_v18 = vadd.f32 %v1152_v4, %v1069_v3  ;;  %v1506_v4 = vstv %s4055_s26  ;;  %s2839_s26 = sld [smem:[#allocation7 + $0x5c]] }
 0x222   : > { %v1507_v19 = vmul.f32 %v1506_v4, %v4067_v54 }
 0x225   : > { %1493 = vrot.lane.b32.xlu1 %v1487_v17, %s3113_s11  ;;  %1475 = vrot.lane.b32.xlu0 %v1467_v7, %s3114_s18  ;;  %v1489_v17 = vmul.f32 %v1486_v2, %v3993_v25  ;;  %v1488_v7 = vmul.f32 %v1486_v2, %v3999_v56  ;;  %v1524_v56 = vstv %s2827_s27  ;;  %s2840_s27 = sld [smem:[#allocation7 + $0x33]] }
 0x226   : > { %1473 = vrot.lane.b32.xlu2 %v1466_v55, %s3114_s18  ;;  %s2836_s18 = sld [smem:[#allocation7 + $0x47]] }
 0x227   : > { %v1188_v28 = vpop.permute.xlu1 %1187  ;;  %v4063_v58 = vpop.permute.xlu0 %1169 }
 0x228   : > { %v1193_v3 = vsel %vm1150_vm2, %v1188_v28, %v1190_v47  ;;  %v1235_v8 = vpop.permute.xlu2 %1234 }
 0x229   : > { %v1198_v63 = vadd.f32 %v1193_v3, %v1111_v27  ;;  %v4084_v27 = vsel %vm307_vm9, %v3547_v15, %v3579_v34 }
 0x22d   : > { %1511 = vrot.lane.b32.xlu1 %v1507_v19, %s3115_s28  ;;  %1497 = vrot.lane.b32.xlu0 %v1489_v17, %s3113_s11  ;;  %v1526_v19 = vmul.f32 %v1524_v56, %v4084_v27  ;;  %v1525_v17 = vmul.f32 %v1524_v56, %v4067_v54 }
 0x22e   : > { %1495 = vrot.lane.b32.xlu2 %v1488_v7, %s3113_s11  ;;  %v1508_v7 = vmul.f32 %v1506_v4, %v4084_v27  ;;  %s2834_s11 = sld [smem:[#allocation7 + $0x39]] }
 0x22f   : > { %v4077_v55 = vpop.permute.xlu1 %1209  ;;  %v4079_v28 = vpop.permute.xlu0 %1191 }
 0x230   : > { %5226 = vst [vmem:[#allocation41_spill] sm:$0xff] %v4077_v55  ;;  %v4086_v3 = vpop.permute.xlu2 %1255  ;;  %v1194_v25 = vsel %vm1150_vm2, %v1190_v47, %v4079_v28 }
 0x231   : > { %v1199_v2 = vadd.f32 %v1194_v25, %v1112_v21  ;;  %v1546_v21 = vstv %s2828_s5  ;;  %v4101_v25 = vsel %vm307_vm9, %v3579_v34, 0.0  ;;  %s2780_s5 = sld [smem:[#allocation7 + $0x15]] }
 0x232   : > { %v1527_v42 = vmul.f32 %v1524_v56, %v4101_v25 }
 0x235   : > { %1533 = vrot.lane.b32.xlu1 %v1526_v19, %s3115_s28  ;;  %1531 = vrot.lane.b32.xlu0 %v1525_v17, %s3115_s28  ;;  %v1548_v19 = vmul.f32 %v1546_v21, %v4084_v27  ;;  %v1547_v17 = vmul.f32 %v1546_v21, %v4067_v54 }
 0x236   : > { %1513 = vrot.lane.b32.xlu2 %v1508_v7, %s3115_s28 }
 0x237   : > { %v1233_v15 = vpop.permute.xlu1 %1232  ;;  %v4096_v55 = vpop.permute.xlu0 %1213 }
 0x238   : > { %5227 = vst [vmem:[#allocation42_spill] sm:$0xff] %v4096_v55  ;;  %v1239_v47 = vsel %vm1238_vm13, %v1233_v15, %v1235_v8  ;;  %v1278_v33 = vpop.permute.xlu2 %1277 }
 0x239   : > { %v1243_v4 = vadd.f32 %v1239_v47, %v1155_v44  ;;  %v1568_v44 = vstv %s2829_s7  ;;  %s3119_s7 = smov 46  }
 0x23a   : > { %v1570_v48 = vmul.f32 %v1568_v44, %v4084_v27  ;;  %v1569_v56 = vmul.f32 %v1568_v44, %v4067_v54 }
 0x23d   : > { %1555 = vrot.lane.b32.xlu1 %v1548_v19, %s3115_s28  ;;  %1553 = vrot.lane.b32.xlu0 %v1547_v17, %s3115_s28  ;;  %v1549_v19 = vmul.f32 %v1546_v21, %v4101_v25 }
 0x23e   : > { %1535 = vrot.lane.b32.xlu2 %v1527_v42, %s3115_s28 }
 0x23f   : > { %v4109_v7 = vpop.permute.xlu1 %1253  ;;  %v1237_v15 = vpop.permute.xlu0 %1236 }
 0x240   : > { %5228 = vst [vmem:[#allocation43_spill] sm:$0xff] %v4109_v7  ;;  %v4111_v55 = vpop.permute.xlu2 %1299  ;;  %v1240_v34 = vsel %vm1238_vm13, %v1235_v8, %v1237_v15  ;;  %v1589_v15 = vstv %s2830_s8  ;;  %s2842_s8 = sld [smem:[#allocation7 + $0x41]] }
 0x241   : > { %5229 = vst [vmem:[#allocation44_spill] sm:$0xff] %v4111_v55  ;;  %v4114_v47 = vadd.f32 %v1240_v34, %v1156_v18  ;;  %v1591_v55 = vmul.f32 %v1589_v15, %v4084_v27  ;;  %v1590_v21 = vmul.f32 %v1589_v15, %v4067_v54 }
 0x245   : > { %1577 = vrot.lane.b32.xlu1 %v1570_v48, %s3116_s19  ;;  %1575 = vrot.lane.b32.xlu0 %v1569_v56, %s3116_s19  ;;  %v1571_v48 = vmul.f32 %v1568_v44, %v4101_v25 }
 0x246   : > { %1557 = vrot.lane.b32.xlu2 %v1549_v19, %s3115_s28  ;;  %s2841_s28 = sld [smem:[#allocation7 + $0x3a]] }
 0x247   : > { %v1276_v42 = vpop.permute.xlu1 %1275  ;;  %v4122_v17 = vpop.permute.xlu0 %1257 }
 0x248   : > { %v1281_v8 = vsel %vm1238_vm13, %v1276_v42, %v1278_v33  ;;  %v1322_v18 = vpop.permute.xlu2 %1321 }
 0x249   : > { %v4125_v34 = vadd.f32 %v1281_v8, %v1198_v63  ;;  %v1611_v8 = vstv %s2831_s24  ;;  %s4357_s24 = sld [smem:[#allocation7 + $0x48]] }
 0x24a   : > { %v1613_v44 = vmul.f32 %v1611_v8, %v4084_v27 }
 0x24d   : > { %1598 = vrot.lane.b32.xlu1 %v1591_v55, %s3116_s19  ;;  %1596 = vrot.lane.b32.xlu0 %v1590_v21, %s3116_s19  ;;  %v1612_v55 = vmul.f32 %v1611_v8, %v4067_v54  ;;  %v1592_v21 = vmul.f32 %v1589_v15, %v4101_v25  ;;  %v824_v15 = vsel %vm802_vm1, %v3825_v53, %v3859_v40 }
 0x24e   : > { %1579 = vrot.lane.b32.xlu2 %v1571_v48, %s3116_s19 }
 0x24f   : > { %v4133_v56 = vpop.permute.xlu1 %1297  ;;  %v4135_v19 = vpop.permute.xlu0 %1279 }
 0x250   : > { %5230 = vst [vmem:[#allocation45_spill] sm:$0xff] %v4133_v56  ;;  %v4137_v42 = vpop.permute.xlu2 %1341  ;;  %v1282_v63 = vsel %vm1238_vm13, %v1278_v33, %v4135_v19 }
 0x251   : > { %5231 = vst [vmem:[#allocation46_spill] sm:$0xff] %v4137_v42  ;;  %v1287_v7 = vadd.f32 %v1282_v63, %v1199_v2  ;;  %v1633_v2 = vstv %s2832_s9  ;;  %s2844_s9 = sld [smem:[#allocation7 + $0x4f]] }
 0x255   : > { %1620 = vrot.lane.b32.xlu1 %v1613_v44, %s3116_s19  ;;  %1618 = vrot.lane.b32.xlu0 %v1612_v55, %s3116_s19  ;;  %v1635_v44 = vmul.f32 %v1633_v2, %v4084_v27  ;;  %v1634_v55 = vmul.f32 %v1633_v2, %v4067_v54  ;;  %v4173_v54 = vsel %vm307_vm9, %v3581_v35, %v3559_v23 }
 0x256   : > { %1600 = vrot.lane.b32.xlu2 %v1592_v21, %s3116_s19  ;;  %v910_v21 = vsel %vm909_vm3, %v3895_v59, %v3872_v1 }
 0x257   : > { %v1320_v48 = vpop.permute.xlu1 %1319  ;;  %v4147_v56 = vpop.permute.xlu0 %1301 }
 0x258   : > { %5232 = vst [vmem:[#allocation47_spill] sm:$0xff] %v4147_v56  ;;  %v1325_v33 = vsel %vm1215_vm5, %v1320_v48, %v1322_v18  ;;  %v4150_v62 = vpop.permute.xlu2 %1363  ;;  %v1614_v48 = vmul.f32 %v1611_v8, %v4101_v25  ;;  %v829_v56 = vadd.f32 %v824_v15, %v3811_v11  ;;  %v4179_v11 = vsel %vm307_vm9, 0.0, %v3581_v35 }
 0x259   : > { %v4152_v63 = vadd.f32 %v1325_v33, %v1243_v4  ;;  %v998_v4 = vsel %vm976_vm6, %v3929_v30, %v3961_v36  ;;  %v1085_v15 = vsel %vm1063_vm8, %v3978_v39, %v4018_v20 }
 0x25a   : > { %v916_v27 = vadd.f32 %v910_v21, %v829_v56  ;;  %v1172_v21 = vsel %vm1150_vm2, %v4031_v24, %v4063_v58 }
 0x25c   : > { %v1003_v59 = vadd.f32 %v998_v4, %v916_v27 }
 0x25d   : > { %1642 = vrot.lane.b32.xlu1 %v1635_v44, %s3116_s19  ;;  %1640 = vrot.lane.b32.xlu0 %v1634_v55, %s3116_s19 }
 0x25e   : > { %1622 = vrot.lane.b32.xlu2 %v1614_v48, %s3116_s19  ;;  %v1655_v48 = vstv %s2833_s10  ;;  %v1090_v35 = vadd.f32 %v1085_v15, %v1003_v59  ;;  %s4444_s10 = sld [smem:[#allocation7 + $0x56]] }
 0x25f   : > { %v4175_v33 = vpop.permute.xlu1 %1339  ;;  %v1324_v8 = vpop.permute.xlu0 %1323  ;;  %v1656_v52 = vmul.f32 %v1655_v48, %v4179_v11 }
 0x260   : > { %5233 = vst [vmem:[#allocation48_spill] sm:$0xff] %v4175_v33  ;;  %v4184_v44 = vpop.permute.xlu2 %1386  ;;  %v1326_v55 = vsel %vm1215_vm5, %v1322_v18, %v1324_v8  ;;  %v1657_v33 = vmul.f32 %v1655_v48, %v4173_v54  ;;  %v1636_v18 = vmul.f32 %v1633_v2, %v4101_v25  ;;  %v1177_v8 = vadd.f32 %v1172_v21, %v1090_v35 }
 0x261   : > { %5234 = vst [vmem:[#allocation49_spill] sm:$0xff] %v4184_v44  ;;  %v4188_v56 = vadd.f32 %v1326_v55, %v4114_v47  ;;  %v1260_v44 = vsel %vm1238_vm13, %v4086_v3, %v4122_v17  ;;  %v1676_v2 = vstv %s2834_s11  ;;  %s2846_s11 = sld [smem:[#allocation7 + $0x5d]] }
 0x262   : > { %v1265_v59 = vadd.f32 %v1260_v44, %v1177_v8  ;;  %v1678_v35 = vmul.f32 %v1676_v2, %v4173_v54 }
 0x265   : > { %1664 = vrot.lane.b32.xlu1 %v1657_v33, %s3117_s12  ;;  %1662 = vrot.lane.b32.xlu0 %v1656_v52, %s3117_s12  ;;  %v4211_v52 = vsel %vm307_vm9, %v3559_v23, 0.0  ;;  %v1026_v33 = vadd.f32 %v3972_v12, %v3932_v16 }
 0x266   : > { %1644 = vrot.lane.b32.xlu2 %v1636_v18, %s3116_s19  ;;  %v1677_v18 = vmul.f32 %v1676_v2, %v4179_v11  ;;  %v1658_v8 = vmul.f32 %v1655_v48, %v4211_v52  ;;  %s3120_s19 = smov 110  }
 0x267   : > { %v1362_v47 = vpop.permute.xlu1 %1361  ;;  %v4202_v4 = vpop.permute.xlu0 %1343  ;;  %v1113_v21 = vadd.f32 %v4029_v0, %v1026_v33 }
 0x268   : > { %v1368_v27 = vsel %vm1367_vm11, %v1362_v47, %v4150_v62  ;;  %v1409_v15 = vpop.permute.xlu2 %1408  ;;  %v1346_v25 = vsel %vm1215_vm5, %v4137_v42, %v4202_v4 }
 0x269   : > { %v4215_v44 = vadd.f32 %v1368_v27, %v1287_v7  ;;  %v4217_v55 = vadd.f32 %v1346_v25, %v1265_v59  ;;  %v1200_v42 = vadd.f32 %v4079_v28, %v1113_v21  ;;  %v1698_v59 = vstv %s2835_s13  ;;  %s2848_s13 = sld [smem:[#allocation7 + $0x3b]] }
 0x26a   : > { %v1700_v28 = vmul.f32 %v1698_v59, %v4173_v54  ;;  %v1699_v27 = vmul.f32 %v1698_v59, %v4179_v11  ;;  %v1679_v25 = vmul.f32 %v1676_v2, %v4211_v52  ;;  %v1720_v21 = vstv %s2836_s18  ;;  %s3121_s18 = smov 29  }
 0x26b   : > { %v1288_v23 = vadd.f32 %v4135_v19, %v1200_v42  ;;  %v1721_v2 = vmul.f32 %v1720_v21, %v4179_v11 }
 0x26d   : > { %1685 = vrot.lane.b32.xlu1 %v1678_v35, %s3117_s12  ;;  %1683 = vrot.lane.b32.xlu0 %v1677_v18, %s3117_s12  ;;  %v1722_v18 = vmul.f32 %v1720_v21, %v4173_v54 }
 0x26e   : > { %1666 = vrot.lane.b32.xlu2 %v1658_v8, %s3117_s12  ;;  %v1701_v8 = vmul.f32 %v1698_v59, %v4211_v52 }
 0x26f   : > { %v4228_v16 = vpop.permute.xlu1 %1384  ;;  %v1366_v12 = vpop.permute.xlu0 %1365 }
 0x270   : > { %5235 = vst [vmem:[#allocation50_spill] sm:$0xff] %v4228_v16  ;;  %v4230_v0 = vpop.permute.xlu2 %1429  ;;  %v1369_v7 = vsel %vm1367_vm11, %v4150_v62, %v1366_v12 }
 0x271   : > { %v4234_v48 = vadd.f32 %v1369_v7, %v1288_v23 }
 0x275   : > { %1707 = vrot.lane.b32.xlu1 %v1700_v28, %s3117_s12  ;;  %1705 = vrot.lane.b32.xlu0 %v1699_v27, %s3117_s12 }
 0x276   : > { %1687 = vrot.lane.b32.xlu2 %v1679_v25, %s3117_s12 }
 0x277   : > { %v1407_v19 = vpop.permute.xlu1 %1406  ;;  %v4242_v42 = vpop.permute.xlu0 %1388 }
 0x278   : > { %v1413_v62 = vsel %vm1412_vm7, %v1407_v19, %v1409_v15  ;;  %v1452_v33 = vpop.permute.xlu2 %1451  ;;  %v1723_v19 = vmul.f32 %v1720_v21, %v4211_v52 }
 0x279   : > { %v1417_v35 = vadd.f32 %v1413_v62, %v4152_v63  ;;  %v1742_v63 = vstv %s2837_s21  ;;  %s2849_s21 = sld [smem:[#allocation7 + $0x42]] }
 0x27a   : > { %v1744_v59 = vmul.f32 %v1742_v63, %v4173_v54  ;;  %v1743_v25 = vmul.f32 %v1742_v63, %v4179_v11 }
 0x27d   : > { %1729 = vrot.lane.b32.xlu1 %v1722_v18, %s3117_s12  ;;  %1727 = vrot.lane.b32.xlu0 %v1721_v2, %s3117_s12 }
 0x27e   : > { %1709 = vrot.lane.b32.xlu2 %v1701_v8, %s3117_s12  ;;  %v1763_v8 = vstv %s2838_s22  ;;  %s2850_s22 = sld [smem:[#allocation7 + $0x49]] }
 0x27f   : > { %v4252_v23 = vpop.permute.xlu1 %1427  ;;  %v1411_v12 = vpop.permute.xlu0 %1410  ;;  %v1765_v21 = vmul.f32 %v1763_v8, %v4173_v54 }
 0x280   : > { %v4254_v7 = vpop.permute.xlu2 %1473  ;;  %v1414_v28 = vsel %vm1412_vm7, %v1409_v15, %v1411_v12  ;;  %v1373_v15 = vadd.f32 %v1362_v47, %v4125_v34 }
 0x281   : > { %5236 = vst [vmem:[#allocation51_spill] sm:$0xff] %v4254_v7  ;;  %v4258_v27 = vadd.f32 %v1414_v28, %v4188_v56  ;;  %v1764_v28 = vmul.f32 %v1763_v8, %v4179_v11 }
 0x285   : > { %1751 = vrot.lane.b32.xlu1 %v1744_v59, %s3118_s23  ;;  %1749 = vrot.lane.b32.xlu0 %v1743_v25, %s3118_s23  ;;  %v1745_v59 = vmul.f32 %v1742_v63, %v4211_v52 }
 0x286   : > { %1731 = vrot.lane.b32.xlu2 %v1723_v19, %s3117_s12  ;;  %s2847_s12 = sld [smem:[#allocation7 + $0x34]] }
 0x287   : > { %v1450_v62 = vpop.permute.xlu1 %1449  ;;  %v4267_v18 = vpop.permute.xlu0 %1431 }
 0x288   : > { %v1455_v56 = vsel %vm1412_vm7, %v1450_v62, %v1452_v33  ;;  %v1496_v2 = vpop.permute.xlu2 %1495 }
 0x289   : > { %v4270_v12 = vadd.f32 %v1455_v56, %v1373_v15  ;;  %v1785_v15 = vstv %s2839_s26  ;;  %s2851_s26 = sld [smem:[#allocation7 + $0x50]] }
 0x28a   : > { %v1787_v63 = vmul.f32 %v1785_v15, %v4173_v54  ;;  %v1786_v56 = vmul.f32 %v1785_v15, %v4179_v11  ;;  %v4303_v54 = vsel %vm307_vm9, %v3604_v49, %v3606_v50  ;;  %v1788_v16 = vmul.f32 %v1785_v15, %v4211_v52 }
 0x28d   : > { %1772 = vrot.lane.b32.xlu1 %v1765_v21, %s3118_s23  ;;  %1770 = vrot.lane.b32.xlu0 %v1764_v28, %s3118_s23  ;;  %v1766_v21 = vmul.f32 %v1763_v8, %v4211_v52 }
 0x28e   : > { %1753 = vrot.lane.b32.xlu2 %v1745_v59, %s3118_s23 }
 0x28f   : > { %v4278_v34 = vpop.permute.xlu1 %1471  ;;  %v1454_v47 = vpop.permute.xlu0 %1453 }
 0x290   : > { %5237 = vst [vmem:[#allocation52_spill] sm:$0xff] %v4278_v34  ;;  %v4280_v25 = vpop.permute.xlu2 %1513  ;;  %v1456_v19 = vsel %vm1412_vm7, %v1452_v33, %v1454_v47  ;;  %v506_v33 = vmul.f32 %v3778_v46, %v3488_v43 }
 0x291   : > { %v4284_v62 = vadd.f32 %v1456_v19, %v4215_v44  ;;  %v4298_v44 = vsel %vm307_vm9, 0.0, %v3604_v49  ;;  %v1807_v19 = vstv %s2840_s27  ;;  %s2852_s27 = sld [smem:[#allocation7 + $0x57]] }
 0x292   : > { %v1809_v34 = vmul.f32 %v1807_v19, %v4303_v54  ;;  %v1808_v7 = vmul.f32 %v1807_v19, %v4298_v44 }
 0x295   : > { %1794 = vrot.lane.b32.xlu1 %v1787_v63, %s3118_s23  ;;  %1792 = vrot.lane.b32.xlu0 %v1786_v56, %s3118_s23  ;;  %v568_v63 = vadd.f32 %v3673_v57, %v506_v33  ;;  %v911_v57 = vsel %vm909_vm3, %v3872_v1, %v3915_v10  ;;  %v1830_v33 = vstv %s2841_s28  ;;  %s2853_s28 = sld [smem:[#allocation7 + $0x5e]] }
 0x296   : > { %1774 = vrot.lane.b32.xlu2 %v1766_v21, %s3118_s23 }
 0x297   : > { %v1494_v28 = vpop.permute.xlu1 %1493  ;;  %v4294_v59 = vpop.permute.xlu0 %1475  ;;  %v656_v21 = vadd.f32 %v3731_v9, %v568_v63 }
 0x298   : > { %v1499_v11 = vsel %vm1367_vm11, %v1494_v28, %v1496_v2  ;;  %v1536_v8 = vpop.permute.xlu2 %1535  ;;  %v561_v28 = vsel %vm540_vm10, %v3657_v31, %v3638_v5  ;;  %v649_v5 = vsel %vm628_vm12, %v3720_v51, %v3696_v13  ;;  %v1851_v31 = vstv %s2842_s8  ;;  %s3123_s8 = smov 12  }
 0x299   : > { %v4307_v56 = vadd.f32 %v1499_v11, %v1417_v35  ;;  %v742_v49 = vadd.f32 %v3794_v45, %v656_v21  ;;  %v519_v11 = vstv %s2780_s5  ;;  %vm1668_vm10 = vcmask 1039360   ;;  %s2854_s5 = sld [smem:[#allocation7 + $0x35]] }
 0x29a   : > { %v522_v63 = vmul.f32 %v519_v11, %v3488_v43  ;;  %v735_v43 = vsel %vm605_vm14, %v3767_v22, %v3746_v32  ;;  %v823_v32 = vsel %vm802_vm1, %v3846_v60, %v3825_v53  ;;  %v1853_v22 = vmul.f32 %v1851_v31, %v4303_v54  ;;  %v5238_v60 = vld [vmem:[#allocation31_spill] sm:$0xff] }
 0x29b   : > { %v830_v9 = vadd.f32 %v3859_v40, %v742_v49  ;;  %v1832_v40 = vmul.f32 %v1830_v33, %v4303_v54  ;;  %v955_v53 = vsel %vm909_vm3, %v3901_v6, %v3940_v41  ;;  %v5241_v41 = vld [vmem:[#allocation35_spill] sm:$0xff] }
 0x29d   : > { %1816 = vrot.lane.b32.xlu1 %v1809_v34, %s3119_s7  ;;  %1814 = vrot.lane.b32.xlu0 %v1808_v7, %s3119_s7  ;;  %v4328_v7 = vsel %vm307_vm9, %v3606_v50, 0.0  ;;  %v917_v34 = vadd.f32 %v911_v57, %v830_v9  ;;  %v504_v50 = vmul.f32 %v3778_v46, %v3480_v38 }
 0x29e   : > { %1796 = vrot.lane.b32.xlu2 %v1788_v16, %s3118_s23  ;;  %v1831_v16 = vmul.f32 %v1830_v33, %v4298_v44  ;;  %s3122_s23 = smov 93  }
 0x29f   : > { %v4321_v35 = vpop.permute.xlu1 %1511  ;;  %v1498_v52 = vpop.permute.xlu0 %1497  ;;  %v1004_v10 = vadd.f32 %v3961_v36, %v917_v34  ;;  %v566_v46 = vadd.f32 %v561_v28, %v504_v50  ;;  %v1833_v34 = vmul.f32 %v1830_v33, %v4328_v7  ;;  %v5240_v28 = vld [vmem:[#allocation29_spill] sm:$0xff] }
 0x2a0   : > { %v4323_v15 = vpop.permute.xlu2 %1557  ;;  %v1500_v45 = vsel %vm1367_vm11, %v1496_v2, %v1498_v52  ;;  %v1810_v2 = vmul.f32 %v1807_v19, %v4328_v7  ;;  %v781_v52 = vsel %vm757_vm15, %v3773_v26, %v3836_v14 }
 0x2a1   : > { %v4331_v1 = vadd.f32 %v1500_v45, %v4258_v27  ;;  %v607_v27 = vsel %vm605_vm14, %v3660_v37, %v3711_v29  ;;  %v1091_v36 = vadd.f32 %v4018_v20, %v1004_v10  ;;  %v1462_v29 = vadd.f32 %v1454_v47, %v4234_v48 }
 0x2a2   : > { %v613_v49 = vadd.f32 %v607_v27, %v522_v63  ;;  %v654_v57 = vadd.f32 %v649_v5, %v566_v46  ;;  %v1873_v63 = vstv %s4357_s24  ;;  %v520_v5 = vmul.f32 %v519_v11, %v3480_v38  ;;  %s2857_s24 = sld [smem:[#allocation7 + $0x4a]] }
 0x2a3   : > { %v1178_v19 = vadd.f32 %v4063_v58, %v1091_v36  ;;  %v1084_v46 = vsel %vm1063_vm8, %v5241_v41, %v3978_v39  ;;  %v1874_v38 = vmul.f32 %v1873_v63, %v4298_v44  ;;  %v5244_v39 = vld [vmem:[#allocation22_spill] sm:$0xff] }
 0x2a4   : > { %v740_v45 = vadd.f32 %v735_v43, %v654_v57  ;;  %v1875_v57 = vmul.f32 %v1873_v63, %v4303_v54  ;;  %v5253_v41 = vld [vmem:[#allocation26_spill] sm:$0xff] }
 0x2a5   : > { %1839 = vrot.lane.b32.xlu1 %v1832_v40, %s3120_s19  ;;  %1837 = vrot.lane.b32.xlu0 %v1831_v16, %s3120_s19  ;;  %v1266_v48 = vadd.f32 %v4122_v17, %v1178_v19  ;;  %v5239_v16 = vld [vmem:[#allocation28_spill] sm:$0xff]  ;;  %v5242_v19 = vld [vmem:[#allocation13_spill] sm:$0xff] }
 0x2a6   : > { %1818 = vrot.lane.b32.xlu2 %v1810_v2, %s3119_s7  ;;  %v828_v40 = vadd.f32 %v823_v32, %v740_v45  ;;  %v5246_v32 = vld [vmem:[#allocation24_spill] sm:$0xff] }
 0x2a7   : > { %v1534_v20 = vpop.permute.xlu1 %1533  ;;  %v4355_v21 = vpop.permute.xlu0 %1531  ;;  %v1352_v17 = vadd.f32 %v4202_v4, %v1266_v48  ;;  %v997_v4 = vsel %vm976_vm6, %v5238_v60, %v3929_v30  ;;  %v4417_v48 = vstv %s2844_s9  ;;  %s2858_s9 = sld [smem:[#allocation7 + $0x51]] }
 0x2a8   : > { %v1538_v13 = vsel %vm1515_vm0, %v1534_v20, %v1536_v8  ;;  %v4363_v51 = vpop.permute.xlu2 %1579  ;;  %v1537_v58 = vsel %vm1515_vm0, %v4355_v21, %v1534_v20  ;;  %v700_v8 = vadd.f32 %v3756_v61, %v613_v49  ;;  %v915_v2 = vadd.f32 %v5240_v28, %v828_v40  ;;  %v5250_v40 = vld [vmem:[#allocation43_spill] sm:$0xff] }
 0x2a9   : > { %v4369_v47 = vadd.f32 %v1537_v58, %v4284_v62  ;;  %v4371_v9 = vadd.f32 %v1538_v13, %v1462_v29  ;;  %v1852_v62 = vmul.f32 %v1851_v31, %v4298_v44  ;;  %v1440_v14 = vadd.f32 %v4267_v18, %v1352_v17  ;;  %v5243_v13 = vld [vmem:[#allocation39_spill] sm:$0xff] }
 0x2aa   : > { %v787_v10 = vadd.f32 %v781_v52, %v700_v8  ;;  %v521_v29 = vmul.f32 %v519_v11, %v5242_v19  ;;  %v1002_v49 = vadd.f32 %v997_v4, %v915_v2  ;;  %v1171_v58 = vsel %vm1150_vm2, %v5243_v13, %v4031_v24  ;;  %v5245_v11 = vld [vmem:[#allocation23_spill] sm:$0xff]  ;;  %v5247_v8 = vld [vmem:[#allocation34_spill] sm:$0xff]  ;;  %v5256_v13 = vld [vmem:[#allocation48_spill] sm:$0xff] }
 0x2ab   : > { %v1522_v50 = vadd.f32 %v4280_v25, %v1440_v14  ;;  %v606_v52 = vsel %vm605_vm14, %v5244_v39, %v3660_v37  ;;  %v5248_v24 = vld [vmem:[#allocation42_spill] sm:$0xff]  ;;  %v1259_v14 = vsel %vm1238_vm13, %v5250_v40, %v4086_v3  ;;  %v1897_v3 = vmul.f32 %v4417_v48, %v4303_v54 }
 0x2ac   : > { %v874_v33 = vadd.f32 %v5239_v16, %v787_v10  ;;  %v1089_v17 = vadd.f32 %v1084_v46, %v1002_v49  ;;  %v5251_v37 = vld [vmem:[#allocation38_spill] sm:$0xff]  ;;  %v612_v28 = vadd.f32 %v606_v52, %v521_v29  ;;  %v5254_v46 = vld [vmem:[#allocation27_spill] sm:$0xff]  ;;  %vm1820_vm14 = vcmask 375808  }
 0x2ad   : > { %1860 = vrot.lane.b32.xlu1 %v1853_v22, %s3120_s19  ;;  %1858 = vrot.lane.b32.xlu0 %v1852_v62, %s3120_s19  ;;  %v693_v22 = vsel %vm628_vm12, %v5246_v32, %v5245_v11  ;;  %v611_v62 = vadd.f32 %v5244_v39, %v520_v5  ;;  %vm2430_vm2 = vcmask 343040  }
 0x2ae   : > { %1841 = vrot.lane.b32.xlu2 %v1833_v34, %s3120_s19  ;;  %v961_v20 = vadd.f32 %v955_v53, %v874_v33  ;;  %v5249_v34 = vld [vmem:[#allocation40_spill] sm:$0xff]  ;;  %v1854_v53 = vmul.f32 %v1851_v31, %v4328_v7  ;;  %v1176_v4 = vadd.f32 %v1171_v58, %v1089_v17  ;;  %v1876_v33 = vmul.f32 %v1873_v63, %v4328_v7  ;;  %v5252_v31 = vld [vmem:[#allocation25_spill] sm:$0xff] }
 0x2af   : > { %v4397_v27 = vpop.permute.xlu1 %1555  ;;  %v4399_v36 = vpop.permute.xlu0 %1553  ;;  %v1217_v10 = vsel %vm1215_vm5, %v5249_v34, %v5248_v24  ;;  %v698_v2 = vadd.f32 %v693_v22, %v611_v62  ;;  %v780_v5 = vsel %vm757_vm15, %v5252_v31, %v3773_v26  ;;  %v867_v63 = vsel %vm802_vm1, %v5254_v46, %v5253_v41 }
 0x2b0   : > { %v4406_v30 = vpop.permute.xlu2 %1600  ;;  %v1048_v45 = vadd.f32 %v5247_v8, %v961_v20  ;;  %v1264_v29 = vadd.f32 %v1259_v14, %v1176_v4  ;;  %v1434_v24 = vsel %vm1412_vm7, %v4230_v0, %v4267_v18  ;;  %v5259_v4 = vld [vmem:[#allocation30_spill] sm:$0xff]  ;;  %vm1843_vm15 = vcmask 900096  }
 0x2b1   : > { %v4410_v43 = vadd.f32 %v4406_v30, %v1522_v50  ;;  %v694_v50 = vsel %vm628_vm12, %v5245_v11, %v3756_v61  ;;  %v5255_v61 = vld [vmem:[#allocation46_spill] sm:$0xff]  ;;  %v5258_v11 = vld [vmem:[#allocation47_spill] sm:$0xff]  ;;  %v785_v62 = vadd.f32 %v5252_v31, %v698_v2  ;;  %vm1755_vm12 = vcmask 515072  }
 0x2b2   : > { %v1135_v60 = vadd.f32 %v5251_v37, %v1048_v45  ;;  %v1345_v58 = vsel %vm1215_vm5, %v5256_v13, %v5255_v61  ;;  %v5262_v61 = vld [vmem:[#allocation36_spill] sm:$0xff]  ;;  %v5263_v13 = vld [vmem:[#allocation37_spill] sm:$0xff] }
 0x2b3   : > { %v872_v14 = vadd.f32 %v867_v63, %v785_v62  ;;  %v1898_v62 = vmul.f32 %v4417_v48, %v4328_v7 }
 0x2b4   : > { %v1223_v19 = vadd.f32 %v1217_v10, %v1135_v60 }
 0x2b5   : > { %1882 = vrot.lane.b32.xlu1 %v1875_v57, %s3120_s19  ;;  %1880 = vrot.lane.b32.xlu0 %v1874_v38, %s3120_s19  ;;  %v5257_v57 = vld [vmem:[#allocation49_spill] sm:$0xff]  ;;  %v959_v2 = vadd.f32 %v5259_v4, %v872_v14 }
 0x2b6   : > { %1862 = vrot.lane.b32.xlu2 %v1854_v53, %s3120_s19  ;;  %v1391_v38 = vsel %vm1367_vm11, %v5257_v57, %v4242_v42  ;;  %v1310_v32 = vadd.f32 %v5258_v11, %v1223_v19  ;;  %v699_v42 = vadd.f32 %v694_v50, %v612_v28  ;;  %v1439_v53 = vadd.f32 %v1434_v24, %v4217_v55 }
 0x2b7   : > { %v1578_v20 = vpop.permute.xlu1 %1577  ;;  %v1576_v49 = vpop.permute.xlu0 %1575  ;;  %v954_v28 = vsel %vm909_vm3, %v5259_v4, %v3901_v6  ;;  %vm2124_vm3 = vcmask 97280  }
 0x2b8   : > { %v1583_v39 = vsel %vm1581_vm4, %v1578_v20, %v4363_v51  ;;  %v4460_v26 = vpop.permute.xlu2 %1622  ;;  %v1582_v52 = vsel %vm1581_vm4, %v1576_v49, %v1578_v20  ;;  %v1433_v51 = vsel %vm1412_vm7, %v4252_v23, %v4230_v0  ;;  %v1397_v10 = vadd.f32 %v1391_v38, %v1310_v32  ;;  %v5264_v32 = vld [vmem:[#allocation41_spill] sm:$0xff] }
 0x2b9   : > { %v4465_v22 = vadd.f32 %v1583_v39, %v4331_v1  ;;  %v4469_v45 = vadd.f32 %v4460_v26, %v4371_v9  ;;  %v4472_v17 = vadd.f32 %v1582_v52, %v4307_v56  ;;  %v868_v1 = vsel %vm802_vm1, %v5253_v41, %v5239_v16  ;;  %v5260_v41 = vld [vmem:[#allocation32_spill] sm:$0xff] }
 0x2ba   : > { %v1350_v9 = vadd.f32 %v1345_v58, %v1264_v29  ;;  %v1896_v56 = vmul.f32 %v4417_v48, %v4298_v44  ;;  %v786_v40 = vadd.f32 %v780_v5, %v699_v42  ;;  %v1516_v23 = vsel %vm1515_vm0, %v4321_v35, %v4280_v25 }
 0x2bb   : > { %v1560_v0 = vsel %vm1515_vm0, %v4397_v27, %v4323_v15  ;;  %v1484_v16 = vadd.f32 %v4294_v59, %v1397_v10  ;;  %v1917_v25 = vstv %s4444_s10  ;;  %v1521_v50 = vadd.f32 %v1516_v23, %v1439_v53  ;;  %v5267_v23 = vld [vmem:[#allocation50_spill] sm:$0xff]  ;;  %s3124_s10 = smov 76  }
 0x2bc   : > { %v1438_v18 = vadd.f32 %v1433_v51, %v1350_v9  ;;  %v873_v60 = vadd.f32 %v868_v1, %v786_v40  ;;  %v1042_v63 = vsel %vm976_vm6, %v5260_v41, %v5247_v8  ;;  %v1128_v58 = vsel %vm1063_vm8, %v5263_v13, %v5262_v61  ;;  %v5266_v1 = vld [vmem:[#allocation45_spill] sm:$0xff] }
 0x2bd   : > { %1904 = vrot.lane.b32.xlu1 %v1897_v3, %s3120_s19  ;;  %1902 = vrot.lane.b32.xlu0 %v1896_v56, %s3120_s19  ;;  %v1566_v31 = vadd.f32 %v1560_v0, %v1484_v16  ;;  %v5261_v3 = vld [vmem:[#allocation33_spill] sm:$0xff]  ;;  %v1129_v8 = vsel %vm1063_vm8, %v5262_v61, %v5251_v37  ;;  %v1919_v39 = vmul.f32 %v1917_v25, %v4303_v54  ;;  %v5265_v37 = vld [vmem:[#allocation44_spill] sm:$0xff]  ;;  %v1937_v16 = vstv %s2846_s11  ;;  %s2860_s11 = sld [smem:[#allocation7 + $0x5f]] }
 0x2be   : > { %1884 = vrot.lane.b32.xlu2 %v1876_v33, %s3120_s19  ;;  %v1520_v15 = vadd.f32 %v4321_v35, %v1438_v18  ;;  %v1041_v46 = vsel %vm976_vm6, %v5261_v3, %v5260_v41  ;;  %v960_v35 = vadd.f32 %v954_v28, %v873_v60  ;;  %v1918_v52 = vmul.f32 %v1917_v25, %v4298_v44 }
 0x2bf   : > { %v1599_v55 = vpop.permute.xlu1 %1598  ;;  %v1597_v5 = vpop.permute.xlu0 %1596  ;;  %v1216_v42 = vsel %vm1215_vm5, %v5264_v32, %v5249_v34  ;;  %v1303_v9 = vsel %vm1238_vm13, %v5266_v1, %v5265_v37  ;;  %v1304_v10 = vsel %vm1238_vm13, %v5265_v37, %v5258_v11  ;;  %v1542_v48 = vadd.f32 %v4355_v21, %v4270_v12  ;;  %v5268_v21 = vld [vmem:[#allocation51_spill] sm:$0xff] }
 0x2c0   : > { %v1603_v6 = vsel %vm1581_vm4, %v1599_v55, %v4406_v30  ;;  %v1645_v33 = vpop.permute.xlu2 %1644  ;;  %v1602_v19 = vsel %vm1581_vm4, %v1597_v5, %v1599_v55  ;;  %v1046_v30 = vadd.f32 %v1041_v46, %v959_v2  ;;  %v1047_v38 = vadd.f32 %v1042_v63, %v960_v35  ;;  %v5269_v2 = vld [vmem:[#allocation52_spill] sm:$0xff] }
 0x2c1   : > { %v4512_v29 = vadd.f32 %v1603_v6, %v1521_v50  ;;  %v4514_v20 = vadd.f32 %v1645_v33, %v1566_v31  ;;  %v4516_v49 = vadd.f32 %v1602_v19, %v1520_v15  ;;  %v1390_v0 = vsel %vm1367_vm11, %v5267_v23, %v5257_v57 }
 0x2c2   : > { %v1133_v51 = vadd.f32 %v1128_v58, %v1046_v30  ;;  %v1134_v24 = vadd.f32 %v1129_v8, %v1047_v38  ;;  %v1477_v15 = vsel %vm1412_vm7, %v5269_v2, %v5268_v21  ;;  %v1478_v57 = vsel %vm1412_vm7, %v5268_v21, %v4294_v59  ;;  %v5270_v59 = vld [vmem:[#allocation14_spill] sm:$0xff] }
 0x2c3   : > { %v1939_v55 = vmul.f32 %v1937_v16, %v4303_v54  ;;  %v1938_v31 = vmul.f32 %v1937_v16, %v4298_v44  ;;  %v1920_v5 = vmul.f32 %v1917_v25, %v4328_v7  ;;  %v4572_v46 = vsel %vm307_vm9, 0.0, %v5270_v59 }
 0x2c4   : > { %v1221_v34 = vadd.f32 %v5264_v32, %v1133_v51  ;;  %v1222_v56 = vadd.f32 %v1216_v42, %v1134_v24  ;;  %v1959_v13 = vstv %s2847_s12  ;;  %s2859_s12 = sld [smem:[#allocation7 + $0x58]]  ;;  %vm1972_vm1 = vcmask 236544  }
 0x2c5   : > { %1926 = vrot.lane.b32.xlu1 %v1919_v39, %s3119_s7  ;;  %1924 = vrot.lane.b32.xlu0 %v1918_v52, %s3119_s7  ;;  %v1960_v38 = vmul.f32 %v1959_v13, %v4572_v46  ;;  %v1940_v39 = vmul.f32 %v1937_v16, %v4328_v7  ;;  %vm2191_vm6 = vcmask 621568   ;;  %vm2278_vm8 = vcmask 1006592  }
 0x2c6   : > { %1906 = vrot.lane.b32.xlu2 %v1898_v62, %s3120_s19  ;;  %v1308_v60 = vadd.f32 %v1303_v9, %v1221_v34  ;;  %v1309_v4 = vadd.f32 %v1304_v10, %v1222_v56  ;;  %v1982_v62 = vstv %s2848_s13  ;;  %s2856_s19 = sld [smem:[#allocation7 + $0x43]]  ;;  %vm2453_vm13 = vcmask 867328  }
 0x2c7   : > { %v1621_v40 = vpop.permute.xlu1 %1620  ;;  %v1619_v14 = vpop.permute.xlu0 %1618  ;;  %v1983_v9 = vmul.f32 %v1982_v62, %v4572_v46  ;;  %s2864_s13 = sld [smem:[#allocation7 + $0x4b]]  ;;  %vm2365_vm5 = vcmask 482304   ;;  %vm2577_vm11 = vcmask 916480   ;;  %vm2610_vm7 = vcmask 785408  }
 0x2c8   : > { %v1625_v18 = vsel %vm1581_vm4, %v1621_v40, %v4460_v26  ;;  %v1667_v53 = vpop.permute.xlu2 %1666  ;;  %v1624_v11 = vsel %vm1581_vm4, %v1619_v14, %v1621_v40  ;;  %v1395_v26 = vadd.f32 %v5267_v23, %v1308_v60  ;;  %v1396_v50 = vadd.f32 %v1390_v0, %v1309_v4 }
 0x2c9   : > { %v4550_v28 = vadd.f32 %v1625_v18, %v4369_v47  ;;  %v4552_v12 = vadd.f32 %v1624_v11, %v1542_v48  ;;  %v1559_v47 = vsel %vm1515_vm0, %v4399_v36, %v4397_v27  ;;  %v5271_v27 = vld [vmem:[#allocation17_spill] sm:$0xff]  ;;  %v2004_v48 = vstv %s2849_s21  ;;  %s3125_s21 = smov 123  }
 0x2ca   : > { %v1482_v41 = vadd.f32 %v1477_v15, %v1395_v26  ;;  %v1483_v3 = vadd.f32 %v1478_v57, %v1396_v50  ;;  %v4578_v25 = vsel %vm307_vm9, %v5270_v59, %v5271_v27  ;;  %v4599_v7 = vsel %vm307_vm9, %v5271_v27, 0.0 }
 0x2cb   : > { %v1961_v30 = vmul.f32 %v1959_v13, %v4578_v25  ;;  %v1984_v1 = vmul.f32 %v1982_v62, %v4578_v25  ;;  %v1962_v10 = vmul.f32 %v1959_v13, %v4599_v7  ;;  %v2006_v0 = vmul.f32 %v2004_v48, %v4578_v25 }
 0x2cc   : > { %v1564_v44 = vadd.f32 %v4399_v36, %v1482_v41  ;;  %v1565_v54 = vadd.f32 %v1559_v47, %v1483_v3  ;;  %v2005_v18 = vmul.f32 %v2004_v48, %v4572_v46  ;;  %v2025_v60 = vstv %s2850_s22  ;;  %s2872_s22 = sld [smem:[#allocation7 + $0x53]] }
 0x2cd   : > { %1946 = vrot.lane.b32.xlu1 %v1939_v55, %s3119_s7  ;;  %1944 = vrot.lane.b32.xlu0 %v1938_v31, %s3119_s7  ;;  %v2027_v2 = vmul.f32 %v2025_v60, %v4578_v25  ;;  %v2026_v15 = vmul.f32 %v2025_v60, %v4572_v46  ;;  %v2007_v57 = vmul.f32 %v2004_v48, %v4599_v7  ;;  %v2047_v31 = vstv %s2851_s26  ;;  %s3127_s26 = smov 106  }
 0x2ce   : > { %1928 = vrot.lane.b32.xlu2 %v1920_v5, %s3119_s7  ;;  %v2049_v3 = vmul.f32 %v2047_v31, %v4578_v25  ;;  %v2048_v59 = vmul.f32 %v2047_v31, %v4572_v46 }
 0x2cf   : > { %v1643_v63 = vpop.permute.xlu1 %1642  ;;  %v1641_v6 = vpop.permute.xlu0 %1640 }
 0x2d0   : > { %v1647_v19 = vsel %vm1581_vm4, %v1643_v63, %v1645_v33  ;;  %v1688_v35 = vpop.permute.xlu2 %1687  ;;  %v1646_v61 = vsel %vm1581_vm4, %v1641_v6, %v1643_v63 }
 0x2d1   : > { %v4582_v58 = vadd.f32 %v1647_v19, %v1565_v54  ;;  %v4585_v8 = vadd.f32 %v1688_v35, %v4410_v43  ;;  %v4587_v36 = vadd.f32 %v1646_v61, %v1564_v44  ;;  %v2028_v44 = vmul.f32 %v2025_v60, %v4599_v7 }
 0x2d5   : > { %1968 = vrot.lane.b32.xlu1 %v1961_v30, %s3121_s18  ;;  %1966 = vrot.lane.b32.xlu0 %v1960_v38, %s3121_s18  ;;  %v2050_v30 = vmul.f32 %v2047_v31, %v4599_v7  ;;  %v2156_v31 = vstv %s2856_s19  ;;  %s2870_s19 = sld [smem:[#allocation7 + $0x45]] }
 0x2d6   : > { %1948 = vrot.lane.b32.xlu2 %v1940_v39, %s3119_s7  ;;  %s2855_s7 = sld [smem:[#allocation7 + $0x3c]] }
 0x2d7   : > { %v1665_v33 = vpop.permute.xlu1 %1664  ;;  %v1663_v52 = vpop.permute.xlu0 %1662 }
 0x2d8   : > { %v1670_v43 = vsel %vm1668_vm10, %v1665_v33, %v1667_v53  ;;  %v1710_v32 = vpop.permute.xlu2 %1709  ;;  %v1669_v42 = vsel %vm1668_vm10, %v1663_v52, %v1665_v33  ;;  %v1985_v53 = vmul.f32 %v1982_v62, %v4599_v7 }
 0x2d9   : > { %v4602_v51 = vadd.f32 %v1670_v43, %v4465_v22  ;;  %v4605_v24 = vadd.f32 %v1710_v32, %v4469_v45  ;;  %v4608_v37 = vadd.f32 %v1669_v42, %v4472_v17 }
 0x2dc   : > { %v2134_v60 = vstv %s2855_s7  ;;  %s2867_s7 = sld [smem:[#allocation7 + $0x60]] }
 0x2dd   : > { %1991 = vrot.lane.b32.xlu1 %v1984_v1, %s3121_s18  ;;  %1989 = vrot.lane.b32.xlu0 %v1983_v9, %s3121_s18  ;;  %v5272_v1 = vld [vmem:[#allocation15_spill] sm:$0xff]  ;;  %v5273_v9 = vld [vmem:[#allocation18_spill] sm:$0xff] }
 0x2de   : > { %1970 = vrot.lane.b32.xlu2 %v1962_v10, %s3121_s18  ;;  %v4698_v10 = vsel %vm307_vm9, %v5273_v9, %v5272_v1 }
 0x2df   : > { %v1686_v22 = vpop.permute.xlu1 %1685  ;;  %v1684_v34 = vpop.permute.xlu0 %1683 }
 0x2e0   : > { %v1690_v45 = vsel %vm1668_vm10, %v1686_v22, %v1688_v35  ;;  %v1732_v56 = vpop.permute.xlu2 %1731  ;;  %v1689_v17 = vsel %vm1668_vm10, %v1684_v34, %v1686_v22  ;;  %v2069_v35 = vstv %s2852_s27  ;;  %s2862_s27 = sld [smem:[#allocation7 + $0x3d]] }
 0x2e1   : > { %v4619_v40 = vadd.f32 %v1690_v45, %v4512_v29  ;;  %v4622_v14 = vadd.f32 %v1732_v56, %v4514_v20  ;;  %v4625_v23 = vadd.f32 %v1689_v17, %v4516_v49  ;;  %v2111_v17 = vstv %s2854_s5  ;;  %s2866_s5 = sld [smem:[#allocation7 + $0x59]] }
 0x2e5   : > { %2013 = vrot.lane.b32.xlu1 %v2006_v0, %s3122_s23  ;;  %2011 = vrot.lane.b32.xlu0 %v2005_v18, %s3122_s23 }
 0x2e6   : > { %1993 = vrot.lane.b32.xlu2 %v1985_v53, %s3121_s18 }
 0x2e7   : > { %v1708_v29 = vpop.permute.xlu1 %1707  ;;  %v1706_v11 = vpop.permute.xlu0 %1705 }
 0x2e8   : > { %v1712_v20 = vsel %vm1668_vm10, %v1708_v29, %v1710_v32  ;;  %v1754_v16 = vpop.permute.xlu2 %1753  ;;  %v1711_v49 = vsel %vm1668_vm10, %v1706_v11, %v1708_v29  ;;  %v2091_v32 = vstv %s2853_s28  ;;  %s2863_s28 = sld [smem:[#allocation7 + $0x44]] }
 0x2e9   : > { %v4636_v4 = vadd.f32 %v1712_v20, %v4550_v28  ;;  %v4639_v21 = vadd.f32 %v1711_v49, %v4552_v12  ;;  %v2094_v18 = vmul.f32 %v2091_v32, %v4599_v7 }
 0x2ed   : > { %2034 = vrot.lane.b32.xlu1 %v2027_v2, %s3122_s23  ;;  %2032 = vrot.lane.b32.xlu0 %v2026_v15, %s3122_s23  ;;  %v2136_v15 = vmul.f32 %v2134_v60, %v4698_v10 }
 0x2ee   : > { %2015 = vrot.lane.b32.xlu2 %v2007_v57, %s3122_s23 }
 0x2ef   : > { %v1730_v26 = vpop.permute.xlu1 %1729  ;;  %v1728_v50 = vpop.permute.xlu0 %1727 }
 0x2f0   : > { %v1734_v28 = vsel %vm1668_vm10, %v1730_v26, %v1732_v56  ;;  %v1775_v55 = vpop.permute.xlu2 %1774  ;;  %v1733_v12 = vsel %vm1668_vm10, %v1728_v50, %v1730_v26 }
 0x2f1   : > { %v4650_v47 = vadd.f32 %v1734_v28, %v4582_v58  ;;  %v4653_v5 = vadd.f32 %v1775_v55, %v4585_v8  ;;  %v4656_v41 = vadd.f32 %v1733_v12, %v4587_v36  ;;  %v2071_v8 = vmul.f32 %v2069_v35, %v4578_v25 }
 0x2f2   : > { %v2070_v36 = vmul.f32 %v2069_v35, %v4572_v46 }
 0x2f5   : > { %2056 = vrot.lane.b32.xlu1 %v2049_v3, %s3122_s23  ;;  %2054 = vrot.lane.b32.xlu0 %v2048_v59, %s3122_s23  ;;  %v2158_v3 = vmul.f32 %v2156_v31, %v4698_v10 }
 0x2f6   : > { %2036 = vrot.lane.b32.xlu2 %v2028_v44, %s3122_s23 }
 0x2f7   : > { %v1752_v54 = vpop.permute.xlu1 %1751  ;;  %v1750_v63 = vpop.permute.xlu0 %1749 }
 0x2f8   : > { %v1757_v6 = vsel %vm1755_vm12, %v1752_v54, %v1754_v16  ;;  %v1797_v27 = vpop.permute.xlu2 %1796  ;;  %v1756_v19 = vsel %vm1755_vm12, %v1750_v63, %v1752_v54 }
 0x2f9   : > { %v4667_v61 = vadd.f32 %v1757_v6, %v4602_v51  ;;  %v4670_v13 = vadd.f32 %v1797_v27, %v4605_v24  ;;  %v4673_v58 = vadd.f32 %v1756_v19, %v4608_v37  ;;  %v2093_v51 = vmul.f32 %v2091_v32, %v4578_v25 }
 0x2fa   : > { %v2092_v24 = vmul.f32 %v2091_v32, %v4572_v46  ;;  %v2072_v37 = vmul.f32 %v2069_v35, %v4599_v7  ;;  %v4702_v25 = vsel %vm307_vm9, 0.0, %v5273_v9  ;;  %v4725_v7 = vsel %vm307_vm9, %v5272_v1, 0.0 }
 0x2fb   : > { %v2112_v0 = vmul.f32 %v2111_v17, %v4702_v25  ;;  %v2135_v57 = vmul.f32 %v2134_v60, %v4702_v25  ;;  %v2114_v26 = vmul.f32 %v2111_v17, %v4725_v7  ;;  %v2157_v59 = vmul.f32 %v2156_v31, %v4702_v25 }
 0x2fc   : > { %v2137_v44 = vmul.f32 %v2134_v60, %v4725_v7  ;;  %v2178_v35 = vstv %s2857_s24  ;;  %v2199_v32 = vstv %s2858_s9  ;;  %s2871_s24 = sld [smem:[#allocation7 + $0x4c]] }
 0x2fd   : > { %2078 = vrot.lane.b32.xlu1 %v2071_v8, %s3122_s23  ;;  %2076 = vrot.lane.b32.xlu0 %v2070_v36, %s3122_s23  ;;  %v2180_v8 = vmul.f32 %v2178_v35, %v4698_v10  ;;  %v2179_v36 = vmul.f32 %v2178_v35, %v4702_v25  ;;  %s2874_s9 = sld [smem:[#allocation7 + $0x61]] }
 0x2fe   : > { %2058 = vrot.lane.b32.xlu2 %v2050_v30, %s3122_s23  ;;  %v2159_v30 = vmul.f32 %v2156_v31, %v4725_v7 }
 0x2ff   : > { %v1773_v38 = vpop.permute.xlu1 %1772  ;;  %v1771_v39 = vpop.permute.xlu0 %1770 }
 0x300   : > { %v1777_v33 = vsel %vm1755_vm12, %v1773_v38, %v1775_v55  ;;  %v1819_v52 = vpop.permute.xlu2 %1818  ;;  %v1776_v43 = vsel %vm1755_vm12, %v1771_v39, %v1773_v38 }
 0x301   : > { %v4684_v42 = vadd.f32 %v1777_v33, %v4619_v40  ;;  %v4687_v62 = vadd.f32 %v1776_v43, %v4625_v23  ;;  %v2113_v23 = vmul.f32 %v2111_v17, %v4698_v10 }
 0x305   : > { %2100 = vrot.lane.b32.xlu1 %v2093_v51, %s3121_s18  ;;  %2098 = vrot.lane.b32.xlu0 %v2092_v24, %s3121_s18  ;;  %v2201_v51 = vmul.f32 %v2199_v32, %v4698_v10  ;;  %v2200_v24 = vmul.f32 %v2199_v32, %v4702_v25 }
 0x306   : > { %2080 = vrot.lane.b32.xlu2 %v2072_v37, %s3122_s23  ;;  %v2181_v37 = vmul.f32 %v2178_v35, %v4725_v7  ;;  %s3126_s23 = smov 42  }
 0x307   : > { %v1795_v22 = vpop.permute.xlu1 %1794  ;;  %v1793_v34 = vpop.permute.xlu0 %1792 }
 0x308   : > { %v1799_v46 = vsel %vm1755_vm12, %v1795_v22, %v1797_v27  ;;  %v1842_v45 = vpop.permute.xlu2 %1841  ;;  %v1798_v56 = vsel %vm1755_vm12, %v1793_v34, %v1795_v22 }
 0x309   : > { %v4707_v48 = vadd.f32 %v1799_v46, %v4636_v4  ;;  %v4710_v40 = vadd.f32 %v1798_v56, %v4639_v21  ;;  %v4789_v56 = vstv %s2859_s12  ;;  %s2865_s12 = sld [smem:[#allocation7 + $0x52]] }
 0x30d   : > { %2120 = vrot.lane.b32.xlu1 %v2113_v23, %s3123_s8  ;;  %2118 = vrot.lane.b32.xlu0 %v2112_v0, %s3123_s8  ;;  %v2222_v0 = vmul.f32 %v4789_v56, %v4702_v25 }
 0x30e   : > { %2102 = vrot.lane.b32.xlu2 %v2094_v18, %s3121_s18  ;;  %v2202_v18 = vmul.f32 %v2199_v32, %v4725_v7  ;;  %s2868_s18 = sld [smem:[#allocation7 + $0x37]] }
 0x30f   : > { %v1817_v53 = vpop.permute.xlu1 %1816  ;;  %v1815_v29 = vpop.permute.xlu0 %1814 }
 0x310   : > { %v1863_v11 = vpop.permute.xlu2 %1862  ;;  %v1822_v20 = vsel %vm1820_vm14, %v1817_v53, %v1819_v52  ;;  %v1821_v16 = vsel %vm1820_vm14, %v1815_v29, %v1817_v53  ;;  %v4721_v49 = vadd.f32 %v1815_v29, %v4656_v41 }
 0x311   : > { %v4728_v4 = vadd.f32 %v1863_v11, %v4653_v5  ;;  %v1828_v21 = vadd.f32 %v1822_v20, %v4622_v14  ;;  %v4732_v2 = vadd.f32 %v1821_v16, %v4650_v47  ;;  %v5275_v20 = vld [vmem:[#allocation19_spill] sm:$0xff] }
 0x312   : > { %v4832_v31 = vsel %vm307_vm9, 0.0, %v5275_v20 }
 0x315   : > { %2143 = vrot.lane.b32.xlu1 %v2136_v15, %s3123_s8  ;;  %2141 = vrot.lane.b32.xlu0 %v2135_v57, %s3123_s8 }
 0x316   : > { %2122 = vrot.lane.b32.xlu2 %v2114_v26, %s3123_s8 }
 0x317   : > { %v1840_v50 = vpop.permute.xlu1 %1839  ;;  %v1838_v28 = vpop.permute.xlu0 %1837 }
 0x318   : > { %v1885_v55 = vpop.permute.xlu2 %1884  ;;  %v1845_v14 = vsel %vm1843_vm15, %v1840_v50, %v1842_v45  ;;  %v1844_v12 = vsel %vm1843_vm15, %v1838_v28, %v1840_v50  ;;  %v2243_v45 = vstv %s2860_s11  ;;  %v5276_v28 = vld [vmem:[#allocation16_spill] sm:$0xff]  ;;  %s3129_s11 = smov 112  }
 0x319   : > { %v4743_v47 = vadd.f32 %v1885_v55, %v4670_v13  ;;  %v4746_v5 = vadd.f32 %v1845_v14, %v4667_v61  ;;  %v4749_v41 = vadd.f32 %v1844_v12, %v4673_v58  ;;  %v2245_v23 = vmul.f32 %v2243_v45, %v4698_v10 }
 0x31a   : > { %v2244_v26 = vmul.f32 %v2243_v45, %v4702_v25  ;;  %v2246_v50 = vmul.f32 %v2243_v45, %v4725_v7  ;;  %v2223_v45 = vmul.f32 %v4789_v56, %v4698_v10 }
 0x31d   : > { %2165 = vrot.lane.b32.xlu1 %v2158_v3, %s3123_s8  ;;  %2163 = vrot.lane.b32.xlu0 %v2157_v59, %s3123_s8  ;;  %v2417_v3 = vstv %s2868_s18  ;;  %s2873_s18 = sld [smem:[#allocation7 + $0x5a]] }
 0x31e   : > { %2145 = vrot.lane.b32.xlu2 %v2137_v44, %s3123_s8 }
 0x31f   : > { %v1861_v54 = vpop.permute.xlu1 %1860  ;;  %v1859_v63 = vpop.permute.xlu0 %1858 }
 0x320   : > { %v1907_v6 = vpop.permute.xlu2 %1906  ;;  %v1865_v27 = vsel %vm1843_vm15, %v1861_v54, %v1863_v11  ;;  %v1864_v19 = vsel %vm1843_vm15, %v1859_v63, %v1861_v54  ;;  %v5274_v11 = vld [vmem:[#allocation20_spill] sm:$0xff] }
 0x321   : > { %v4759_v61 = vadd.f32 %v1907_v6, %v1828_v21  ;;  %v4762_v13 = vadd.f32 %v1865_v27, %v4684_v42  ;;  %v4765_v58 = vadd.f32 %v1864_v19, %v4687_v62  ;;  %v4810_v16 = vsel %vm307_vm9, %v5275_v20, %v5274_v11  ;;  %v5277_v19 = vld [vmem:[#allocation21_spill] sm:$0xff] }
 0x322   : > { %v2330_v21 = vstv %s2864_s13  ;;  %v4838_v59 = vsel %vm307_vm9, %v5274_v11, 0.0  ;;  %v4855_v35 = vsel %vm307_vm9, %v5276_v28, %v5277_v19  ;;  %s2869_s13 = sld [smem:[#allocation7 + $0x3e]] }
 0x323   : > { %v2332_v57 = vmul.f32 %v2330_v21, %v4810_v16  ;;  %v2333_v27 = vmul.f32 %v2330_v21, %v4838_v59 }
 0x325   : > { %2187 = vrot.lane.b32.xlu1 %v2180_v8, %s3124_s10  ;;  %2185 = vrot.lane.b32.xlu0 %v2179_v36, %s3124_s10 }
 0x326   : > { %2167 = vrot.lane.b32.xlu2 %v2159_v30, %s3123_s8  ;;  %s3128_s8 = smov 59  }
 0x327   : > { %v1883_v38 = vpop.permute.xlu1 %1882  ;;  %v1881_v39 = vpop.permute.xlu0 %1880 }
 0x328   : > { %v1929_v33 = vpop.permute.xlu2 %1928  ;;  %v1887_v52 = vsel %vm1843_vm15, %v1883_v38, %v1885_v55  ;;  %v1886_v43 = vsel %vm1843_vm15, %v1881_v39, %v1883_v38  ;;  %v4828_v55 = vsel %vm307_vm9, 0.0, %v5276_v28 }
 0x329   : > { %v4776_v42 = vadd.f32 %v1887_v52, %v4707_v48  ;;  %v4779_v62 = vadd.f32 %v1886_v43, %v4710_v40  ;;  %v2418_v63 = vmul.f32 %v2417_v3, %v4828_v55 }
 0x32d   : > { %2208 = vrot.lane.b32.xlu1 %v2201_v51, %s3124_s10  ;;  %2206 = vrot.lane.b32.xlu0 %v2200_v24, %s3124_s10  ;;  %v2419_v24 = vmul.f32 %v2417_v3, %v4855_v35 }
 0x32e   : > { %2189 = vrot.lane.b32.xlu2 %v2181_v37, %s3124_s10 }
 0x32f   : > { %v1905_v1 = vpop.permute.xlu1 %1904  ;;  %v1903_v9 = vpop.permute.xlu0 %1902 }
 0x330   : > { %v1949_v22 = vpop.permute.xlu2 %1948  ;;  %v1909_v34 = vsel %vm1843_vm15, %v1905_v1, %v1907_v6  ;;  %v1908_v46 = vsel %vm1843_vm15, %v1903_v9, %v1905_v1  ;;  %v2331_v6 = vmul.f32 %v2330_v21, %v4832_v31 }
 0x331   : > { %v4792_v17 = vadd.f32 %v1949_v22, %v4728_v4  ;;  %v4795_v48 = vadd.f32 %v1909_v34, %v4732_v2  ;;  %v4798_v40 = vadd.f32 %v1908_v46, %v4721_v49 }
 0x335   : > { %2252 = vrot.lane.b32.xlu1 %v2245_v23, %s3124_s10  ;;  %2228 = vrot.lane.b32.xlu0 %v2222_v0, %s3124_s10 }
 0x336   : > { %2210 = vrot.lane.b32.xlu2 %v2202_v18, %s3124_s10 }
 0x337   : > { %v1927_v53 = vpop.permute.xlu1 %1926  ;;  %v1925_v29 = vpop.permute.xlu0 %1924 }
 0x338   : > { %v1931_v49 = vsel %vm1820_vm14, %v1927_v53, %v1929_v33  ;;  %v1971_v60 = vpop.permute.xlu2 %1970  ;;  %v1930_v4 = vsel %vm1820_vm14, %v1925_v29, %v1927_v53  ;;  %v2505_v33 = vstv %s2872_s22  ;;  %v2286_v53 = vstv %s2862_s27  ;;  %s2617_s22 = sld [smem:[#allocation2]] }
 0x339   : > { %v4815_v2 = vadd.f32 %v1931_v49, %v4746_v5  ;;  %v4818_v15 = vadd.f32 %v1930_v4, %v4749_v41  ;;  %v2507_v32 = vmul.f32 %v2505_v33, %v4855_v35  ;;  %v2506_v23 = vmul.f32 %v2505_v33, %v4828_v55 }
 0x33a   : > { %v2289_v20 = vmul.f32 %v2286_v53, %v4838_v59  ;;  %v2288_v49 = vmul.f32 %v2286_v53, %v4810_v16 }
 0x33d   : > { %2339 = vrot.lane.b32.xlu1 %v2332_v57, %s3125_s21  ;;  %2250 = vrot.lane.b32.xlu0 %v2244_v26, %s3124_s10  ;;  %v2308_v26 = vstv %s2863_s28 }
 0x33e   : > { %2254 = vrot.lane.b32.xlu2 %v2246_v50, %s3124_s10 }
 0x33f   : > { %v1947_v14 = vpop.permute.xlu1 %1946  ;;  %v1945_v12 = vpop.permute.xlu0 %1944 }
 0x340   : > { %v1951_v25 = vsel %vm1820_vm14, %v1947_v14, %v1949_v22  ;;  %v1994_v5 = vpop.permute.xlu2 %1993  ;;  %v1950_v41 = vsel %vm1820_vm14, %v1945_v12, %v1947_v14  ;;  %v2310_v14 = vmul.f32 %v2308_v26, %v4810_v16  ;;  %v2287_v12 = vmul.f32 %v2286_v53, %v4832_v31 }
 0x341   : > { %v4841_v44 = vadd.f32 %v1951_v25, %v4762_v13  ;;  %v4844_v54 = vadd.f32 %v1950_v41, %v4765_v58  ;;  %v4859_v13 = vsel %vm307_vm9, %v5277_v19, 0.0  ;;  %vm2017_vm9 = vcmask 760832  }
 0x342   : > { %v2420_v51 = vmul.f32 %v2417_v3, %v4859_v13  ;;  %v2508_v0 = vmul.f32 %v2505_v33, %v4859_v13  ;;  %v2395_v33 = vstv %s2867_s7 }
 0x345   : > { %2424 = vrot.lane.b32.xlu1 %v2418_v63, %s3126_s23  ;;  %2337 = vrot.lane.b32.xlu0 %v2331_v6, %s3125_s21  ;;  %v2373_v6 = vstv %s2866_s5 }
 0x346   : > { %2341 = vrot.lane.b32.xlu2 %v2333_v27, %s3125_s21  ;;  %v2309_v27 = vmul.f32 %v2308_v26, %v4832_v31  ;;  %v2376_v19 = vmul.f32 %v2373_v6, %v4838_v59 }
 0x347   : > { %v1969_v58 = vpop.permute.xlu1 %1968  ;;  %v1967_v8 = vpop.permute.xlu0 %1966 }
 0x348   : > { %v2016_v36 = vpop.permute.xlu2 %2015  ;;  %v1974_v30 = vsel %vm1972_vm1, %v1969_v58, %v1971_v60  ;;  %v1973_v38 = vsel %vm1972_vm1, %v1967_v8, %v1969_v58  ;;  %v4864_v39 = vadd.f32 %v1967_v8, %v4779_v62  ;;  %v2224_v60 = vmul.f32 %v4789_v56, %v4725_v7 }
 0x349   : > { %v1980_v52 = vadd.f32 %v1974_v30, %v4743_v47  ;;  %v4868_v43 = vadd.f32 %v1973_v38, %v4776_v42  ;;  %v2311_v56 = vmul.f32 %v2308_v26, %v4838_v59  ;;  %v2375_v58 = vmul.f32 %v2373_v6, %v4810_v16 }
 0x34d   : > { %2514 = vrot.lane.b32.xlu1 %v2507_v32, %s3127_s26  ;;  %2428 = vrot.lane.b32.xlu0 %v2420_v51, %s3126_s23  ;;  %v2398_v32 = vmul.f32 %v2395_v33, %v4838_v59  ;;  %v2397_v51 = vmul.f32 %v2395_v33, %v4810_v16 }
 0x34e   : > { %2426 = vrot.lane.b32.xlu2 %v2419_v24, %s3126_s23  ;;  %v2374_v24 = vmul.f32 %v2373_v6, %v4832_v31 }
 0x34f   : > { %v1992_v62 = vpop.permute.xlu1 %1991  ;;  %v1990_v37 = vpop.permute.xlu0 %1989 }
 0x350   : > { %v2037_v1 = vpop.permute.xlu2 %2036  ;;  %v1996_v47 = vsel %vm1972_vm1, %v1992_v62, %v1994_v5  ;;  %v1995_v42 = vsel %vm1972_vm1, %v1990_v37, %v1992_v62  ;;  %v4879_v9 = vadd.f32 %v1990_v37, %v4798_v40 }
 0x351   : > { %v4882_v22 = vadd.f32 %v2037_v1, %v4792_v17  ;;  %v2002_v34 = vadd.f32 %v1996_v47, %v4759_v61  ;;  %v2001_v46 = vadd.f32 %v1995_v42, %v4795_v48 }
 0x355   : > { %2230 = vrot.lane.b32.xlu1 %v2223_v45, %s3124_s10  ;;  %2512 = vrot.lane.b32.xlu0 %v2506_v23, %s3127_s26  ;;  %v2396_v45 = vmul.f32 %v2395_v33, %v4832_v31 }
 0x356   : > { %2516 = vrot.lane.b32.xlu2 %v2508_v0, %s3127_s26 }
 0x357   : > { %v2014_v17 = vpop.permute.xlu1 %2013  ;;  %v2012_v40 = vpop.permute.xlu0 %2011 }
 0x358   : > { %v2059_v18 = vpop.permute.xlu2 %2058  ;;  %v2019_v61 = vsel %vm2017_vm9, %v2014_v17, %v2016_v36  ;;  %v2018_v48 = vsel %vm2017_vm9, %v2012_v40, %v2014_v17 }
 0x359   : > { %v4895_v10 = vadd.f32 %v2059_v18, %v1980_v52  ;;  %v2023_v29 = vadd.f32 %v2019_v61, %v4815_v2  ;;  %v2022_v11 = vadd.f32 %v2018_v48, %v4818_v15 }
 0x35d   : > { %2297 = vrot.lane.b32.xlu1 %v2289_v20, %s3125_s21  ;;  %2295 = vrot.lane.b32.xlu0 %v2288_v49, %s3125_s21 }
 0x35e   : > { %2232 = vrot.lane.b32.xlu2 %v2224_v60, %s3124_s10  ;;  %s2861_s10 = sld [smem:[#allocation7 + $0x36]] }
 0x35f   : > { %v2035_v4 = vpop.permute.xlu1 %2034  ;;  %v2033_v21 = vpop.permute.xlu0 %2032 }
 0x360   : > { %v2081_v57 = vpop.permute.xlu2 %2080  ;;  %v2039_v2 = vsel %vm2017_vm9, %v2035_v4, %v2037_v1  ;;  %v2038_v15 = vsel %vm2017_vm9, %v2033_v21, %v2035_v4 }
 0x361   : > { %v4908_v50 = vadd.f32 %v2081_v57, %v2002_v34  ;;  %v4911_v28 = vadd.f32 %v2039_v2, %v4841_v44  ;;  %v2043_v7 = vadd.f32 %v2038_v15, %v4844_v54 }
 0x365   : > { %2319 = vrot.lane.b32.xlu1 %v2311_v56, %s3125_s21  ;;  %2317 = vrot.lane.b32.xlu0 %v2310_v14, %s3125_s21  ;;  %v2547_v56 = vstv %s2874_s9 }
 0x366   : > { %2293 = vrot.lane.b32.xlu2 %v2287_v12, %s3125_s21  ;;  %v2550_v12 = vmul.f32 %v2547_v56, %v4859_v13 }
 0x367   : > { %v2057_v25 = vpop.permute.xlu1 %2056  ;;  %v2055_v5 = vpop.permute.xlu0 %2054 }
 0x368   : > { %v2103_v41 = vpop.permute.xlu2 %2102  ;;  %v2061_v3 = vsel %vm2017_vm9, %v2057_v25, %v2059_v18  ;;  %v2060_v44 = vsel %vm2017_vm9, %v2055_v5, %v2057_v25  ;;  %v2549_v25 = vmul.f32 %v2547_v56, %v4855_v35 }
 0x369   : > { %v4923_v54 = vadd.f32 %v2061_v3, %v4868_v43  ;;  %v2065_v63 = vadd.f32 %v2060_v44, %v4864_v39  ;;  %v2548_v44 = vmul.f32 %v2547_v56, %v4828_v55 }
 0x36d   : > { %2315 = vrot.lane.b32.xlu1 %v2309_v27, %s3125_s21  ;;  %2384 = vrot.lane.b32.xlu0 %v2376_v19, %s3128_s8 }
 0x36e   : > { %2382 = vrot.lane.b32.xlu2 %v2375_v58, %s3128_s8 }
 0x36f   : > { %v2079_v8 = vpop.permute.xlu1 %2078  ;;  %v2077_v36 = vpop.permute.xlu0 %2076 }
 0x370   : > { %v2123_v30 = vpop.permute.xlu2 %2122  ;;  %v2083_v38 = vsel %vm2017_vm9, %v2079_v8, %v2081_v57  ;;  %v2082_v39 = vsel %vm2017_vm9, %v2077_v36, %v2079_v8 }
 0x371   : > { %v4934_v52 = vadd.f32 %v2083_v38, %v2001_v46  ;;  %v4937_v43 = vadd.f32 %v2082_v39, %v4879_v9  ;;  %v2461_v46 = vstv %s2870_s19 }
 0x372   : > { %v2464_v23 = vmul.f32 %v2461_v46, %v4859_v13  ;;  %v2463_v0 = vmul.f32 %v2461_v46, %v4855_v35  ;;  %v2462_v4 = vmul.f32 %v2461_v46, %v4828_v55 }
 0x375   : > { %2406 = vrot.lane.b32.xlu1 %v2398_v32, %s3128_s8  ;;  %2404 = vrot.lane.b32.xlu0 %v2397_v51, %s3128_s8 }
 0x376   : > { %2380 = vrot.lane.b32.xlu2 %v2374_v24, %s3128_s8 }
 0x377   : > { %v2101_v62 = vpop.permute.xlu1 %2100  ;;  %v2099_v37 = vpop.permute.xlu0 %2098 }
 0x378   : > { %v2146_v1 = vpop.permute.xlu2 %2145  ;;  %v2105_v47 = vsel %vm1972_vm1, %v2101_v62, %v2103_v41  ;;  %v2104_v42 = vsel %vm1972_vm1, %v2099_v37, %v2101_v62 }
 0x379   : > { %v2109_v9 = vadd.f32 %v2105_v47, %v2023_v29  ;;  %v2108_v34 = vadd.f32 %v2104_v42, %v2022_v11  ;;  %v2483_v29 = vstv %s2871_s24 }
 0x37a   : > { %v2486_v49 = vmul.f32 %v2483_v29, %v4859_v13  ;;  %v2485_v60 = vmul.f32 %v2483_v29, %v4855_v35  ;;  %v2484_v14 = vmul.f32 %v2483_v29, %v4828_v55 }
 0x37d   : > { %2402 = vrot.lane.b32.xlu1 %v2396_v45, %s3128_s8  ;;  %2472 = vrot.lane.b32.xlu0 %v2464_v23, %s3127_s26 }
 0x37e   : > { %2470 = vrot.lane.b32.xlu2 %v2463_v0, %s3127_s26 }
 0x37f   : > { %v2121_v17 = vpop.permute.xlu1 %2120  ;;  %v2119_v40 = vpop.permute.xlu0 %2118 }
 0x380   : > { %v2168_v18 = vpop.permute.xlu2 %2167  ;;  %v2126_v61 = vsel %vm2124_vm3, %v2121_v17, %v2123_v30  ;;  %v2125_v48 = vsel %vm2124_vm3, %v2119_v40, %v2121_v17  ;;  %v2130_v53 = vadd.f32 %v2119_v40, %v2043_v7 }
 0x381   : > { %v2132_v11 = vadd.f32 %v2126_v61, %v4882_v22  ;;  %v2131_v20 = vadd.f32 %v2125_v48, %v4911_v28 }
 0x385   : > { %2494 = vrot.lane.b32.xlu1 %v2486_v49, %s3127_s26  ;;  %2492 = vrot.lane.b32.xlu0 %v2485_v60, %s3127_s26 }
 0x386   : > { %2468 = vrot.lane.b32.xlu2 %v2462_v4, %s3127_s26 }
 0x387   : > { %v2144_v21 = vpop.permute.xlu1 %2143  ;;  %v2142_v57 = vpop.permute.xlu0 %2141 }
 0x388   : > { %v2190_v2 = vpop.permute.xlu2 %2189  ;;  %v2148_v22 = vsel %vm2124_vm3, %v2144_v21, %v2146_v1  ;;  %v2147_v15 = vsel %vm2124_vm3, %v2142_v57, %v2144_v21  ;;  %v4965_v26 = vadd.f32 %v2142_v57, %v2065_v63 }
 0x389   : > { %v2154_v28 = vadd.f32 %v2148_v22, %v4895_v10  ;;  %v4969_v7 = vadd.f32 %v2147_v15, %v4923_v54 }
 0x38d   : > { %2490 = vrot.lane.b32.xlu1 %v2484_v14, %s3127_s26  ;;  %2558 = vrot.lane.b32.xlu0 %v2550_v12, %s3126_s23 }
 0x38e   : > { %2556 = vrot.lane.b32.xlu2 %v2549_v25, %s3126_s23 }
 0x38f   : > { %v2166_v5 = vpop.permute.xlu1 %2165  ;;  %v2164_v41 = vpop.permute.xlu0 %2163 }
 0x390   : > { %v2211_v3 = vpop.permute.xlu2 %2210  ;;  %v2170_v45 = vsel %vm2124_vm3, %v2166_v5, %v2168_v18  ;;  %v2174_v49 = vadd.f32 %v2164_v41, %v4937_v43  ;;  %v2265_v43 = vstv %s2861_s10 }
 0x391   : > { %v4977_v10 = vadd.f32 %v2211_v3, %v2132_v11  ;;  %v2176_v48 = vadd.f32 %v2170_v45, %v4908_v50  ;;  %v2527_v45 = vstv %s2873_s18 }
 0x396   : > { %2554 = vrot.lane.b32.xlu2 %v2548_v44, %s3126_s23 }
 0x397   : > { %v2188_v54 = vpop.permute.xlu1 %2187  ;;  %v2186_v63 = vpop.permute.xlu0 %2185 }
 0x398   : > { %v2255_v6 = vpop.permute.xlu2 %2254  ;;  %v2193_v27 = vsel %vm2191_vm6, %v2188_v54, %v2190_v2  ;;  %v2192_v19 = vsel %vm2191_vm6, %v2186_v63, %v2188_v54 }
 0x399   : > { %v4983_v58 = vadd.f32 %v2193_v27, %v2109_v9  ;;  %v4985_v8 = vadd.f32 %v2192_v19, %v2108_v34  ;;  %v2169_v9 = vsel %vm2124_vm3, %v2164_v41, %v2166_v5  ;;  %v2263_v11 = vadd.f32 %v2255_v6, %v2176_v48 }
 0x39a   : > { %v2175_v17 = vadd.f32 %v2169_v9, %v4934_v52  ;;  %vm5278_vm3 = vcmask 1043456  }
 0x39f   : > { %v2209_v36 = vpop.permute.xlu1 %2208  ;;  %v2207_v30 = vpop.permute.xlu0 %2206 }
 0x3a0   : > { %v2342_v38 = vpop.permute.xlu2 %2341  ;;  %v2213_v39 = vsel %vm2191_vm6, %v2209_v36, %v2211_v3  ;;  %v2212_v33 = vsel %vm2191_vm6, %v2207_v30, %v2209_v36  ;;  %v2267_v36 = vmul.f32 %v2265_v43, %v4810_v16  ;;  %v2268_v30 = vmul.f32 %v2265_v43, %v4838_v59 }
 0x3a1   : > { %v4989_v32 = vadd.f32 %v2213_v39, %v2131_v20  ;;  %v4991_v51 = vadd.f32 %v2212_v33, %v2130_v53  ;;  %v2350_v60 = vadd.f32 %v2342_v38, %v2263_v11 }
 0x3a7   : > { %v2253_v24 = vpop.permute.xlu1 %2252  ;;  %v2229_v62 = vpop.permute.xlu0 %2228 }
 0x3a8   : > { %v2427_v37 = vpop.permute.xlu2 %2426  ;;  %v2257_v23 = vsel %vm2191_vm6, %v2253_v24, %v2255_v6 }
 0x3a9   : > { %v2262_v53 = vadd.f32 %v2257_v23, %v2175_v17 }
 0x3af   : > { %v2340_v1 = vpop.permute.xlu1 %2339  ;;  %v2251_v47 = vpop.permute.xlu0 %2250 }
 0x3b0   : > { %v2517_v42 = vpop.permute.xlu2 %2516  ;;  %v2344_v61 = vsel %vm2278_vm8, %v2340_v1, %v2342_v38  ;;  %v2256_v18 = vsel %vm2191_vm6, %v2251_v47, %v2253_v24  ;;  %v2352_v38 = vstv %s2865_s12 }
 0x3b1   : > { %v2349_v20 = vadd.f32 %v2344_v61, %v2262_v53  ;;  %v2261_v15 = vadd.f32 %v2256_v18, %v2174_v49  ;;  %v2529_v53 = vmul.f32 %v2527_v45, %v4855_v35 }
 0x3b7   : > { %v2425_v34 = vpop.permute.xlu1 %2424  ;;  %v2338_v46 = vpop.permute.xlu0 %2337 }
 0x3b8   : > { %v2233_v0 = vpop.permute.xlu2 %2232  ;;  %v2431_v29 = vsel %vm2430_vm2, %v2425_v34, %v2427_v37  ;;  %v2343_v57 = vsel %vm2278_vm8, %v2338_v46, %v2340_v1  ;;  %v2353_v46 = vmul.f32 %v2352_v38, %v4832_v31 }
 0x3b9   : > { %v4997_v40 = vadd.f32 %v2233_v0, %v2154_v28  ;;  %v2437_v52 = vadd.f32 %v2431_v29, %v2349_v20  ;;  %v2348_v14 = vadd.f32 %v2343_v57, %v2261_v15 }
 0x3bb   : > { %v2436_v5 = vadd.f32 %v2425_v34, %v2348_v14 }
 0x3bf   : > { %v2515_v4 = vpop.permute.xlu1 %2514  ;;  %v2429_v21 = vpop.permute.xlu0 %2428 }
 0x3c0   : > { %v2519_v2 = vsel %vm2453_vm13, %v2515_v4, %v2517_v42  ;;  %v5006_v50 = vpop.permute.xlu2 %2293  ;;  %v2432_v22 = vsel %vm2430_vm2, %v2427_v37, %v2429_v21  ;;  %v2440_v37 = vstv %s2869_s13 }
 0x3c1   : > { %v2524_v28 = vadd.f32 %v2519_v2, %v2437_v52  ;;  %v2438_v56 = vadd.f32 %v2432_v22, %v2350_v60  ;;  %v2442_v34 = vmul.f32 %v2440_v37, %v4855_v35  ;;  %v2441_v29 = vmul.f32 %v2440_v37, %v4828_v55 }
 0x3c2   : > { %v2528_v52 = vmul.f32 %v2527_v45, %v4828_v55 }
 0x3c3   : > { %v2525_v12 = vadd.f32 %v2517_v42, %v2438_v56  ;;  %2589 = vrot.lane.b32.xlu0 %v2524_v28, %s3129_s11 }
 0x3c5   : > { %2591 = vrot.lane.b32.xlu1 %v2525_v12, %s3129_s11 }
 0x3c7   : > { %v2231_v25 = vpop.permute.xlu1 %2230  ;;  %v2513_v41 = vpop.permute.xlu0 %2512 }
 0x3c8   : > { %v2234_v3 = vsel %vm2191_vm6, %v2229_v62, %v2231_v25  ;;  %v2235_v44 = vsel %vm2191_vm6, %v2231_v25, %v2233_v0  ;;  %v5013_v54 = vpop.permute.xlu2 %2382  ;;  %v2518_v63 = vsel %vm2453_vm13, %v2513_v41, %v2515_v4  ;;  %v2355_v62 = vmul.f32 %v2352_v38, %v4838_v59 }
 0x3c9   : > { %v2239_v6 = vadd.f32 %v2234_v3, %v4965_v26  ;;  %v2240_v27 = vadd.f32 %v2235_v44, %v4969_v7  ;;  %v2523_v19 = vadd.f32 %v2518_v63, %v2436_v5  ;;  %v2354_v26 = vmul.f32 %v2352_v38, %v4810_v16 }
 0x3ca   : > { %v2266_v7 = vmul.f32 %v2265_v43, %v4832_v31  ;;  %v2443_v59 = vmul.f32 %v2440_v37, %v4859_v13  ;;  %v2530_v31 = vmul.f32 %v2527_v45, %v4859_v13 }
 0x3cb   : > { %2274 = vrot.lane.b32.xlu0 %v2267_v36, %s3125_s21  ;;  %2587 = vrot.lane.b32.xlu2 %v2523_v19, %s3129_s11 }
 0x3cd   : > { %2276 = vrot.lane.b32.xlu1 %v2268_v30, %s3125_s21 }
 0x3cf   : > { %v2298_v39 = vpop.permute.xlu1 %2297  ;;  %v2296_v33 = vpop.permute.xlu0 %2295 }
 0x3d0   : > { %v2381_v24 = vpop.permute.xlu2 %2380  ;;  %v2299_v11 = vsel %vm2278_vm8, %v5006_v50, %v2296_v33  ;;  %v2300_v12 = vsel %vm2278_vm8, %v2296_v33, %v2298_v39  ;;  %v2306_v43 = vadd.f32 %v2298_v39, %v4977_v10 }
 0x3d1   : > { %v2304_v4 = vadd.f32 %v2299_v11, %v4991_v51  ;;  %v2386_v13 = vsel %vm2365_vm5, %v2381_v24, %v5013_v54  ;;  %v2305_v5 = vadd.f32 %v2300_v12, %v4989_v32 }
 0x3d3   : > { %2361 = vrot.lane.b32.xlu0 %v2354_v26, %s3128_s8  ;;  %2272 = vrot.lane.b32.xlu2 %v2266_v7, %s3125_s21  ;;  %v2391_v57 = vadd.f32 %v2386_v13, %v2304_v4  ;;  %s3130_s21 = smov 96  }
 0x3d5   : > { %2363 = vrot.lane.b32.xlu1 %v2355_v62, %s3128_s8 }
 0x3d7   : > { %v5029_v1 = vpop.permute.xlu1 %2319  ;;  %v2318_v47 = vpop.permute.xlu0 %2317 }
 0x3d8   : > { %v2471_v42 = vpop.permute.xlu2 %2470  ;;  %v2322_v9 = vsel %vm2278_vm8, %v2318_v47, %v5029_v1  ;;  %v2328_v32 = vadd.f32 %v5029_v1, %v4997_v40 }
 0x3d9   : > { %v2327_v16 = vadd.f32 %v2322_v9, %v2240_v27 }
 0x3db   : > { %2449 = vrot.lane.b32.xlu0 %v2442_v34, %s3127_s26  ;;  %2359 = vrot.lane.b32.xlu2 %v2353_v46, %s3128_s8  ;;  %s2669_s8 = scalar_lea.sflag [#allocation5], %s3247_s4 }
 0x3dd   : > { %2451 = vrot.lane.b32.xlu1 %v2443_v59, %s3127_s26 }
 0x3df   : > { %v2316_v23 = vpop.permute.xlu1 %2315  ;;  %v2385_v0 = vpop.permute.xlu0 %2384 }
 0x3e0   : > { %v2321_v17 = vsel %vm2278_vm8, %v2316_v23, %v2318_v47  ;;  %v2469_v61 = vpop.permute.xlu2 %2468  ;;  %v2387_v25 = vsel %vm2365_vm5, %v5013_v54, %v2385_v0  ;;  %v2393_v41 = vadd.f32 %v2385_v0, %v2306_v43 }
 0x3e1   : > { %v2326_v48 = vadd.f32 %v2321_v17, %v2239_v6  ;;  %v2474_v21 = vsel %vm2453_vm13, %v2469_v61, %v2471_v42  ;;  %v2392_v44 = vadd.f32 %v2387_v25, %v2305_v5 }
 0x3e2   : > { %v2479_v22 = vadd.f32 %v2474_v21, %v2391_v57 }
 0x3e3   : > { %2536 = vrot.lane.b32.xlu0 %v2529_v53, %s3126_s23  ;;  %2447 = vrot.lane.b32.xlu2 %v2441_v29, %s3127_s26 }
 0x3e5   : > { %2538 = vrot.lane.b32.xlu1 %v2530_v31, %s3126_s23 }
 0x3e7   : > { %v2407_v20 = vpop.permute.xlu1 %2406  ;;  %v2405_v18 = vpop.permute.xlu0 %2404 }
 0x3e8   : > { %v2557_v49 = vpop.permute.xlu2 %2556  ;;  %v2409_v60 = vsel %vm2365_vm5, %v2405_v18, %v2407_v20  ;;  %v2415_v39 = vadd.f32 %v2407_v20, %v2328_v32 }
 0x3e9   : > { %v2414_v35 = vadd.f32 %v2409_v60, %v2327_v16 }
 0x3eb   : > { %2534 = vrot.lane.b32.xlu2 %v2528_v52, %s3126_s23  ;;  %s2883_s23 = sshll.u32 %s3175_s2, 3  ;;  %s203_s2 = scalar_lea.vmem [#allocation8], %s2775_s6 }
 0x3ec   : > { %s2680_s28 = scalar_lea.hbm %s5125_s3, %s2883_s23  ;;  %s2682_s5 = sshll.u32 %s203_s2, 4  ;;  %s2683_s5 = int_to_ptr.vmem [resolvable:$true] %s2682_s5 }
 0x3ed   : > { %s2684_s7 = sshll.u32 %s2680_s28, 4  ;;  %s3047_s6 = scalar_lea.hbm %s5125_s3, 16  ;;  %s2685_s7 = int_to_ptr.hbm [resolvable:$true] %s2684_s7 }
 0x3ee   : > { %s3041_s19 = sshra.s32 %s2685_s7, 4  ;;  %s3042_s19 = int_to_ptr.hbm [resolvable:$true] %s3041_s19 }
 0x3ef   : > { %v2403_v2 = vpop.permute.xlu1 %2402  ;;  %v2473_v50 = vpop.permute.xlu0 %2472  ;;  %s3043_s24 = scalar_lea.hbm %s3042_s19, 8  ;;  %p3048_p9 = scmp.lt.s32.totalorder %s3042_s19, %s5125_s3 }
 0x3f0   : > { %v2408_v15 = vsel %vm2365_vm5, %v2403_v2, %v2405_v18  ;;  %v2555_v28 = vpop.permute.xlu2 %2554  ;;  %v2475_v3 = vsel %vm2453_vm13, %v2471_v42, %v2473_v50  ;;  %v2481_v63 = vadd.f32 %v2473_v50, %v2393_v41  ;;  %v2618_v41 = vstv %s2617_s22  ;;  %p3044_p1 = scmp.ne.s32.totalorder %s3042_s19, %s3043_s24  ;;  %p3049_p10 = scmp.lt.s32.totalorder %s3047_s6, %s3043_s24 }
 0x3f1   : > { %v2413_v56 = vadd.f32 %v2408_v15, %v2326_v48  ;;  %v2560_v14 = vsel %vm2430_vm2, %v2555_v28, %v2557_v49  ;;  %v2480_v6 = vadd.f32 %v2475_v3, %v2392_v44 }
 0x3f2   : > { %v2565_v55 = vadd.f32 %v2560_v14, %v2479_v22  ;;  %p3045_p4 = pnand %p3044_p1, %p3220_p3  ;;  %p3050_p2 = por %p3049_p10, %p3048_p9 }
 0x3f4   : > { %2571 = vrot.lane.b32.xlu2 %v2565_v55, %s3129_s11  ;;  %p3046_p8 = pneg %p3045_p4 }
 0x3f6   : > { %p3051_p11 = pnand %p3050_p2, %p3046_p8 }
 0x3f7   : > { %v2493_v51 = vpop.permute.xlu0 %2492  ;;  %v2495_v10 = vpop.permute.xlu1 %2494 }
 0x3f8   : > { %v2497_v33 = vsel %vm2453_vm13, %v2493_v51, %v2495_v10  ;;  %v2503_v62 = vadd.f32 %v2495_v10, %v2415_v39 }
 0x3f9   : > { %v2502_v47 = vadd.f32 %v2497_v33, %v2414_v35 }
 0x3ff   : > { %v2559_v27 = vpop.permute.xlu0 %2558  ;;  %v2491_v38 = vpop.permute.xlu1 %2490 }
 0x400   : > { %v2561_v19 = vsel %vm2430_vm2, %v2557_v49, %v2559_v27  ;;  %v2567_v36 = vadd.f32 %v2559_v27, %v2481_v63  ;;  %v2496_v54 = vsel %vm2453_vm13, %v2491_v38, %v2493_v51 }
 0x401   : > { %v2566_v30 = vadd.f32 %v2561_v19, %v2480_v6  ;;  %v2501_v24 = vadd.f32 %v2496_v54, %v2413_v56 }
 0x402   : > { %2575 = vrot.lane.b32.xlu1 %v2567_v36, %s3129_s11 }
 0x403   : > { %2573 = vrot.lane.b32.xlu0 %v2566_v30, %s3129_s11 }
 0x425   : > { %v2588_v26 = vpop.permute.xlu2 %2587 }
 0x42d   : > { %v2273_v40 = vpop.permute.xlu2 %2272 }
 0x435   : > { %v2590_v7 = vpop.permute.xlu0 %2589  ;;  %v2360_v45 = vpop.permute.xlu2 %2359 }
 0x436   : > { %v2593_v37 = vsel %vm2577_vm11, %v2588_v26, %v2590_v7 }
 0x437   : > { %v2598_v42 = vadd.f32 %v2593_v37, %v2501_v24  ;;  %v2592_v9 = vpop.permute.xlu1 %2591 }
 0x438   : > { %v2594_v16 = vsel %vm2577_vm11, %v2590_v7, %v2592_v9  ;;  %v2600_v34 = vadd.f32 %v2592_v9, %v2503_v62 }
 0x439   : > { %v2599_v46 = vadd.f32 %v2594_v16, %v2502_v47  ;;  %2604 = vrot.lane.b32.xlu2 %v2598_v42, %s3130_s21 }
 0x43a   : > { %2608 = vrot.lane.b32.xlu1 %v2600_v34, %s3130_s21 }
 0x43b   : > { %2606 = vrot.lane.b32.xlu0 %v2599_v46, %s3130_s21 }
 0x43d   : > { %v2275_v59 = vpop.permute.xlu0 %2274  ;;  %v2448_v17 = vpop.permute.xlu2 %2447 }
 0x43e   : > { %v2279_v29 = vsel %vm2278_vm8, %v2273_v40, %v2275_v59 }
 0x43f   : > { %v2277_v1 = vpop.permute.xlu1 %2276  ;;  %v2283_v60 = vadd.f32 %v2279_v29, %v4985_v8 }
 0x440   : > { %v2280_v31 = vsel %vm2278_vm8, %v2275_v59, %v2277_v1 }
 0x441   : > { %v2284_v35 = vadd.f32 %v2280_v31, %v4983_v58  ;;  %v5279_v31 = vld [vmem:[#allocation12_spill] sm:$0xff] }
 0x445   : > { %v2362_v0 = vpop.permute.xlu0 %2361  ;;  %v2535_v53 = vpop.permute.xlu2 %2534 }
 0x446   : > { %v2366_v18 = vsel %vm2365_vm5, %v2360_v45, %v2362_v0 }
 0x447   : > { %v2364_v23 = vpop.permute.xlu1 %2363  ;;  %v2370_v13 = vadd.f32 %v2366_v18, %v2283_v60 }
 0x448   : > { %v2367_v49 = vsel %vm2365_vm5, %v2362_v0, %v2364_v23 }
 0x449   : > { %v2371_v21 = vadd.f32 %v2367_v49, %v2284_v35 }
 0x44d   : > { %v2450_v48 = vpop.permute.xlu0 %2449 }
 0x44e   : > { %v2454_v52 = vsel %vm2453_vm13, %v2448_v17, %v2450_v48  ;;  %v2572_v28 = vpop.permute.xlu2 %2571 }
 0x44f   : > { %v2452_v61 = vpop.permute.xlu1 %2451  ;;  %v2458_v50 = vadd.f32 %v2454_v52, %v2370_v13 }
 0x450   : > { %v2455_v4 = vsel %vm2453_vm13, %v2450_v48, %v2452_v61 }
 0x451   : > { %v2459_v22 = vadd.f32 %v2455_v4, %v2371_v21 }
 0x455   : > { %v2537_v20 = vpop.permute.xlu0 %2536 }
 0x456   : > { %v2540_v57 = vsel %vm2430_vm2, %v2535_v53, %v2537_v20 }
 0x457   : > { %v2539_v11 = vpop.permute.xlu1 %2538  ;;  %v2544_v56 = vadd.f32 %v2540_v57, %v2458_v50 }
 0x458   : > { %v2541_v2 = vsel %vm2430_vm2, %v2537_v20, %v2539_v11 }
 0x459   : > { %v2545_v14 = vadd.f32 %v2541_v2, %v2459_v22 }
 0x474   : > { %v2576_v15 = vpop.permute.xlu1 %2575 }
 0x475   : > { %v2574_v55 = vpop.permute.xlu0 %2573 }
 0x476   : > { %v2578_v8 = vsel %vm2577_vm11, %v2572_v28, %v2574_v55  ;;  %v2579_v58 = vsel %vm2577_vm11, %v2574_v55, %v2576_v15 }
 0x477   : > { %v2582_v51 = vadd.f32 %v2578_v8, %v2544_v56  ;;  %v2583_v12 = vadd.f32 %v2579_v58, %v2545_v14 }
 0x493   : > { %v2605_v25 = vpop.permute.xlu2 %2604 }
 0x4ac   : > { %v2609_v43 = vpop.permute.xlu1 %2608 }
 0x4ad   : > { %v2607_v5 = vpop.permute.xlu0 %2606 }
 0x4ae   : > { %v2611_v3 = vsel %vm2610_vm7, %v2605_v25, %v2607_v5  ;;  %v2612_v44 = vsel %vm2610_vm7, %v2607_v5, %v2609_v43 }
 0x4af   : > { %v2615_v63 = vadd.f32 %v2611_v3, %v2582_v51  ;;  %v2616_v6 = vadd.f32 %v2612_v44, %v2583_v12 }
 0x4b1   : > { %v2619_v27 = vadd.f32 %v2618_v41, %v2615_v63  ;;  %v2620_v19 = vadd.f32 %v2618_v41, %v2616_v6 }
 0x4b3   : > { %v2875_v36 = vmul.f32 -1.442695, %v2619_v27  ;;  %v2876_v30 = vmul.f32 -1.442695, %v2620_v19 }
 0x4b5   : > { %2974 = vpow2.f32 %v2875_v36 }
 0x4b6   : > { %2976 = vpow2.f32 %v2876_v30 }
 0x4bb   : > { %v2975_v10 = vpop.eup %2974 }
 0x4bc   : > { %v2977_v38 = vpop.eup %2976  ;;  %v2627_v32 = vadd.f32 1.0, %v2975_v10 }
 0x4bd   : > { %v2628_v54 = vadd.f32 1.0, %v2977_v38 }
 0x4be   : > { %2978 = vrcp.f32 %v2627_v32  ;;  %v2640_v47 = vand.u32 2147483648, %v2627_v32  ;;  %v2638_v9 = vand.u32 2147483647, %v2627_v32  ;;  %vm2634_vm10 = vweird.f32 %v2627_v32 }
 0x4bf   : > { %2980 = vrcp.f32 %v2628_v54  ;;  %v2655_v42 = vand.u32 2147483648, %v2628_v54  ;;  %v2653_v34 = vand.u32 2147483647, %v2628_v54  ;;  %vm2649_vm14 = vweird.f32 %v2628_v54 }
 0x4c0   : > { %v2641_v59 = vor.u32 1.1754944e-38, %v2640_v47  ;;  %vm2639_vm1 = vcmp.eq.f32.partialorder %v2638_v9, 8.507059e+37 }
 0x4c1   : > { %v2656_v45 = vor.u32 1.1754944e-38, %v2655_v42  ;;  %vm2654_vm9 = vcmp.eq.f32.partialorder %v2653_v34, 8.507059e+37 }
 0x4c4   : > { %v2979_v39 = vpop.eup %2978 }
 0x4c5   : > { %v2981_v33 = vpop.eup %2980  ;;  %v2630_v24 = vmul.f32 %v2979_v39, %v2627_v32  ;;  %vm2635_vm0 = vweird.f32 %v2979_v39 }
 0x4c6   : > { %v2645_v26 = vmul.f32 %v2981_v33, %v2628_v54  ;;  %vm2650_vm4 = vweird.f32 %v2981_v33  ;;  %vm2636_vm12 = vmor %vm2634_vm10, %vm2635_vm0 }
 0x4c7   : > { %v2631_v7 = vsub.f32 1.0, %v2630_v24  ;;  %vm2651_vm15 = vmor %vm2649_vm14, %vm2650_vm4 }
 0x4c8   : > { %v2646_v62 = vsub.f32 1.0, %v2645_v26 }
 0x4c9   : > { %v2632_v37 = vmul.f32 %v2979_v39, %v2631_v7 }
 0x4ca   : > { %v2647_v16 = vmul.f32 %v2981_v33, %v2646_v62 }
 0x4cb   : > { %v2633_v46 = vadd.f32 %v2979_v39, %v2632_v37 }
 0x4cc   : > { %v2648_v40 = vadd.f32 %v2981_v33, %v2647_v16 }
 0x4cd   : > { %v2637_v1 = vsel %vm2636_vm12, %v2979_v39, %v2633_v46 }
 0x4ce   : > { %v2652_v23 = vsel %vm2651_vm15, %v2981_v33, %v2648_v40  ;;  %v2642_v0 = vsel %vm2639_vm1, %v2641_v59, %v2637_v1 }
 0x4cf   : > { %v2657_v17 = vsel %vm2654_vm9, %v2656_v45, %v2652_v23  ;;  %v2659_v48 = vperm.slane %v2642_v0, 0 }
 0x4d0   : > { %v2660_v61 = vperm.slane %v2657_v17, 0 }
 0x4d2   : > { %v2663_v53 = vrot.slane %v2660_v61, 4 }
 0x4d4   : > { %v2664_v29 = vsel %vm5278_vm3, %v2659_v48, %v2663_v53 }
 0x4d5   : > { %v2666_v11 = vmul.f32 %v2664_v29, %v5279_v31 }
 0x4d7   : > { %2667 = vst [vmem:[%s203_s2] sm:$0xff] %v2666_v11 }
 0x4d8   : > { %3054 = shalt.err (!%p3051_p11)
}
 0x4d9   : > { %2890 = dma.vmem_to_hbm [thread:$0]  (%p3220_p3), %s2683_s5, 128, %s2685_s7, %s2669_s8  }
 0x4da PF: > { %s2696_s4 = sand.u32 1, %s3085_s14   ;;  %p5280_p12 = scmp.ge.s32.totalorder %s3097_s17, 2 }
 0x4db   : > { %s2697_s13 = scalar_lea.sflag [#allocation5], %s2696_s4 }
 0x4dc   : > { %p2901_p13 = pnand %p5280_p12, %p3189_p6 }
 0x4de   : > { %p2902_p0 = pneg %p2901_p13 }
 0x4e0   : > { %3080 = dma.done.wait (%p2902_p0), %s2697_s13, 128  }
 0x4e1   : > { %3082 = vsyncadd (%p2902_p0), %s2697_s13, 4294967168  ;;  %p18_p5 = scmp.ge.s32.totalorder %s3205_s25, 4   ;;  %s5281_s14 = smov %s3089_s15 }
 0x4e2   : > { %s5282_s15 = smov %s3093_s16  ;;  %s5283_s16 = smov %s3215_s29 }
 0x4e3   : > { %s5284_s17 = smov %s3205_s25  ;;  %20 = sbr.rel (!%p18_p5) target bundleno = 8 (0x8), region = 82 }
 0x4e8   :  { %2703 = vsyncpa [#allocation4], 1 }
 0x4e9   :  { %2705 = vsyncpa [#allocation4 + $0x1], 1 }
 0x4ea   :  { %2706 = vsyncpa [#allocation5], 1 }
 0x4eb   :  { %2708 = vsyncpa [#allocation5 + $0x1], 1 }
 0x4ec   :  { %2709 = vsyncpa [#allocation6], 1 }
 0x4ed   :  { %2711 = vsyncpa [#allocation6 + $0x1], 1 }

</bundles_post_ra>
